<compile_context>
chip_gen: v5e
topology: v5e:2x2
jax: 0.10.0
libtpu: 0.0.40
codegen_flags: <defaults>
</compile_context>

<pallas_src>
import functools

import jax
import jax.numpy as jnp
import numpy as np
from jax.experimental import pallas as pl
from jax.experimental.pallas import tpu as pltpu


# ----------------------------------------------------------------------------
# Fused bidirectional GRU layer kernel.
# grid = (S // T_BLK,), serial ("arbitrary").  Per grid step:
#   - load the forward x block (time block tb) and the backward x block
#     (time block nT-1-tb), each as P input "parts",
#   - compute the block's input projection Gx (one fused 3H-wide dot per part
#     per direction, independent of the serial chain -> pipelines freely),
#   - run T_BLK statically-unrolled recurrence steps, interleaving the fwd and
#     bwd hidden-state chains (one fused (B,H)@(H,3H) dot per chain per step),
#   - carry the hidden states in the grid-resident (D,B,H) output block.
# ----------------------------------------------------------------------------
def make_gru_layer_kernel(t_blk, num_dirs, num_parts):
    def kernel(*refs):
        i = 0
        xf_refs = refs[i:i + num_parts]; i += num_parts          # (TB,B,Ein) x P
        if num_dirs == 2:
            xb_refs = refs[i:i + num_parts]; i += num_parts      # (TB,B,Ein) x P
        wih_ref, bih_ref, whh_ref, bhn_ref = refs[i:i + 4]; i += 4
        # wih: (D,P,Ein,3H)  bih: (D,1,3H)  whh: (D,H,3H)  bhn: (D,1,H)
        yf_ref = refs[i]; i += 1                                  # (TB,B,H)
        if num_dirs == 2:
            yb_ref = refs[i]; i += 1                              # (TB,B,H)
        hfin_ref = refs[i]                                        # (D,B,H) resident

        H = bhn_ref.shape[-1]
        B = yf_ref.shape[1]
        TB = t_blk
        tb = pl.program_id(0)

        @pl.when(tb == 0)
        def _init():
            hfin_ref[...] = jnp.zeros_like(hfin_ref)

        def gx_dir(x_refs, d):
            # Hoisted, fused input projection for the whole time block:
            # one (TB*B, Ein) @ (Ein, 3H) dot per input part.
            Ein = x_refs[0].shape[-1]
            acc = jnp.dot(x_refs[0][...].reshape(TB * B, Ein), wih_ref[d, 0],
                          preferred_element_type=jnp.float32)
            for p in range(1, num_parts):
                acc = acc + jnp.dot(x_refs[p][...].reshape(TB * B, Ein),
                                    wih_ref[d, p],
                                    preferred_element_type=jnp.float32)
            return (acc + bih_ref[d]).reshape(TB, B, 3 * H)

        gx_f = gx_dir(xf_refs, 0)
        if num_dirs == 2:
            gx_b = gx_dir(xb_refs, 1)

        def cell(gx, h, whh, bhn):
            # One fused hidden matmul per step; gates sliced from (B, 3H).
            gh = jnp.dot(h, whh, preferred_element_type=jnp.float32)
            r = jax.nn.sigmoid(gx[:, 0 * H:1 * H] + gh[:, 0 * H:1 * H])
            z = jax.nn.sigmoid(gx[:, 1 * H:2 * H] + gh[:, 1 * H:2 * H])
            n = jnp.tanh(gx[:, 2 * H:3 * H] + r * (gh[:, 2 * H:3 * H] + bhn))
            return (1.0 - z) * n + z * h

        whh_f, bhn_f, h_f = whh_ref[0], bhn_ref[0], hfin_ref[0]
        if num_dirs == 2:
            whh_b, bhn_b, h_b = whh_ref[1], bhn_ref[1], hfin_ref[1]

        for step in range(TB):              # static unroll; static indices only
            h_f = cell(gx_f[step], h_f, whh_f, bhn_f)
            yf_ref[step] = h_f
            if num_dirs == 2:
                j = TB - 1 - step           # backward in-block index (static)
                h_b = cell(gx_b[j], h_b, whh_b, bhn_b)
                yb_ref[j] = h_b

        hfin_ref[0] = h_f
        if num_dirs == 2:
            hfin_ref[1] = h_b

    return kernel


def gru_layer_pallas(x_parts, wih, bih, whh, bhn, t_blk, *,
                     vmem_limit_bytes=None):
    """One (bi)directional GRU layer.

    x_parts: list of P arrays, each (S, B, Ein)   (P=1 for layer 0, P=D after)
    wih: (D, P, Ein, 3H)   fused [r|z|n] input weights, transposed
    bih: (D, 1, 3H)        b_ih (+ b_hh for r,z gates folded in)
    whh: (D, H, 3H)        fused [r|z|n] hidden weights, transposed
    bhn: (D, 1, H)         b_hn (stays inside the r-multiplied term)

    Returns ([y_fwd, y_bwd], h_final) with y_*: (S, B, H), h_final: (D, B, H).
    """
    P = len(x_parts)
    S, B, _ = x_parts[0].shape
    D = whh.shape[0]
    H = whh.shape[1]
    assert S % t_blk == 0, "sequence length must be divisible by the time block"
    nT = S // t_blk

    def fwd_x(tb):
        return (tb, 0, 0)

    def bwd_x(tb):
        return (nT - 1 - tb, 0, 0)

    in_specs = []
    inputs = []
    for p in range(P):
        in_specs.append(pl.BlockSpec((t_blk, B, x_parts[p].shape[-1]), fwd_x))
        inputs.append(x_parts[p])
    if D == 2:
        for p in range(P):
            in_specs.append(pl.BlockSpec((t_blk, B, x_parts[p].shape[-1]),
                                         bwd_x))
            inputs.append(x_parts[p])
    in_specs += [
        pl.BlockSpec(wih.shape, lambda tb: (0, 0, 0, 0)),
        pl.BlockSpec(bih.shape, lambda tb: (0, 0, 0)),
        pl.BlockSpec(whh.shape, lambda tb: (0, 0, 0)),
        pl.BlockSpec(bhn.shape, lambda tb: (0, 0, 0)),
    ]
    inputs += [wih, bih, whh, bhn]

    out_shapes = [jax.ShapeDtypeStruct((S, B, H), jnp.float32)]
    out_specs = [pl.BlockSpec((t_blk, B, H), fwd_x)]
    if D == 2:
        out_shapes.append(jax.ShapeDtypeStruct((S, B, H), jnp.float32))
        out_specs.append(pl.BlockSpec((t_blk, B, H), bwd_x))
    # Final hidden states: grid-resident block, doubles as the carried state.
    out_shapes.append(jax.ShapeDtypeStruct((D, B, H), jnp.float32))
    out_specs.append(pl.BlockSpec((D, B, H), lambda tb: (0, 0, 0)))

    extra = {"vmem_limit_bytes": vmem_limit_bytes} if vmem_limit_bytes else {}
    outs = pl.pallas_call(
        make_gru_layer_kernel(t_blk, D, P),
        out_shape=tuple(out_shapes),
        grid_spec=pltpu.PrefetchScalarGridSpec(
            num_scalar_prefetch=0,
            grid=(nT,),
            in_specs=in_specs,
            out_specs=out_specs,
        ),
        compiler_params=pltpu.CompilerParams(
            dimension_semantics=("arbitrary",),   # recurrence is serial in time
            **extra),
    )(*inputs)

    if D == 2:
        y_f, y_b, hfin = outs
        return [y_f, y_b], hfin
    y_f, hfin = outs
    return [y_f], hfin


# ----------------------------------------------------------------------------
# Classifier head: out = [h_fwd | h_bwd] @ W^T + b, consuming the (D, B, H)
# final-hidden output of the last GRU layer directly (no gather from y).
# TODO(synk): for production, pad the output dim O to 128 and slice after.
# ----------------------------------------------------------------------------
def head_kernel(h_ref, w_ref, b_ref, o_ref):
    D = h_ref.shape[0]
    acc = jnp.dot(h_ref[0], w_ref[0], preferred_element_type=jnp.float32)
    for d in range(1, D):
        acc = acc + jnp.dot(h_ref[d], w_ref[d],
                            preferred_element_type=jnp.float32)
    o_ref[...] = acc + b_ref[...]


def head_pallas(hfin, out_w, out_b):
    """hfin: (D, B, H); out_w: (O, D*H) PyTorch layout; out_b: (O,)."""
    D, B, H = hfin.shape
    O = out_w.shape[0]
    w = jnp.transpose(out_w.reshape(O, D, H), (1, 2, 0))   # (D, H, O)
    b = out_b.reshape(1, O).astype(jnp.float32)
    return pl.pallas_call(
        head_kernel,
        out_shape=jax.ShapeDtypeStruct((B, O), jnp.float32),
        grid_spec=pltpu.PrefetchScalarGridSpec(
            num_scalar_prefetch=0,
            grid=(1,),
            in_specs=[
                pl.BlockSpec((D, B, H), lambda i: (0, 0, 0)),
                pl.BlockSpec((D, H, O), lambda i: (0, 0, 0)),
                pl.BlockSpec((1, O), lambda i: (0, 0)),
            ],
            out_specs=pl.BlockSpec((B, O), lambda i: (0, 0)),
        ),
    )(hfin, w, b)


# ----------------------------------------------------------------------------
# Parameter init (PyTorch nn.GRU / nn.Linear layout) and kernel-layout prep.
# ----------------------------------------------------------------------------
def init_params(key, vocab_size, embedding_dim, hidden_dim, output_dim,
                n_layers, bidirectional):
    keys = jax.random.split(key, 64)
    ki = iter(keys)
    bound = 1.0 / np.sqrt(hidden_dim)

    def u(k, shape):
        return jax.random.uniform(k, shape, jnp.float32, -bound, bound)

    params = {
        "emb_table": jax.random.normal(next(ki), (vocab_size, embedding_dim),
                                       jnp.float32) * 0.02,
        "gru": [],
    }
    num_dirs = 2 if bidirectional else 1
    for layer in range(n_layers):
        in_dim = embedding_dim if layer == 0 else hidden_dim * num_dirs
        layer_p = {}
        for d in range(num_dirs):
            layer_p[d] = dict(
                w_ih=u(next(ki), (3 * hidden_dim, in_dim)),
                w_hh=u(next(ki), (3 * hidden_dim, hidden_dim)),
                b_ih=u(next(ki), (3 * hidden_dim,)),
                b_hh=u(next(ki), (3 * hidden_dim,)),
            )
        params["gru"].append(layer_p)
    out_in = hidden_dim * num_dirs
    out_bound = 1.0 / np.sqrt(out_in)
    params["out_w"] = jax.random.uniform(next(ki), (output_dim, out_in),
                                         jnp.float32, -out_bound, out_bound)
    params["out_b"] = jax.random.uniform(next(ki), (output_dim,),
                                         jnp.float32, -out_bound, out_bound)
    return params


def _prep_gru_layer(p_list, H, num_parts):
    """Repack PyTorch-layout GRU weights into fused [r|z|n] kernel layouts."""
    wih_all, bih_all, whh_all, bhn_all = [], [], [], []
    for p_dir in p_list:
        w_ih, w_hh = p_dir["w_ih"], p_dir["w_hh"]       # (3H, in), (3H, H)
        b_ih, b_hh = p_dir["b_ih"], p_dir["b_hh"]       # (3H,), (3H,)
        in_dim = w_ih.shape[1]
        Ein = in_dim // num_parts
        # (P, Ein, 3H): per-part column slice, transposed; gate order preserved.
        wih_d = jnp.stack([jnp.transpose(w_ih[:, p * Ein:(p + 1) * Ein])
                           for p in range(num_parts)], axis=0)
        # b_hh for the r/z gates is folded into the hoisted projection bias.
        bih_d = jnp.concatenate([b_ih[:2 * H] + b_hh[:2 * H],
                                 b_ih[2 * H:]]).reshape(1, 3 * H)
        whh_d = jnp.transpose(w_hh)                      # (H, 3H) fused
        bhn_d = b_hh[2 * H:].reshape(1, H)               # (1, H)
        wih_all.append(wih_d)
        bih_all.append(bih_d)
        whh_all.append(whh_d)
        bhn_all.append(bhn_d)
    return (jnp.stack(wih_all), jnp.stack(bih_all),
            jnp.stack(whh_all), jnp.stack(bhn_all))


# ----------------------------------------------------------------------------
# Forward pass
# ----------------------------------------------------------------------------
def bert_gru_sentiment_forward(params, ids, mask, *, n_layers, bidirectional,
                               t_blk=None, vmem_limit_bytes=None):
    del mask  # stand-in "bert" (embedding lookup) ignores the attention mask
    # --- "bert" + dropout (identity at inference) ---
    embedded = params["emb_table"][ids]                 # (B, S, E) batch_first
    x = jnp.transpose(embedded, (1, 0, 2))              # (S, B, E)
    S = x.shape[0]
    if t_blk is None:
        t_blk = S   # short sequences: whole recurrence in one grid step
        # TODO(synk): for long S, cap t_blk by the VMEM budget (halve on v7x).

    D = 2 if bidirectional else 1
    H = params["gru"][0][0]["w_hh"].shape[1]

    x_parts = [x]                                        # layer 0: one part
    hfin = None
    for layer in range(n_layers):
        p_list = [params["gru"][layer][d] for d in range(D)]
        wih, bih, whh, bhn = _prep_gru_layer(p_list, H, len(x_parts))
        x_parts, hfin = gru_layer_pallas(x_parts, wih, bih, whh, bhn, t_blk,
                                         vmem_limit_bytes=vmem_limit_bytes)
        # inter-layer dropout: identity at inference; next layer consumes the
        # fwd/bwd outputs as two parts (no HBM concat).

    # dropout on hidden: identity at inference.
    return head_pallas(hfin, params["out_w"], params["out_b"])


# ----------------------------------------------------------------------------
# Pure-JAX reference (for correctness check)
# ----------------------------------------------------------------------------
def gru_layer_ref(x_sbE, w_ih, w_hh, b_ih, b_hh):
    S, B, _ = x_sbE.shape
    H = w_hh.shape[1]
    h = jnp.zeros((B, H), jnp.float32)
    ys = []
    for t in range(S):
        gx = x_sbE[t] @ w_ih.T + b_ih
        gh = h @ w_hh.T + b_hh
        r = jax.nn.sigmoid(gx[:, :H] + gh[:, :H])
        z = jax.nn.sigmoid(gx[:, H:2 * H] + gh[:, H:2 * H])
        n = jnp.tanh(gx[:, 2 * H:] + r * gh[:, 2 * H:])
        h = (1.0 - z) * n + z * h
        ys.append(h)
    return jnp.stack(ys), h


def forward_ref(params, ids, mask, *, n_layers, bidirectional):
    del mask
    embedded = params["emb_table"][ids]
    inp = jnp.transpose(embedded, (1, 0, 2))
    h_final = None
    for layer in range(n_layers):
        p_f = params["gru"][layer][0]
        y_f, h_f = gru_layer_ref(inp, p_f["w_ih"], p_f["w_hh"],
                                 p_f["b_ih"], p_f["b_hh"])
        if bidirectional:
            p_b = params["gru"][layer][1]
            y_b_rev, h_b = gru_layer_ref(inp[::-1], p_b["w_ih"], p_b["w_hh"],
                                         p_b["b_ih"], p_b["b_hh"])
            inp = jnp.concatenate([y_f, y_b_rev[::-1]], axis=-1)
            h_final = (h_f, h_b)
        else:
            inp = y_f
            h_final = (h_f,)
    hidden = jnp.concatenate(h_final, axis=-1) if bidirectional else h_final[0]
    return hidden @ params["out_w"].T + params["out_b"]


# ----------------------------------------------------------------------------
if __name__ == "__main__":
    # Small, module-consistent shapes.
    B, S = 2, 8               # batch, sequence length
    VOCAB = 50
    EMBEDDING_DIM = 32        # bert.config.hidden_size (stand-in)
    HIDDEN_DIM = 32
    OUTPUT_DIM = 2
    N_LAYERS = 2
    BIDIRECTIONAL = True

    key = jax.random.PRNGKey(0)
    k_param, k_ids = jax.random.split(key)

    params = init_params(k_param, VOCAB, EMBEDDING_DIM, HIDDEN_DIM,
                         OUTPUT_DIM, N_LAYERS, BIDIRECTIONAL)

    ids = jax.random.randint(k_ids, (B, S), 0, VOCAB, dtype=jnp.int32)
    mask = jnp.ones((B, S), dtype=jnp.int32)

    fwd = jax.jit(functools.partial(bert_gru_sentiment_forward,
                                    n_layers=N_LAYERS,
                                    bidirectional=BIDIRECTIONAL,
                                    t_blk=S))          # whole sequence per step

    out = jax.block_until_ready(fwd(params, ids, mask))

    ref = jax.block_until_ready(
        forward_ref(params, ids, mask,
                    n_layers=N_LAYERS, bidirectional=BIDIRECTIONAL))

    np.testing.assert_allclose(np.asarray(out), np.asarray(ref),
                               rtol=2e-2, atol=2e-2)
    assert out.shape == (B, OUTPUT_DIM)
    print("KERNEL_OK")
</pallas_src>

<mosaic_0001>
module attributes {stable_mosaic.version = 11 : i64} {
  func.func @head_kernel(%arg0: i32, %arg1: memref<2x2x32xf32, #tpu.memory_space<vmem>>, %arg2: memref<2x32x2xf32, #tpu.memory_space<vmem>>, %arg3: memref<1x2xf32, #tpu.memory_space<vmem>>, %arg4: memref<2x2xf32, #tpu.memory_space<vmem>>) attributes {dimension_semantics = [#tpu.dimension_semantics<arbitrary>], iteration_bounds = array<i64: 1>, scalar_prefetch = 0 : i64, scratch_operands = 0 : i64, tpu.core_type = #tpu.core_type<tc>, window_params = [{pipeline_mode = #tpu.pipeline_mode<synchronous>, transform_indices = @transform_0, window_bounds = array<i64: 2, 2, 32>}, {pipeline_mode = #tpu.pipeline_mode<synchronous>, transform_indices = @transform_1, window_bounds = array<i64: 2, 32, 2>}, {pipeline_mode = #tpu.pipeline_mode<synchronous>, transform_indices = @transform_2, window_bounds = array<i64: 1, 2>}, {pipeline_mode = #tpu.pipeline_mode<synchronous>, transform_indices = @transform_3, window_bounds = array<i64: 2, 2>}]} {
    %c0 = arith.constant 0 : index
    %c0_0 = arith.constant 0 : index
    %c0_1 = arith.constant 0 : index
    %0 = vector.load %arg1[%c0, %c0_0, %c0_1] : memref<2x2x32xf32, #tpu.memory_space<vmem>>, vector<1x2x32xf32>
    %1 = vector.shape_cast %0 : vector<1x2x32xf32> to vector<2x32xf32>
    %c0_2 = arith.constant 0 : index
    %c0_3 = arith.constant 0 : index
    %c0_4 = arith.constant 0 : index
    %2 = vector.load %arg2[%c0_2, %c0_3, %c0_4] : memref<2x32x2xf32, #tpu.memory_space<vmem>>, vector<1x32x2xf32>
    %3 = vector.shape_cast %2 : vector<1x32x2xf32> to vector<32x2xf32>
    %cst = arith.constant dense<0.000000e+00> : vector<2x2xf32>
    %4 = tpu.matmul %1, %3, %cst {dimension_numbers = #tpu.dot_dimension_numbers<[1], [0], [0], [1], [0, 0, 1, 1], [], []>} : vector<2x32xf32>, vector<32x2xf32>, vector<2x2xf32> -> vector<2x2xf32>
    %c1 = arith.constant 1 : index
    %c0_5 = arith.constant 0 : index
    %c0_6 = arith.constant 0 : index
    %5 = vector.load %arg1[%c1, %c0_5, %c0_6] : memref<2x2x32xf32, #tpu.memory_space<vmem>>, vector<1x2x32xf32>
    %6 = vector.shape_cast %5 : vector<1x2x32xf32> to vector<2x32xf32>
    %c1_7 = arith.constant 1 : index
    %c0_8 = arith.constant 0 : index
    %c0_9 = arith.constant 0 : index
    %7 = vector.load %arg2[%c1_7, %c0_8, %c0_9] : memref<2x32x2xf32, #tpu.memory_space<vmem>>, vector<1x32x2xf32>
    %8 = vector.shape_cast %7 : vector<1x32x2xf32> to vector<32x2xf32>
    %cst_10 = arith.constant dense<0.000000e+00> : vector<2x2xf32>
    %9 = tpu.matmul %6, %8, %cst_10 {dimension_numbers = #tpu.dot_dimension_numbers<[1], [0], [0], [1], [0, 0, 1, 1], [], []>} : vector<2x32xf32>, vector<32x2xf32>, vector<2x2xf32> -> vector<2x2xf32>
    %10 = arith.addf %4, %9 : vector<2x2xf32>
    %c0_11 = arith.constant 0 : index
    %c0_12 = arith.constant 0 : index
    %11 = vector.load %arg3[%c0_11, %c0_12] : memref<1x2xf32, #tpu.memory_space<vmem>>, vector<1x2xf32>
    %12 = vector.broadcast %11 : vector<1x2xf32> to vector<2x2xf32>
    %13 = arith.addf %10, %12 : vector<2x2xf32>
    %c0_13 = arith.constant 0 : index
    %c0_14 = arith.constant 0 : index
    %14 = vector.load %arg4[%c0_13, %c0_14] : memref<2x2xf32, #tpu.memory_space<vmem>>, vector<2x2xf32>
    tpu.vector_store %arg4[%c0_13, %c0_14], %13 {strides = array<i32>} : memref<2x2xf32, #tpu.memory_space<vmem>>, vector<2x2xf32>,
    return
  }
  func.func @transform_0(%arg0: i32) -> (i32, i32, i32) {
    %c0_i32 = arith.constant 0 : i32
    %c0_i32_0 = arith.constant 0 : i32
    %c0_i32_1 = arith.constant 0 : i32
    %c0_i32_2 = arith.constant 0 : i32
    return %c0_i32, %c0_i32_0, %c0_i32_1 : i32, i32, i32
  }
  func.func @transform_1(%arg0: i32) -> (i32, i32, i32) {
    %c0_i32 = arith.constant 0 : i32
    %c0_i32_0 = arith.constant 0 : i32
    %c0_i32_1 = arith.constant 0 : i32
    %c0_i32_2 = arith.constant 0 : i32
    return %c0_i32, %c0_i32_0, %c0_i32_1 : i32, i32, i32
  }
  func.func @transform_2(%arg0: i32) -> (i32, i32) {
    %c0_i32 = arith.constant 0 : i32
    %c0_i32_0 = arith.constant 0 : i32
    %c0_i32_1 = arith.constant 0 : i32
    return %c0_i32, %c0_i32_0 : i32, i32
  }
  func.func @transform_3(%arg0: i32) -> (i32, i32) {
    %c0_i32 = arith.constant 0 : i32
    %c0_i32_0 = arith.constant 0 : i32
    %c0_i32_1 = arith.constant 0 : i32
    return %c0_i32, %c0_i32_0 : i32, i32
  }
}

module attributes {stable_mosaic.version = 11 : i64} {
  func.func @kernel(%arg0: i32, %arg1: memref<8x2x32xf32, #tpu.memory_space<vmem>>, %arg2: memref<8x2x32xf32, #tpu.memory_space<vmem>>, %arg3: memref<2x1x32x96xf32, #tpu.memory_space<vmem>>, %arg4: memref<2x1x96xf32, #tpu.memory_space<vmem>>, %arg5: memref<2x32x96xf32, #tpu.memory_space<vmem>>, %arg6: memref<2x1x32xf32, #tpu.memory_space<vmem>>, %arg7: memref<8x2x32xf32, #tpu.memory_space<vmem>>, %arg8: memref<8x2x32xf32, #tpu.memory_space<vmem>>, %arg9: memref<2x2x32xf32, #tpu.memory_space<vmem>>) attributes {dimension_semantics = [#tpu.dimension_semantics<arbitrary>], iteration_bounds = array<i64: 1>, scalar_prefetch = 0 : i64, scratch_operands = 0 : i64, tpu.core_type = #tpu.core_type<tc>, window_params = [{transform_indices = @transform_0, window_bounds = array<i64: 8, 2, 32>}, {transform_indices = @transform_1, window_bounds = array<i64: 8, 2, 32>}, {pipeline_mode = #tpu.pipeline_mode<synchronous>, transform_indices = @transform_2, window_bounds = array<i64: 2, 1, 32, 96>}, {pipeline_mode = #tpu.pipeline_mode<synchronous>, transform_indices = @transform_3, window_bounds = array<i64: 2, 1, 96>}, {pipeline_mode = #tpu.pipeline_mode<synchronous>, transform_indices = @transform_4, window_bounds = array<i64: 2, 32, 96>}, {pipeline_mode = #tpu.pipeline_mode<synchronous>, transform_indices = @transform_5, window_bounds = array<i64: 2, 1, 32>}, {transform_indices = @transform_6, window_bounds = array<i64: 8, 2, 32>}, {transform_indices = @transform_7, window_bounds = array<i64: 8, 2, 32>}, {pipeline_mode = #tpu.pipeline_mode<synchronous>, transform_indices = @transform_8, window_bounds = array<i64: 2, 2, 32>}]} {
    %c0_i32 = arith.constant 0 : i32
    %0 = arith.cmpi eq, %arg0, %c0_i32 : i32
    %1 = arith.extui %0 : i1 to i32
    %c0_i32_0 = arith.constant 0 : i32
    %2 = arith.cmpi ne, %1, %c0_i32_0 : i32
    scf.if %2 {
      %cst_150 = arith.constant 0.000000e+00 : f32
      %585 = vector.broadcast %cst_150 : f32 to vector<2x2x32xf32>
      %c0_151 = arith.constant 0 : index
      %c0_152 = arith.constant 0 : index
      %c0_153 = arith.constant 0 : index
      %586 = vector.load %arg9[%c0_151, %c0_152, %c0_153] : memref<2x2x32xf32, #tpu.memory_space<vmem>>, vector<2x2x32xf32>
      tpu.vector_store %arg9[%c0_151, %c0_152, %c0_153], %585 {strides = array<i32>} : memref<2x2x32xf32, #tpu.memory_space<vmem>>, vector<2x2x32xf32>,
    } else {
    }
    %c0 = arith.constant 0 : index
    %c0_1 = arith.constant 0 : index
    %c0_2 = arith.constant 0 : index
    %3 = vector.load %arg1[%c0, %c0_1, %c0_2] : memref<8x2x32xf32, #tpu.memory_space<vmem>>, vector<8x2x32xf32>
    %4 = vector.shape_cast %3 : vector<8x2x32xf32> to vector<16x32xf32>
    %c0_3 = arith.constant 0 : index
    %c0_4 = arith.constant 0 : index
    %c0_5 = arith.constant 0 : index
    %c0_6 = arith.constant 0 : index
    %5 = vector.load %arg3[%c0_3, %c0_4, %c0_5, %c0_6] : memref<2x1x32x96xf32, #tpu.memory_space<vmem>>, vector<1x1x32x96xf32>
    %6 = vector.shape_cast %5 : vector<1x1x32x96xf32> to vector<32x96xf32>
    %cst = arith.constant dense<0.000000e+00> : vector<16x96xf32>
    %7 = tpu.matmul %4, %6, %cst {dimension_numbers = #tpu.dot_dimension_numbers<[1], [0], [0], [1], [0, 0, 1, 1], [], []>} : vector<16x32xf32>, vector<32x96xf32>, vector<16x96xf32> -> vector<16x96xf32>
    %c0_7 = arith.constant 0 : index
    %c0_8 = arith.constant 0 : index
    %c0_9 = arith.constant 0 : index
    %8 = vector.load %arg4[%c0_7, %c0_8, %c0_9] : memref<2x1x96xf32, #tpu.memory_space<vmem>>, vector<1x1x96xf32>
    %9 = vector.shape_cast %8 : vector<1x1x96xf32> to vector<1x96xf32>
    %10 = vector.broadcast %9 : vector<1x96xf32> to vector<16x96xf32>
    %11 = arith.addf %7, %10 : vector<16x96xf32>
    %12 = vector.shape_cast %11 : vector<16x96xf32> to vector<8x2x96xf32>
    %c0_10 = arith.constant 0 : index
    %c0_11 = arith.constant 0 : index
    %c0_12 = arith.constant 0 : index
    %13 = vector.load %arg2[%c0_10, %c0_11, %c0_12] : memref<8x2x32xf32, #tpu.memory_space<vmem>>, vector<8x2x32xf32>
    %14 = vector.shape_cast %13 : vector<8x2x32xf32> to vector<16x32xf32>
    %c1 = arith.constant 1 : index
    %c0_13 = arith.constant 0 : index
    %c0_14 = arith.constant 0 : index
    %c0_15 = arith.constant 0 : index
    %15 = vector.load %arg3[%c1, %c0_13, %c0_14, %c0_15] : memref<2x1x32x96xf32, #tpu.memory_space<vmem>>, vector<1x1x32x96xf32>
    %16 = vector.shape_cast %15 : vector<1x1x32x96xf32> to vector<32x96xf32>
    %cst_16 = arith.constant dense<0.000000e+00> : vector<16x96xf32>
    %17 = tpu.matmul %14, %16, %cst_16 {dimension_numbers = #tpu.dot_dimension_numbers<[1], [0], [0], [1], [0, 0, 1, 1], [], []>} : vector<16x32xf32>, vector<32x96xf32>, vector<16x96xf32> -> vector<16x96xf32>
    %c1_17 = arith.constant 1 : index
    %c0_18 = arith.constant 0 : index
    %c0_19 = arith.constant 0 : index
    %18 = vector.load %arg4[%c1_17, %c0_18, %c0_19] : memref<2x1x96xf32, #tpu.memory_space<vmem>>, vector<1x1x96xf32>
    %19 = vector.shape_cast %18 : vector<1x1x96xf32> to vector<1x96xf32>
    %20 = vector.broadcast %19 : vector<1x96xf32> to vector<16x96xf32>
    %21 = arith.addf %17, %20 : vector<16x96xf32>
    %22 = vector.shape_cast %21 : vector<16x96xf32> to vector<8x2x96xf32>
    %c0_20 = arith.constant 0 : index
    %c0_21 = arith.constant 0 : index
    %c0_22 = arith.constant 0 : index
    %23 = vector.load %arg5[%c0_20, %c0_21, %c0_22] : memref<2x32x96xf32, #tpu.memory_space<vmem>>, vector<1x32x96xf32>
    %24 = vector.shape_cast %23 : vector<1x32x96xf32> to vector<32x96xf32>
    %c0_23 = arith.constant 0 : index
    %c0_24 = arith.constant 0 : index
    %c0_25 = arith.constant 0 : index
    %25 = vector.load %arg6[%c0_23, %c0_24, %c0_25] : memref<2x1x32xf32, #tpu.memory_space<vmem>>, vector<1x1x32xf32>
    %26 = vector.shape_cast %25 : vector<1x1x32xf32> to vector<1x32xf32>
    %c0_26 = arith.constant 0 : index
    %c0_27 = arith.constant 0 : index
    %c0_28 = arith.constant 0 : index
    %27 = vector.load %arg9[%c0_26, %c0_27, %c0_28] : memref<2x2x32xf32, #tpu.memory_space<vmem>>, vector<1x2x32xf32>
    %28 = vector.shape_cast %27 : vector<1x2x32xf32> to vector<2x32xf32>
    %c1_29 = arith.constant 1 : index
    %c0_30 = arith.constant 0 : index
    %c0_31 = arith.constant 0 : index
    %29 = vector.load %arg5[%c1_29, %c0_30, %c0_31] : memref<2x32x96xf32, #tpu.memory_space<vmem>>, vector<1x32x96xf32>
    %30 = vector.shape_cast %29 : vector<1x32x96xf32> to vector<32x96xf32>
    %c1_32 = arith.constant 1 : index
    %c0_33 = arith.constant 0 : index
    %c0_34 = arith.constant 0 : index
    %31 = vector.load %arg6[%c1_32, %c0_33, %c0_34] : memref<2x1x32xf32, #tpu.memory_space<vmem>>, vector<1x1x32xf32>
    %32 = vector.shape_cast %31 : vector<1x1x32xf32> to vector<1x32xf32>
    %c1_35 = arith.constant 1 : index
    %c0_36 = arith.constant 0 : index
    %c0_37 = arith.constant 0 : index
    %33 = vector.load %arg9[%c1_35, %c0_36, %c0_37] : memref<2x2x32xf32, #tpu.memory_space<vmem>>, vector<1x2x32xf32>
    %34 = vector.shape_cast %33 : vector<1x2x32xf32> to vector<2x32xf32>
    %35 = vector.extract_strided_slice %12 {offsets = [0, 0, 0], sizes = [1, 2, 96], strides = [1, 1, 1]} : vector<8x2x96xf32> to vector<1x2x96xf32>
    %36 = vector.shape_cast %35 : vector<1x2x96xf32> to vector<2x96xf32>
    %cst_38 = arith.constant dense<0.000000e+00> : vector<2x96xf32>
    %37 = tpu.matmul %28, %24, %cst_38 {dimension_numbers = #tpu.dot_dimension_numbers<[1], [0], [0], [1], [0, 0, 1, 1], [], []>} : vector<2x32xf32>, vector<32x96xf32>, vector<2x96xf32> -> vector<2x96xf32>
    %38 = vector.extract_strided_slice %36 {offsets = [0, 0], sizes = [2, 32], strides = [1, 1]} : vector<2x96xf32> to vector<2x32xf32>
    %39 = vector.extract_strided_slice %37 {offsets = [0, 0], sizes = [2, 32], strides = [1, 1]} : vector<2x96xf32> to vector<2x32xf32>
    %40 = arith.addf %38, %39 : vector<2x32xf32>
    %41 = arith.negf %40 : vector<2x32xf32>
    %42 = math.exp %41 : vector<2x32xf32>
    %cst_39 = arith.constant 1.000000e+00 : f32
    %43 = vector.broadcast %cst_39 : f32 to vector<2x32xf32>
    %44 = arith.addf %43, %42 : vector<2x32xf32>
    %45 = arith.divf %43, %44 : vector<2x32xf32>
    %46 = vector.extract_strided_slice %36 {offsets = [0, 32], sizes = [2, 32], strides = [1, 1]} : vector<2x96xf32> to vector<2x32xf32>
    %47 = vector.extract_strided_slice %37 {offsets = [0, 32], sizes = [2, 32], strides = [1, 1]} : vector<2x96xf32> to vector<2x32xf32>
    %48 = arith.addf %46, %47 : vector<2x32xf32>
    %49 = arith.negf %48 : vector<2x32xf32>
    %50 = math.exp %49 : vector<2x32xf32>
    %cst_40 = arith.constant 1.000000e+00 : f32
    %51 = vector.broadcast %cst_40 : f32 to vector<2x32xf32>
    %52 = arith.addf %51, %50 : vector<2x32xf32>
    %53 = arith.divf %51, %52 : vector<2x32xf32>
    %54 = vector.extract_strided_slice %36 {offsets = [0, 64], sizes = [2, 32], strides = [1, 1]} : vector<2x96xf32> to vector<2x32xf32>
    %55 = vector.extract_strided_slice %37 {offsets = [0, 64], sizes = [2, 32], strides = [1, 1]} : vector<2x96xf32> to vector<2x32xf32>
    %56 = vector.broadcast %26 : vector<1x32xf32> to vector<2x32xf32>
    %57 = arith.addf %55, %56 : vector<2x32xf32>
    %58 = arith.mulf %45, %57 : vector<2x32xf32>
    %59 = arith.addf %54, %58 : vector<2x32xf32>
    %60 = math.tanh %59 : vector<2x32xf32>
    %cst_41 = arith.constant 1.000000e+00 : f32
    %61 = vector.broadcast %cst_41 : f32 to vector<2x32xf32>
    %62 = arith.subf %61, %53 : vector<2x32xf32>
    %63 = arith.mulf %62, %60 : vector<2x32xf32>
    %64 = arith.mulf %53, %28 : vector<2x32xf32>
    %65 = arith.addf %63, %64 : vector<2x32xf32>
    %c0_42 = arith.constant 0 : index
    %c0_43 = arith.constant 0 : index
    %c0_44 = arith.constant 0 : index
    %66 = vector.load %arg7[%c0_42, %c0_43, %c0_44] : memref<8x2x32xf32, #tpu.memory_space<vmem>>, vector<1x2x32xf32>
    %67 = vector.shape_cast %66 : vector<1x2x32xf32> to vector<2x32xf32>
    %68 = vector.shape_cast %65 : vector<2x32xf32> to vector<1x2x32xf32>
    tpu.vector_store %arg7[%c0_42, %c0_43, %c0_44], %68 {strides = array<i32>} : memref<8x2x32xf32, #tpu.memory_space<vmem>>, vector<1x2x32xf32>,
    %69 = vector.extract_strided_slice %22 {offsets = [7, 0, 0], sizes = [1, 2, 96], strides = [1, 1, 1]} : vector<8x2x96xf32> to vector<1x2x96xf32>
    %70 = vector.shape_cast %69 : vector<1x2x96xf32> to vector<2x96xf32>
    %cst_45 = arith.constant dense<0.000000e+00> : vector<2x96xf32>
    %71 = tpu.matmul %34, %30, %cst_45 {dimension_numbers = #tpu.dot_dimension_numbers<[1], [0], [0], [1], [0, 0, 1, 1], [], []>} : vector<2x32xf32>, vector<32x96xf32>, vector<2x96xf32> -> vector<2x96xf32>
    %72 = vector.extract_strided_slice %70 {offsets = [0, 0], sizes = [2, 32], strides = [1, 1]} : vector<2x96xf32> to vector<2x32xf32>
    %73 = vector.extract_strided_slice %71 {offsets = [0, 0], sizes = [2, 32], strides = [1, 1]} : vector<2x96xf32> to vector<2x32xf32>
    %74 = arith.addf %72, %73 : vector<2x32xf32>
    %75 = arith.negf %74 : vector<2x32xf32>
    %76 = math.exp %75 : vector<2x32xf32>
    %cst_46 = arith.constant 1.000000e+00 : f32
    %77 = vector.broadcast %cst_46 : f32 to vector<2x32xf32>
    %78 = arith.addf %77, %76 : vector<2x32xf32>
    %79 = arith.divf %77, %78 : vector<2x32xf32>
    %80 = vector.extract_strided_slice %70 {offsets = [0, 32], sizes = [2, 32], strides = [1, 1]} : vector<2x96xf32> to vector<2x32xf32>
    %81 = vector.extract_strided_slice %71 {offsets = [0, 32], sizes = [2, 32], strides = [1, 1]} : vector<2x96xf32> to vector<2x32xf32>
    %82 = arith.addf %80, %81 : vector<2x32xf32>
    %83 = arith.negf %82 : vector<2x32xf32>
    %84 = math.exp %83 : vector<2x32xf32>
    %cst_47 = arith.constant 1.000000e+00 : f32
    %85 = vector.broadcast %cst_47 : f32 to vector<2x32xf32>
    %86 = arith.addf %85, %84 : vector<2x32xf32>
    %87 = arith.divf %85, %86 : vector<2x32xf32>
    %88 = vector.extract_strided_slice %70 {offsets = [0, 64], sizes = [2, 32], strides = [1, 1]} : vector<2x96xf32> to vector<2x32xf32>
    %89 = vector.extract_strided_slice %71 {offsets = [0, 64], sizes = [2, 32], strides = [1, 1]} : vector<2x96xf32> to vector<2x32xf32>
    %90 = vector.broadcast %32 : vector<1x32xf32> to vector<2x32xf32>
    %91 = arith.addf %89, %90 : vector<2x32xf32>
    %92 = arith.mulf %79, %91 : vector<2x32xf32>
    %93 = arith.addf %88, %92 : vector<2x32xf32>
    %94 = math.tanh %93 : vector<2x32xf32>
    %cst_48 = arith.constant 1.000000e+00 : f32
    %95 = vector.broadcast %cst_48 : f32 to vector<2x32xf32>
    %96 = arith.subf %95, %87 : vector<2x32xf32>
    %97 = arith.mulf %96, %94 : vector<2x32xf32>
    %98 = arith.mulf %87, %34 : vector<2x32xf32>
    %99 = arith.addf %97, %98 : vector<2x32xf32>
    %c7 = arith.constant 7 : index
    %c0_49 = arith.constant 0 : index
    %c0_50 = arith.constant 0 : index
    %100 = vector.load %arg8[%c7, %c0_49, %c0_50] : memref<8x2x32xf32, #tpu.memory_space<vmem>>, vector<1x2x32xf32>
    %101 = vector.shape_cast %100 : vector<1x2x32xf32> to vector<2x32xf32>
    %102 = vector.shape_cast %99 : vector<2x32xf32> to vector<1x2x32xf32>
    tpu.vector_store %arg8[%c7, %c0_49, %c0_50], %102 {strides = array<i32>} : memref<8x2x32xf32, #tpu.memory_space<vmem>>, vector<1x2x32xf32>,
    %103 = vector.extract_strided_slice %12 {offsets = [1, 0, 0], sizes = [1, 2, 96], strides = [1, 1, 1]} : vector<8x2x96xf32> to vector<1x2x96xf32>
    %104 = vector.shape_cast %103 : vector<1x2x96xf32> to vector<2x96xf32>
    %cst_51 = arith.constant dense<0.000000e+00> : vector<2x96xf32>
    %105 = tpu.matmul %65, %24, %cst_51 {dimension_numbers = #tpu.dot_dimension_numbers<[1], [0], [0], [1], [0, 0, 1, 1], [], []>} : vector<2x32xf32>, vector<32x96xf32>, vector<2x96xf32> -> vector<2x96xf32>
    %106 = vector.extract_strided_slice %104 {offsets = [0, 0], sizes = [2, 32], strides = [1, 1]} : vector<2x96xf32> to vector<2x32xf32>
    %107 = vector.extract_strided_slice %105 {offsets = [0, 0], sizes = [2, 32], strides = [1, 1]} : vector<2x96xf32> to vector<2x32xf32>
    %108 = arith.addf %106, %107 : vector<2x32xf32>
    %109 = arith.negf %108 : vector<2x32xf32>
    %110 = math.exp %109 : vector<2x32xf32>
    %cst_52 = arith.constant 1.000000e+00 : f32
    %111 = vector.broadcast %cst_52 : f32 to vector<2x32xf32>
    %112 = arith.addf %111, %110 : vector<2x32xf32>
    %113 = arith.divf %111, %112 : vector<2x32xf32>
    %114 = vector.extract_strided_slice %104 {offsets = [0, 32], sizes = [2, 32], strides = [1, 1]} : vector<2x96xf32> to vector<2x32xf32>
    %115 = vector.extract_strided_slice %105 {offsets = [0, 32], sizes = [2, 32], strides = [1, 1]} : vector<2x96xf32> to vector<2x32xf32>
    %116 = arith.addf %114, %115 : vector<2x32xf32>
    %117 = arith.negf %116 : vector<2x32xf32>
    %118 = math.exp %117 : vector<2x32xf32>
    %cst_53 = arith.constant 1.000000e+00 : f32
    %119 = vector.broadcast %cst_53 : f32 to vector<2x32xf32>
    %120 = arith.addf %119, %118 : vector<2x32xf32>
    %121 = arith.divf %119, %120 : vector<2x32xf32>
    %122 = vector.extract_strided_slice %104 {offsets = [0, 64], sizes = [2, 32], strides = [1, 1]} : vector<2x96xf32> to vector<2x32xf32>
    %123 = vector.extract_strided_slice %105 {offsets = [0, 64], sizes = [2, 32], strides = [1, 1]} : vector<2x96xf32> to vector<2x32xf32>
    %124 = vector.broadcast %26 : vector<1x32xf32> to vector<2x32xf32>
    %125 = arith.addf %123, %124 : vector<2x32xf32>
    %126 = arith.mulf %113, %125 : vector<2x32xf32>
    %127 = arith.addf %122, %126 : vector<2x32xf32>
    %128 = math.tanh %127 : vector<2x32xf32>
    %cst_54 = arith.constant 1.000000e+00 : f32
    %129 = vector.broadcast %cst_54 : f32 to vector<2x32xf32>
    %130 = arith.subf %129, %121 : vector<2x32xf32>
    %131 = arith.mulf %130, %128 : vector<2x32xf32>
    %132 = arith.mulf %121, %65 : vector<2x32xf32>
    %133 = arith.addf %131, %132 : vector<2x32xf32>
    %c1_55 = arith.constant 1 : index
    %c0_56 = arith.constant 0 : index
    %c0_57 = arith.constant 0 : index
    %134 = vector.load %arg7[%c1_55, %c0_56, %c0_57] : memref<8x2x32xf32, #tpu.memory_space<vmem>>, vector<1x2x32xf32>
    %135 = vector.shape_cast %134 : vector<1x2x32xf32> to vector<2x32xf32>
    %136 = vector.shape_cast %133 : vector<2x32xf32> to vector<1x2x32xf32>
    tpu.vector_store %arg7[%c1_55, %c0_56, %c0_57], %136 {strides = array<i32>} : memref<8x2x32xf32, #tpu.memory_space<vmem>>, vector<1x2x32xf32>,
    %137 = vector.extract_strided_slice %22 {offsets = [6, 0, 0], sizes = [1, 2, 96], strides = [1, 1, 1]} : vector<8x2x96xf32> to vector<1x2x96xf32>
    %138 = vector.shape_cast %137 : vector<1x2x96xf32> to vector<2x96xf32>
    %cst_58 = arith.constant dense<0.000000e+00> : vector<2x96xf32>
    %139 = tpu.matmul %99, %30, %cst_58 {dimension_numbers = #tpu.dot_dimension_numbers<[1], [0], [0], [1], [0, 0, 1, 1], [], []>} : vector<2x32xf32>, vector<32x96xf32>, vector<2x96xf32> -> vector<2x96xf32>
    %140 = vector.extract_strided_slice %138 {offsets = [0, 0], sizes = [2, 32], strides = [1, 1]} : vector<2x96xf32> to vector<2x32xf32>
    %141 = vector.extract_strided_slice %139 {offsets = [0, 0], sizes = [2, 32], strides = [1, 1]} : vector<2x96xf32> to vector<2x32xf32>
    %142 = arith.addf %140, %141 : vector<2x32xf32>
    %143 = arith.negf %142 : vector<2x32xf32>
    %144 = math.exp %143 : vector<2x32xf32>
    %cst_59 = arith.constant 1.000000e+00 : f32
    %145 = vector.broadcast %cst_59 : f32 to vector<2x32xf32>
    %146 = arith.addf %145, %144 : vector<2x32xf32>
    %147 = arith.divf %145, %146 : vector<2x32xf32>
    %148 = vector.extract_strided_slice %138 {offsets = [0, 32], sizes = [2, 32], strides = [1, 1]} : vector<2x96xf32> to vector<2x32xf32>
    %149 = vector.extract_strided_slice %139 {offsets = [0, 32], sizes = [2, 32], strides = [1, 1]} : vector<2x96xf32> to vector<2x32xf32>
    %150 = arith.addf %148, %149 : vector<2x32xf32>
    %151 = arith.negf %150 : vector<2x32xf32>
    %152 = math.exp %151 : vector<2x32xf32>
    %cst_60 = arith.constant 1.000000e+00 : f32
    %153 = vector.broadcast %cst_60 : f32 to vector<2x32xf32>
    %154 = arith.addf %153, %152 : vector<2x32xf32>
    %155 = arith.divf %153, %154 : vector<2x32xf32>
    %156 = vector.extract_strided_slice %138 {offsets = [0, 64], sizes = [2, 32], strides = [1, 1]} : vector<2x96xf32> to vector<2x32xf32>
    %157 = vector.extract_strided_slice %139 {offsets = [0, 64], sizes = [2, 32], strides = [1, 1]} : vector<2x96xf32> to vector<2x32xf32>
    %158 = vector.broadcast %32 : vector<1x32xf32> to vector<2x32xf32>
    %159 = arith.addf %157, %158 : vector<2x32xf32>
    %160 = arith.mulf %147, %159 : vector<2x32xf32>
    %161 = arith.addf %156, %160 : vector<2x32xf32>
    %162 = math.tanh %161 : vector<2x32xf32>
    %cst_61 = arith.constant 1.000000e+00 : f32
    %163 = vector.broadcast %cst_61 : f32 to vector<2x32xf32>
    %164 = arith.subf %163, %155 : vector<2x32xf32>
    %165 = arith.mulf %164, %162 : vector<2x32xf32>
    %166 = arith.mulf %155, %99 : vector<2x32xf32>
    %167 = arith.addf %165, %166 : vector<2x32xf32>
    %c6 = arith.constant 6 : index
    %c0_62 = arith.constant 0 : index
    %c0_63 = arith.constant 0 : index
    %168 = vector.load %arg8[%c6, %c0_62, %c0_63] : memref<8x2x32xf32, #tpu.memory_space<vmem>>, vector<1x2x32xf32>
    %169 = vector.shape_cast %168 : vector<1x2x32xf32> to vector<2x32xf32>
    %170 = vector.shape_cast %167 : vector<2x32xf32> to vector<1x2x32xf32>
    tpu.vector_store %arg8[%c6, %c0_62, %c0_63], %170 {strides = array<i32>} : memref<8x2x32xf32, #tpu.memory_space<vmem>>, vector<1x2x32xf32>,
    %171 = vector.extract_strided_slice %12 {offsets = [2, 0, 0], sizes = [1, 2, 96], strides = [1, 1, 1]} : vector<8x2x96xf32> to vector<1x2x96xf32>
    %172 = vector.shape_cast %171 : vector<1x2x96xf32> to vector<2x96xf32>
    %cst_64 = arith.constant dense<0.000000e+00> : vector<2x96xf32>
    %173 = tpu.matmul %133, %24, %cst_64 {dimension_numbers = #tpu.dot_dimension_numbers<[1], [0], [0], [1], [0, 0, 1, 1], [], []>} : vector<2x32xf32>, vector<32x96xf32>, vector<2x96xf32> -> vector<2x96xf32>
    %174 = vector.extract_strided_slice %172 {offsets = [0, 0], sizes = [2, 32], strides = [1, 1]} : vector<2x96xf32> to vector<2x32xf32>
    %175 = vector.extract_strided_slice %173 {offsets = [0, 0], sizes = [2, 32], strides = [1, 1]} : vector<2x96xf32> to vector<2x32xf32>
    %176 = arith.addf %174, %175 : vector<2x32xf32>
    %177 = arith.negf %176 : vector<2x32xf32>
    %178 = math.exp %177 : vector<2x32xf32>
    %cst_65 = arith.constant 1.000000e+00 : f32
    %179 = vector.broadcast %cst_65 : f32 to vector<2x32xf32>
    %180 = arith.addf %179, %178 : vector<2x32xf32>
    %181 = arith.divf %179, %180 : vector<2x32xf32>
    %182 = vector.extract_strided_slice %172 {offsets = [0, 32], sizes = [2, 32], strides = [1, 1]} : vector<2x96xf32> to vector<2x32xf32>
    %183 = vector.extract_strided_slice %173 {offsets = [0, 32], sizes = [2, 32], strides = [1, 1]} : vector<2x96xf32> to vector<2x32xf32>
    %184 = arith.addf %182, %183 : vector<2x32xf32>
    %185 = arith.negf %184 : vector<2x32xf32>
    %186 = math.exp %185 : vector<2x32xf32>
    %cst_66 = arith.constant 1.000000e+00 : f32
    %187 = vector.broadcast %cst_66 : f32 to vector<2x32xf32>
    %188 = arith.addf %187, %186 : vector<2x32xf32>
    %189 = arith.divf %187, %188 : vector<2x32xf32>
    %190 = vector.extract_strided_slice %172 {offsets = [0, 64], sizes = [2, 32], strides = [1, 1]} : vector<2x96xf32> to vector<2x32xf32>
    %191 = vector.extract_strided_slice %173 {offsets = [0, 64], sizes = [2, 32], strides = [1, 1]} : vector<2x96xf32> to vector<2x32xf32>
    %192 = vector.broadcast %26 : vector<1x32xf32> to vector<2x32xf32>
    %193 = arith.addf %191, %192 : vector<2x32xf32>
    %194 = arith.mulf %181, %193 : vector<2x32xf32>
    %195 = arith.addf %190, %194 : vector<2x32xf32>
    %196 = math.tanh %195 : vector<2x32xf32>
    %cst_67 = arith.constant 1.000000e+00 : f32
    %197 = vector.broadcast %cst_67 : f32 to vector<2x32xf32>
    %198 = arith.subf %197, %189 : vector<2x32xf32>
    %199 = arith.mulf %198, %196 : vector<2x32xf32>
    %200 = arith.mulf %189, %133 : vector<2x32xf32>
    %201 = arith.addf %199, %200 : vector<2x32xf32>
    %c2 = arith.constant 2 : index
    %c0_68 = arith.constant 0 : index
    %c0_69 = arith.constant 0 : index
    %202 = vector.load %arg7[%c2, %c0_68, %c0_69] : memref<8x2x32xf32, #tpu.memory_space<vmem>>, vector<1x2x32xf32>
    %203 = vector.shape_cast %202 : vector<1x2x32xf32> to vector<2x32xf32>
    %204 = vector.shape_cast %201 : vector<2x32xf32> to vector<1x2x32xf32>
    tpu.vector_store %arg7[%c2, %c0_68, %c0_69], %204 {strides = array<i32>} : memref<8x2x32xf32, #tpu.memory_space<vmem>>, vector<1x2x32xf32>,
    %205 = vector.extract_strided_slice %22 {offsets = [5, 0, 0], sizes = [1, 2, 96], strides = [1, 1, 1]} : vector<8x2x96xf32> to vector<1x2x96xf32>
    %206 = vector.shape_cast %205 : vector<1x2x96xf32> to vector<2x96xf32>
    %cst_70 = arith.constant dense<0.000000e+00> : vector<2x96xf32>
    %207 = tpu.matmul %167, %30, %cst_70 {dimension_numbers = #tpu.dot_dimension_numbers<[1], [0], [0], [1], [0, 0, 1, 1], [], []>} : vector<2x32xf32>, vector<32x96xf32>, vector<2x96xf32> -> vector<2x96xf32>
    %208 = vector.extract_strided_slice %206 {offsets = [0, 0], sizes = [2, 32], strides = [1, 1]} : vector<2x96xf32> to vector<2x32xf32>
    %209 = vector.extract_strided_slice %207 {offsets = [0, 0], sizes = [2, 32], strides = [1, 1]} : vector<2x96xf32> to vector<2x32xf32>
    %210 = arith.addf %208, %209 : vector<2x32xf32>
    %211 = arith.negf %210 : vector<2x32xf32>
    %212 = math.exp %211 : vector<2x32xf32>
    %cst_71 = arith.constant 1.000000e+00 : f32
    %213 = vector.broadcast %cst_71 : f32 to vector<2x32xf32>
    %214 = arith.addf %213, %212 : vector<2x32xf32>
    %215 = arith.divf %213, %214 : vector<2x32xf32>
    %216 = vector.extract_strided_slice %206 {offsets = [0, 32], sizes = [2, 32], strides = [1, 1]} : vector<2x96xf32> to vector<2x32xf32>
    %217 = vector.extract_strided_slice %207 {offsets = [0, 32], sizes = [2, 32], strides = [1, 1]} : vector<2x96xf32> to vector<2x32xf32>
    %218 = arith.addf %216, %217 : vector<2x32xf32>
    %219 = arith.negf %218 : vector<2x32xf32>
    %220 = math.exp %219 : vector<2x32xf32>
    %cst_72 = arith.constant 1.000000e+00 : f32
    %221 = vector.broadcast %cst_72 : f32 to vector<2x32xf32>
    %222 = arith.addf %221, %220 : vector<2x32xf32>
    %223 = arith.divf %221, %222 : vector<2x32xf32>
    %224 = vector.extract_strided_slice %206 {offsets = [0, 64], sizes = [2, 32], strides = [1, 1]} : vector<2x96xf32> to vector<2x32xf32>
    %225 = vector.extract_strided_slice %207 {offsets = [0, 64], sizes = [2, 32], strides = [1, 1]} : vector<2x96xf32> to vector<2x32xf32>
    %226 = vector.broadcast %32 : vector<1x32xf32> to vector<2x32xf32>
    %227 = arith.addf %225, %226 : vector<2x32xf32>
    %228 = arith.mulf %215, %227 : vector<2x32xf32>
    %229 = arith.addf %224, %228 : vector<2x32xf32>
    %230 = math.tanh %229 : vector<2x32xf32>
    %cst_73 = arith.constant 1.000000e+00 : f32
    %231 = vector.broadcast %cst_73 : f32 to vector<2x32xf32>
    %232 = arith.subf %231, %223 : vector<2x32xf32>
    %233 = arith.mulf %232, %230 : vector<2x32xf32>
    %234 = arith.mulf %223, %167 : vector<2x32xf32>
    %235 = arith.addf %233, %234 : vector<2x32xf32>
    %c5 = arith.constant 5 : index
    %c0_74 = arith.constant 0 : index
    %c0_75 = arith.constant 0 : index
    %236 = vector.load %arg8[%c5, %c0_74, %c0_75] : memref<8x2x32xf32, #tpu.memory_space<vmem>>, vector<1x2x32xf32>
    %237 = vector.shape_cast %236 : vector<1x2x32xf32> to vector<2x32xf32>
    %238 = vector.shape_cast %235 : vector<2x32xf32> to vector<1x2x32xf32>
    tpu.vector_store %arg8[%c5, %c0_74, %c0_75], %238 {strides = array<i32>} : memref<8x2x32xf32, #tpu.memory_space<vmem>>, vector<1x2x32xf32>,
    %239 = vector.extract_strided_slice %12 {offsets = [3, 0, 0], sizes = [1, 2, 96], strides = [1, 1, 1]} : vector<8x2x96xf32> to vector<1x2x96xf32>
    %240 = vector.shape_cast %239 : vector<1x2x96xf32> to vector<2x96xf32>
    %cst_76 = arith.constant dense<0.000000e+00> : vector<2x96xf32>
    %241 = tpu.matmul %201, %24, %cst_76 {dimension_numbers = #tpu.dot_dimension_numbers<[1], [0], [0], [1], [0, 0, 1, 1], [], []>} : vector<2x32xf32>, vector<32x96xf32>, vector<2x96xf32> -> vector<2x96xf32>
    %242 = vector.extract_strided_slice %240 {offsets = [0, 0], sizes = [2, 32], strides = [1, 1]} : vector<2x96xf32> to vector<2x32xf32>
    %243 = vector.extract_strided_slice %241 {offsets = [0, 0], sizes = [2, 32], strides = [1, 1]} : vector<2x96xf32> to vector<2x32xf32>
    %244 = arith.addf %242, %243 : vector<2x32xf32>
    %245 = arith.negf %244 : vector<2x32xf32>
    %246 = math.exp %245 : vector<2x32xf32>
    %cst_77 = arith.constant 1.000000e+00 : f32
    %247 = vector.broadcast %cst_77 : f32 to vector<2x32xf32>
    %248 = arith.addf %247, %246 : vector<2x32xf32>
    %249 = arith.divf %247, %248 : vector<2x32xf32>
    %250 = vector.extract_strided_slice %240 {offsets = [0, 32], sizes = [2, 32], strides = [1, 1]} : vector<2x96xf32> to vector<2x32xf32>
    %251 = vector.extract_strided_slice %241 {offsets = [0, 32], sizes = [2, 32], strides = [1, 1]} : vector<2x96xf32> to vector<2x32xf32>
    %252 = arith.addf %250, %251 : vector<2x32xf32>
    %253 = arith.negf %252 : vector<2x32xf32>
    %254 = math.exp %253 : vector<2x32xf32>
    %cst_78 = arith.constant 1.000000e+00 : f32
    %255 = vector.broadcast %cst_78 : f32 to vector<2x32xf32>
    %256 = arith.addf %255, %254 : vector<2x32xf32>
    %257 = arith.divf %255, %256 : vector<2x32xf32>
    %258 = vector.extract_strided_slice %240 {offsets = [0, 64], sizes = [2, 32], strides = [1, 1]} : vector<2x96xf32> to vector<2x32xf32>
    %259 = vector.extract_strided_slice %241 {offsets = [0, 64], sizes = [2, 32], strides = [1, 1]} : vector<2x96xf32> to vector<2x32xf32>
    %260 = vector.broadcast %26 : vector<1x32xf32> to vector<2x32xf32>
    %261 = arith.addf %259, %260 : vector<2x32xf32>
    %262 = arith.mulf %249, %261 : vector<2x32xf32>
    %263 = arith.addf %258, %262 : vector<2x32xf32>
    %264 = math.tanh %263 : vector<2x32xf32>
    %cst_79 = arith.constant 1.000000e+00 : f32
    %265 = vector.broadcast %cst_79 : f32 to vector<2x32xf32>
    %266 = arith.subf %265, %257 : vector<2x32xf32>
    %267 = arith.mulf %266, %264 : vector<2x32xf32>
    %268 = arith.mulf %257, %201 : vector<2x32xf32>
    %269 = arith.addf %267, %268 : vector<2x32xf32>
    %c3 = arith.constant 3 : index
    %c0_80 = arith.constant 0 : index
    %c0_81 = arith.constant 0 : index
    %270 = vector.load %arg7[%c3, %c0_80, %c0_81] : memref<8x2x32xf32, #tpu.memory_space<vmem>>, vector<1x2x32xf32>
    %271 = vector.shape_cast %270 : vector<1x2x32xf32> to vector<2x32xf32>
    %272 = vector.shape_cast %269 : vector<2x32xf32> to vector<1x2x32xf32>
    tpu.vector_store %arg7[%c3, %c0_80, %c0_81], %272 {strides = array<i32>} : memref<8x2x32xf32, #tpu.memory_space<vmem>>, vector<1x2x32xf32>,
    %273 = vector.extract_strided_slice %22 {offsets = [4, 0, 0], sizes = [1, 2, 96], strides = [1, 1, 1]} : vector<8x2x96xf32> to vector<1x2x96xf32>
    %274 = vector.shape_cast %273 : vector<1x2x96xf32> to vector<2x96xf32>
    %cst_82 = arith.constant dense<0.000000e+00> : vector<2x96xf32>
    %275 = tpu.matmul %235, %30, %cst_82 {dimension_numbers = #tpu.dot_dimension_numbers<[1], [0], [0], [1], [0, 0, 1, 1], [], []>} : vector<2x32xf32>, vector<32x96xf32>, vector<2x96xf32> -> vector<2x96xf32>
    %276 = vector.extract_strided_slice %274 {offsets = [0, 0], sizes = [2, 32], strides = [1, 1]} : vector<2x96xf32> to vector<2x32xf32>
    %277 = vector.extract_strided_slice %275 {offsets = [0, 0], sizes = [2, 32], strides = [1, 1]} : vector<2x96xf32> to vector<2x32xf32>
    %278 = arith.addf %276, %277 : vector<2x32xf32>
    %279 = arith.negf %278 : vector<2x32xf32>
    %280 = math.exp %279 : vector<2x32xf32>
    %cst_83 = arith.constant 1.000000e+00 : f32
    %281 = vector.broadcast %cst_83 : f32 to vector<2x32xf32>
    %282 = arith.addf %281, %280 : vector<2x32xf32>
    %283 = arith.divf %281, %282 : vector<2x32xf32>
    %284 = vector.extract_strided_slice %274 {offsets = [0, 32], sizes = [2, 32], strides = [1, 1]} : vector<2x96xf32> to vector<2x32xf32>
    %285 = vector.extract_strided_slice %275 {offsets = [0, 32], sizes = [2, 32], strides = [1, 1]} : vector<2x96xf32> to vector<2x32xf32>
    %286 = arith.addf %284, %285 : vector<2x32xf32>
    %287 = arith.negf %286 : vector<2x32xf32>
    %288 = math.exp %287 : vector<2x32xf32>
    %cst_84 = arith.constant 1.000000e+00 : f32
    %289 = vector.broadcast %cst_84 : f32 to vector<2x32xf32>
    %290 = arith.addf %289, %288 : vector<2x32xf32>
    %291 = arith.divf %289, %290 : vector<2x32xf32>
    %292 = vector.extract_strided_slice %274 {offsets = [0, 64], sizes = [2, 32], strides = [1, 1]} : vector<2x96xf32> to vector<2x32xf32>
    %293 = vector.extract_strided_slice %275 {offsets = [0, 64], sizes = [2, 32], strides = [1, 1]} : vector<2x96xf32> to vector<2x32xf32>
    %294 = vector.broadcast %32 : vector<1x32xf32> to vector<2x32xf32>
    %295 = arith.addf %293, %294 : vector<2x32xf32>
    %296 = arith.mulf %283, %295 : vector<2x32xf32>
    %297 = arith.addf %292, %296 : vector<2x32xf32>
    %298 = math.tanh %297 : vector<2x32xf32>
    %cst_85 = arith.constant 1.000000e+00 : f32
    %299 = vector.broadcast %cst_85 : f32 to vector<2x32xf32>
    %300 = arith.subf %299, %291 : vector<2x32xf32>
    %301 = arith.mulf %300, %298 : vector<2x32xf32>
    %302 = arith.mulf %291, %235 : vector<2x32xf32>
    %303 = arith.addf %301, %302 : vector<2x32xf32>
    %c4 = arith.constant 4 : index
    %c0_86 = arith.constant 0 : index
    %c0_87 = arith.constant 0 : index
    %304 = vector.load %arg8[%c4, %c0_86, %c0_87] : memref<8x2x32xf32, #tpu.memory_space<vmem>>, vector<1x2x32xf32>
    %305 = vector.shape_cast %304 : vector<1x2x32xf32> to vector<2x32xf32>
    %306 = vector.shape_cast %303 : vector<2x32xf32> to vector<1x2x32xf32>
    tpu.vector_store %arg8[%c4, %c0_86, %c0_87], %306 {strides = array<i32>} : memref<8x2x32xf32, #tpu.memory_space<vmem>>, vector<1x2x32xf32>,
    %307 = vector.extract_strided_slice %12 {offsets = [4, 0, 0], sizes = [1, 2, 96], strides = [1, 1, 1]} : vector<8x2x96xf32> to vector<1x2x96xf32>
    %308 = vector.shape_cast %307 : vector<1x2x96xf32> to vector<2x96xf32>
    %cst_88 = arith.constant dense<0.000000e+00> : vector<2x96xf32>
    %309 = tpu.matmul %269, %24, %cst_88 {dimension_numbers = #tpu.dot_dimension_numbers<[1], [0], [0], [1], [0, 0, 1, 1], [], []>} : vector<2x32xf32>, vector<32x96xf32>, vector<2x96xf32> -> vector<2x96xf32>
    %310 = vector.extract_strided_slice %308 {offsets = [0, 0], sizes = [2, 32], strides = [1, 1]} : vector<2x96xf32> to vector<2x32xf32>
    %311 = vector.extract_strided_slice %309 {offsets = [0, 0], sizes = [2, 32], strides = [1, 1]} : vector<2x96xf32> to vector<2x32xf32>
    %312 = arith.addf %310, %311 : vector<2x32xf32>
    %313 = arith.negf %312 : vector<2x32xf32>
    %314 = math.exp %313 : vector<2x32xf32>
    %cst_89 = arith.constant 1.000000e+00 : f32
    %315 = vector.broadcast %cst_89 : f32 to vector<2x32xf32>
    %316 = arith.addf %315, %314 : vector<2x32xf32>
    %317 = arith.divf %315, %316 : vector<2x32xf32>
    %318 = vector.extract_strided_slice %308 {offsets = [0, 32], sizes = [2, 32], strides = [1, 1]} : vector<2x96xf32> to vector<2x32xf32>
    %319 = vector.extract_strided_slice %309 {offsets = [0, 32], sizes = [2, 32], strides = [1, 1]} : vector<2x96xf32> to vector<2x32xf32>
    %320 = arith.addf %318, %319 : vector<2x32xf32>
    %321 = arith.negf %320 : vector<2x32xf32>
    %322 = math.exp %321 : vector<2x32xf32>
    %cst_90 = arith.constant 1.000000e+00 : f32
    %323 = vector.broadcast %cst_90 : f32 to vector<2x32xf32>
    %324 = arith.addf %323, %322 : vector<2x32xf32>
    %325 = arith.divf %323, %324 : vector<2x32xf32>
    %326 = vector.extract_strided_slice %308 {offsets = [0, 64], sizes = [2, 32], strides = [1, 1]} : vector<2x96xf32> to vector<2x32xf32>
    %327 = vector.extract_strided_slice %309 {offsets = [0, 64], sizes = [2, 32], strides = [1, 1]} : vector<2x96xf32> to vector<2x32xf32>
    %328 = vector.broadcast %26 : vector<1x32xf32> to vector<2x32xf32>
    %329 = arith.addf %327, %328 : vector<2x32xf32>
    %330 = arith.mulf %317, %329 : vector<2x32xf32>
    %331 = arith.addf %326, %330 : vector<2x32xf32>
    %332 = math.tanh %331 : vector<2x32xf32>
    %cst_91 = arith.constant 1.000000e+00 : f32
    %333 = vector.broadcast %cst_91 : f32 to vector<2x32xf32>
    %334 = arith.subf %333, %325 : vector<2x32xf32>
    %335 = arith.mulf %334, %332 : vector<2x32xf32>
    %336 = arith.mulf %325, %269 : vector<2x32xf32>
    %337 = arith.addf %335, %336 : vector<2x32xf32>
    %c4_92 = arith.constant 4 : index
    %c0_93 = arith.constant 0 : index
    %c0_94 = arith.constant 0 : index
    %338 = vector.load %arg7[%c4_92, %c0_93, %c0_94] : memref<8x2x32xf32, #tpu.memory_space<vmem>>, vector<1x2x32xf32>
    %339 = vector.shape_cast %338 : vector<1x2x32xf32> to vector<2x32xf32>
    %340 = vector.shape_cast %337 : vector<2x32xf32> to vector<1x2x32xf32>
    tpu.vector_store %arg7[%c4_92, %c0_93, %c0_94], %340 {strides = array<i32>} : memref<8x2x32xf32, #tpu.memory_space<vmem>>, vector<1x2x32xf32>,
    %341 = vector.extract_strided_slice %22 {offsets = [3, 0, 0], sizes = [1, 2, 96], strides = [1, 1, 1]} : vector<8x2x96xf32> to vector<1x2x96xf32>
    %342 = vector.shape_cast %341 : vector<1x2x96xf32> to vector<2x96xf32>
    %cst_95 = arith.constant dense<0.000000e+00> : vector<2x96xf32>
    %343 = tpu.matmul %303, %30, %cst_95 {dimension_numbers = #tpu.dot_dimension_numbers<[1], [0], [0], [1], [0, 0, 1, 1], [], []>} : vector<2x32xf32>, vector<32x96xf32>, vector<2x96xf32> -> vector<2x96xf32>
    %344 = vector.extract_strided_slice %342 {offsets = [0, 0], sizes = [2, 32], strides = [1, 1]} : vector<2x96xf32> to vector<2x32xf32>
    %345 = vector.extract_strided_slice %343 {offsets = [0, 0], sizes = [2, 32], strides = [1, 1]} : vector<2x96xf32> to vector<2x32xf32>
    %346 = arith.addf %344, %345 : vector<2x32xf32>
    %347 = arith.negf %346 : vector<2x32xf32>
    %348 = math.exp %347 : vector<2x32xf32>
    %cst_96 = arith.constant 1.000000e+00 : f32
    %349 = vector.broadcast %cst_96 : f32 to vector<2x32xf32>
    %350 = arith.addf %349, %348 : vector<2x32xf32>
    %351 = arith.divf %349, %350 : vector<2x32xf32>
    %352 = vector.extract_strided_slice %342 {offsets = [0, 32], sizes = [2, 32], strides = [1, 1]} : vector<2x96xf32> to vector<2x32xf32>
    %353 = vector.extract_strided_slice %343 {offsets = [0, 32], sizes = [2, 32], strides = [1, 1]} : vector<2x96xf32> to vector<2x32xf32>
    %354 = arith.addf %352, %353 : vector<2x32xf32>
    %355 = arith.negf %354 : vector<2x32xf32>
    %356 = math.exp %355 : vector<2x32xf32>
    %cst_97 = arith.constant 1.000000e+00 : f32
    %357 = vector.broadcast %cst_97 : f32 to vector<2x32xf32>
    %358 = arith.addf %357, %356 : vector<2x32xf32>
    %359 = arith.divf %357, %358 : vector<2x32xf32>
    %360 = vector.extract_strided_slice %342 {offsets = [0, 64], sizes = [2, 32], strides = [1, 1]} : vector<2x96xf32> to vector<2x32xf32>
    %361 = vector.extract_strided_slice %343 {offsets = [0, 64], sizes = [2, 32], strides = [1, 1]} : vector<2x96xf32> to vector<2x32xf32>
    %362 = vector.broadcast %32 : vector<1x32xf32> to vector<2x32xf32>
    %363 = arith.addf %361, %362 : vector<2x32xf32>
    %364 = arith.mulf %351, %363 : vector<2x32xf32>
    %365 = arith.addf %360, %364 : vector<2x32xf32>
    %366 = math.tanh %365 : vector<2x32xf32>
    %cst_98 = arith.constant 1.000000e+00 : f32
    %367 = vector.broadcast %cst_98 : f32 to vector<2x32xf32>
    %368 = arith.subf %367, %359 : vector<2x32xf32>
    %369 = arith.mulf %368, %366 : vector<2x32xf32>
    %370 = arith.mulf %359, %303 : vector<2x32xf32>
    %371 = arith.addf %369, %370 : vector<2x32xf32>
    %c3_99 = arith.constant 3 : index
    %c0_100 = arith.constant 0 : index
    %c0_101 = arith.constant 0 : index
    %372 = vector.load %arg8[%c3_99, %c0_100, %c0_101] : memref<8x2x32xf32, #tpu.memory_space<vmem>>, vector<1x2x32xf32>
    %373 = vector.shape_cast %372 : vector<1x2x32xf32> to vector<2x32xf32>
    %374 = vector.shape_cast %371 : vector<2x32xf32> to vector<1x2x32xf32>
    tpu.vector_store %arg8[%c3_99, %c0_100, %c0_101], %374 {strides = array<i32>} : memref<8x2x32xf32, #tpu.memory_space<vmem>>, vector<1x2x32xf32>,
    %375 = vector.extract_strided_slice %12 {offsets = [5, 0, 0], sizes = [1, 2, 96], strides = [1, 1, 1]} : vector<8x2x96xf32> to vector<1x2x96xf32>
    %376 = vector.shape_cast %375 : vector<1x2x96xf32> to vector<2x96xf32>
    %cst_102 = arith.constant dense<0.000000e+00> : vector<2x96xf32>
    %377 = tpu.matmul %337, %24, %cst_102 {dimension_numbers = #tpu.dot_dimension_numbers<[1], [0], [0], [1], [0, 0, 1, 1], [], []>} : vector<2x32xf32>, vector<32x96xf32>, vector<2x96xf32> -> vector<2x96xf32>
    %378 = vector.extract_strided_slice %376 {offsets = [0, 0], sizes = [2, 32], strides = [1, 1]} : vector<2x96xf32> to vector<2x32xf32>
    %379 = vector.extract_strided_slice %377 {offsets = [0, 0], sizes = [2, 32], strides = [1, 1]} : vector<2x96xf32> to vector<2x32xf32>
    %380 = arith.addf %378, %379 : vector<2x32xf32>
    %381 = arith.negf %380 : vector<2x32xf32>
    %382 = math.exp %381 : vector<2x32xf32>
    %cst_103 = arith.constant 1.000000e+00 : f32
    %383 = vector.broadcast %cst_103 : f32 to vector<2x32xf32>
    %384 = arith.addf %383, %382 : vector<2x32xf32>
    %385 = arith.divf %383, %384 : vector<2x32xf32>
    %386 = vector.extract_strided_slice %376 {offsets = [0, 32], sizes = [2, 32], strides = [1, 1]} : vector<2x96xf32> to vector<2x32xf32>
    %387 = vector.extract_strided_slice %377 {offsets = [0, 32], sizes = [2, 32], strides = [1, 1]} : vector<2x96xf32> to vector<2x32xf32>
    %388 = arith.addf %386, %387 : vector<2x32xf32>
    %389 = arith.negf %388 : vector<2x32xf32>
    %390 = math.exp %389 : vector<2x32xf32>
    %cst_104 = arith.constant 1.000000e+00 : f32
    %391 = vector.broadcast %cst_104 : f32 to vector<2x32xf32>
    %392 = arith.addf %391, %390 : vector<2x32xf32>
    %393 = arith.divf %391, %392 : vector<2x32xf32>
    %394 = vector.extract_strided_slice %376 {offsets = [0, 64], sizes = [2, 32], strides = [1, 1]} : vector<2x96xf32> to vector<2x32xf32>
    %395 = vector.extract_strided_slice %377 {offsets = [0, 64], sizes = [2, 32], strides = [1, 1]} : vector<2x96xf32> to vector<2x32xf32>
    %396 = vector.broadcast %26 : vector<1x32xf32> to vector<2x32xf32>
    %397 = arith.addf %395, %396 : vector<2x32xf32>
    %398 = arith.mulf %385, %397 : vector<2x32xf32>
    %399 = arith.addf %394, %398 : vector<2x32xf32>
    %400 = math.tanh %399 : vector<2x32xf32>
    %cst_105 = arith.constant 1.000000e+00 : f32
    %401 = vector.broadcast %cst_105 : f32 to vector<2x32xf32>
    %402 = arith.subf %401, %393 : vector<2x32xf32>
    %403 = arith.mulf %402, %400 : vector<2x32xf32>
    %404 = arith.mulf %393, %337 : vector<2x32xf32>
    %405 = arith.addf %403, %404 : vector<2x32xf32>
    %c5_106 = arith.constant 5 : index
    %c0_107 = arith.constant 0 : index
    %c0_108 = arith.constant 0 : index
    %406 = vector.load %arg7[%c5_106, %c0_107, %c0_108] : memref<8x2x32xf32, #tpu.memory_space<vmem>>, vector<1x2x32xf32>
    %407 = vector.shape_cast %406 : vector<1x2x32xf32> to vector<2x32xf32>
    %408 = vector.shape_cast %405 : vector<2x32xf32> to vector<1x2x32xf32>
    tpu.vector_store %arg7[%c5_106, %c0_107, %c0_108], %408 {strides = array<i32>} : memref<8x2x32xf32, #tpu.memory_space<vmem>>, vector<1x2x32xf32>,
    %409 = vector.extract_strided_slice %22 {offsets = [2, 0, 0], sizes = [1, 2, 96], strides = [1, 1, 1]} : vector<8x2x96xf32> to vector<1x2x96xf32>
    %410 = vector.shape_cast %409 : vector<1x2x96xf32> to vector<2x96xf32>
    %cst_109 = arith.constant dense<0.000000e+00> : vector<2x96xf32>
    %411 = tpu.matmul %371, %30, %cst_109 {dimension_numbers = #tpu.dot_dimension_numbers<[1], [0], [0], [1], [0, 0, 1, 1], [], []>} : vector<2x32xf32>, vector<32x96xf32>, vector<2x96xf32> -> vector<2x96xf32>
    %412 = vector.extract_strided_slice %410 {offsets = [0, 0], sizes = [2, 32], strides = [1, 1]} : vector<2x96xf32> to vector<2x32xf32>
    %413 = vector.extract_strided_slice %411 {offsets = [0, 0], sizes = [2, 32], strides = [1, 1]} : vector<2x96xf32> to vector<2x32xf32>
    %414 = arith.addf %412, %413 : vector<2x32xf32>
    %415 = arith.negf %414 : vector<2x32xf32>
    %416 = math.exp %415 : vector<2x32xf32>
    %cst_110 = arith.constant 1.000000e+00 : f32
    %417 = vector.broadcast %cst_110 : f32 to vector<2x32xf32>
    %418 = arith.addf %417, %416 : vector<2x32xf32>
    %419 = arith.divf %417, %418 : vector<2x32xf32>
    %420 = vector.extract_strided_slice %410 {offsets = [0, 32], sizes = [2, 32], strides = [1, 1]} : vector<2x96xf32> to vector<2x32xf32>
    %421 = vector.extract_strided_slice %411 {offsets = [0, 32], sizes = [2, 32], strides = [1, 1]} : vector<2x96xf32> to vector<2x32xf32>
    %422 = arith.addf %420, %421 : vector<2x32xf32>
    %423 = arith.negf %422 : vector<2x32xf32>
    %424 = math.exp %423 : vector<2x32xf32>
    %cst_111 = arith.constant 1.000000e+00 : f32
    %425 = vector.broadcast %cst_111 : f32 to vector<2x32xf32>
    %426 = arith.addf %425, %424 : vector<2x32xf32>
    %427 = arith.divf %425, %426 : vector<2x32xf32>
    %428 = vector.extract_strided_slice %410 {offsets = [0, 64], sizes = [2, 32], strides = [1, 1]} : vector<2x96xf32> to vector<2x32xf32>
    %429 = vector.extract_strided_slice %411 {offsets = [0, 64], sizes = [2, 32], strides = [1, 1]} : vector<2x96xf32> to vector<2x32xf32>
    %430 = vector.broadcast %32 : vector<1x32xf32> to vector<2x32xf32>
    %431 = arith.addf %429, %430 : vector<2x32xf32>
    %432 = arith.mulf %419, %431 : vector<2x32xf32>
    %433 = arith.addf %428, %432 : vector<2x32xf32>
    %434 = math.tanh %433 : vector<2x32xf32>
    %cst_112 = arith.constant 1.000000e+00 : f32
    %435 = vector.broadcast %cst_112 : f32 to vector<2x32xf32>
    %436 = arith.subf %435, %427 : vector<2x32xf32>
    %437 = arith.mulf %436, %434 : vector<2x32xf32>
    %438 = arith.mulf %427, %371 : vector<2x32xf32>
    %439 = arith.addf %437, %438 : vector<2x32xf32>
    %c2_113 = arith.constant 2 : index
    %c0_114 = arith.constant 0 : index
    %c0_115 = arith.constant 0 : index
    %440 = vector.load %arg8[%c2_113, %c0_114, %c0_115] : memref<8x2x32xf32, #tpu.memory_space<vmem>>, vector<1x2x32xf32>
    %441 = vector.shape_cast %440 : vector<1x2x32xf32> to vector<2x32xf32>
    %442 = vector.shape_cast %439 : vector<2x32xf32> to vector<1x2x32xf32>
    tpu.vector_store %arg8[%c2_113, %c0_114, %c0_115], %442 {strides = array<i32>} : memref<8x2x32xf32, #tpu.memory_space<vmem>>, vector<1x2x32xf32>,
    %443 = vector.extract_strided_slice %12 {offsets = [6, 0, 0], sizes = [1, 2, 96], strides = [1, 1, 1]} : vector<8x2x96xf32> to vector<1x2x96xf32>
    %444 = vector.shape_cast %443 : vector<1x2x96xf32> to vector<2x96xf32>
    %cst_116 = arith.constant dense<0.000000e+00> : vector<2x96xf32>
    %445 = tpu.matmul %405, %24, %cst_116 {dimension_numbers = #tpu.dot_dimension_numbers<[1], [0], [0], [1], [0, 0, 1, 1], [], []>} : vector<2x32xf32>, vector<32x96xf32>, vector<2x96xf32> -> vector<2x96xf32>
    %446 = vector.extract_strided_slice %444 {offsets = [0, 0], sizes = [2, 32], strides = [1, 1]} : vector<2x96xf32> to vector<2x32xf32>
    %447 = vector.extract_strided_slice %445 {offsets = [0, 0], sizes = [2, 32], strides = [1, 1]} : vector<2x96xf32> to vector<2x32xf32>
    %448 = arith.addf %446, %447 : vector<2x32xf32>
    %449 = arith.negf %448 : vector<2x32xf32>
    %450 = math.exp %449 : vector<2x32xf32>
    %cst_117 = arith.constant 1.000000e+00 : f32
    %451 = vector.broadcast %cst_117 : f32 to vector<2x32xf32>
    %452 = arith.addf %451, %450 : vector<2x32xf32>
    %453 = arith.divf %451, %452 : vector<2x32xf32>
    %454 = vector.extract_strided_slice %444 {offsets = [0, 32], sizes = [2, 32], strides = [1, 1]} : vector<2x96xf32> to vector<2x32xf32>
    %455 = vector.extract_strided_slice %445 {offsets = [0, 32], sizes = [2, 32], strides = [1, 1]} : vector<2x96xf32> to vector<2x32xf32>
    %456 = arith.addf %454, %455 : vector<2x32xf32>
    %457 = arith.negf %456 : vector<2x32xf32>
    %458 = math.exp %457 : vector<2x32xf32>
    %cst_118 = arith.constant 1.000000e+00 : f32
    %459 = vector.broadcast %cst_118 : f32 to vector<2x32xf32>
    %460 = arith.addf %459, %458 : vector<2x32xf32>
    %461 = arith.divf %459, %460 : vector<2x32xf32>
    %462 = vector.extract_strided_slice %444 {offsets = [0, 64], sizes = [2, 32], strides = [1, 1]} : vector<2x96xf32> to vector<2x32xf32>
    %463 = vector.extract_strided_slice %445 {offsets = [0, 64], sizes = [2, 32], strides = [1, 1]} : vector<2x96xf32> to vector<2x32xf32>
    %464 = vector.broadcast %26 : vector<1x32xf32> to vector<2x32xf32>
    %465 = arith.addf %463, %464 : vector<2x32xf32>
    %466 = arith.mulf %453, %465 : vector<2x32xf32>
    %467 = arith.addf %462, %466 : vector<2x32xf32>
    %468 = math.tanh %467 : vector<2x32xf32>
    %cst_119 = arith.constant 1.000000e+00 : f32
    %469 = vector.broadcast %cst_119 : f32 to vector<2x32xf32>
    %470 = arith.subf %469, %461 : vector<2x32xf32>
    %471 = arith.mulf %470, %468 : vector<2x32xf32>
    %472 = arith.mulf %461, %405 : vector<2x32xf32>
    %473 = arith.addf %471, %472 : vector<2x32xf32>
    %c6_120 = arith.constant 6 : index
    %c0_121 = arith.constant 0 : index
    %c0_122 = arith.constant 0 : index
    %474 = vector.load %arg7[%c6_120, %c0_121, %c0_122] : memref<8x2x32xf32, #tpu.memory_space<vmem>>, vector<1x2x32xf32>
    %475 = vector.shape_cast %474 : vector<1x2x32xf32> to vector<2x32xf32>
    %476 = vector.shape_cast %473 : vector<2x32xf32> to vector<1x2x32xf32>
    tpu.vector_store %arg7[%c6_120, %c0_121, %c0_122], %476 {strides = array<i32>} : memref<8x2x32xf32, #tpu.memory_space<vmem>>, vector<1x2x32xf32>,
    %477 = vector.extract_strided_slice %22 {offsets = [1, 0, 0], sizes = [1, 2, 96], strides = [1, 1, 1]} : vector<8x2x96xf32> to vector<1x2x96xf32>
    %478 = vector.shape_cast %477 : vector<1x2x96xf32> to vector<2x96xf32>
    %cst_123 = arith.constant dense<0.000000e+00> : vector<2x96xf32>
    %479 = tpu.matmul %439, %30, %cst_123 {dimension_numbers = #tpu.dot_dimension_numbers<[1], [0], [0], [1], [0, 0, 1, 1], [], []>} : vector<2x32xf32>, vector<32x96xf32>, vector<2x96xf32> -> vector<2x96xf32>
    %480 = vector.extract_strided_slice %478 {offsets = [0, 0], sizes = [2, 32], strides = [1, 1]} : vector<2x96xf32> to vector<2x32xf32>
    %481 = vector.extract_strided_slice %479 {offsets = [0, 0], sizes = [2, 32], strides = [1, 1]} : vector<2x96xf32> to vector<2x32xf32>
    %482 = arith.addf %480, %481 : vector<2x32xf32>
    %483 = arith.negf %482 : vector<2x32xf32>
    %484 = math.exp %483 : vector<2x32xf32>
    %cst_124 = arith.constant 1.000000e+00 : f32
    %485 = vector.broadcast %cst_124 : f32 to vector<2x32xf32>
    %486 = arith.addf %485, %484 : vector<2x32xf32>
    %487 = arith.divf %485, %486 : vector<2x32xf32>
    %488 = vector.extract_strided_slice %478 {offsets = [0, 32], sizes = [2, 32], strides = [1, 1]} : vector<2x96xf32> to vector<2x32xf32>
    %489 = vector.extract_strided_slice %479 {offsets = [0, 32], sizes = [2, 32], strides = [1, 1]} : vector<2x96xf32> to vector<2x32xf32>
    %490 = arith.addf %488, %489 : vector<2x32xf32>
    %491 = arith.negf %490 : vector<2x32xf32>
    %492 = math.exp %491 : vector<2x32xf32>
    %cst_125 = arith.constant 1.000000e+00 : f32
    %493 = vector.broadcast %cst_125 : f32 to vector<2x32xf32>
    %494 = arith.addf %493, %492 : vector<2x32xf32>
    %495 = arith.divf %493, %494 : vector<2x32xf32>
    %496 = vector.extract_strided_slice %478 {offsets = [0, 64], sizes = [2, 32], strides = [1, 1]} : vector<2x96xf32> to vector<2x32xf32>
    %497 = vector.extract_strided_slice %479 {offsets = [0, 64], sizes = [2, 32], strides = [1, 1]} : vector<2x96xf32> to vector<2x32xf32>
    %498 = vector.broadcast %32 : vector<1x32xf32> to vector<2x32xf32>
    %499 = arith.addf %497, %498 : vector<2x32xf32>
    %500 = arith.mulf %487, %499 : vector<2x32xf32>
    %501 = arith.addf %496, %500 : vector<2x32xf32>
    %502 = math.tanh %501 : vector<2x32xf32>
    %cst_126 = arith.constant 1.000000e+00 : f32
    %503 = vector.broadcast %cst_126 : f32 to vector<2x32xf32>
    %504 = arith.subf %503, %495 : vector<2x32xf32>
    %505 = arith.mulf %504, %502 : vector<2x32xf32>
    %506 = arith.mulf %495, %439 : vector<2x32xf32>
    %507 = arith.addf %505, %506 : vector<2x32xf32>
    %c1_127 = arith.constant 1 : index
    %c0_128 = arith.constant 0 : index
    %c0_129 = arith.constant 0 : index
    %508 = vector.load %arg8[%c1_127, %c0_128, %c0_129] : memref<8x2x32xf32, #tpu.memory_space<vmem>>, vector<1x2x32xf32>
    %509 = vector.shape_cast %508 : vector<1x2x32xf32> to vector<2x32xf32>
    %510 = vector.shape_cast %507 : vector<2x32xf32> to vector<1x2x32xf32>
    tpu.vector_store %arg8[%c1_127, %c0_128, %c0_129], %510 {strides = array<i32>} : memref<8x2x32xf32, #tpu.memory_space<vmem>>, vector<1x2x32xf32>,
    %511 = vector.extract_strided_slice %12 {offsets = [7, 0, 0], sizes = [1, 2, 96], strides = [1, 1, 1]} : vector<8x2x96xf32> to vector<1x2x96xf32>
    %512 = vector.shape_cast %511 : vector<1x2x96xf32> to vector<2x96xf32>
    %cst_130 = arith.constant dense<0.000000e+00> : vector<2x96xf32>
    %513 = tpu.matmul %473, %24, %cst_130 {dimension_numbers = #tpu.dot_dimension_numbers<[1], [0], [0], [1], [0, 0, 1, 1], [], []>} : vector<2x32xf32>, vector<32x96xf32>, vector<2x96xf32> -> vector<2x96xf32>
    %514 = vector.extract_strided_slice %512 {offsets = [0, 0], sizes = [2, 32], strides = [1, 1]} : vector<2x96xf32> to vector<2x32xf32>
    %515 = vector.extract_strided_slice %513 {offsets = [0, 0], sizes = [2, 32], strides = [1, 1]} : vector<2x96xf32> to vector<2x32xf32>
    %516 = arith.addf %514, %515 : vector<2x32xf32>
    %517 = arith.negf %516 : vector<2x32xf32>
    %518 = math.exp %517 : vector<2x32xf32>
    %cst_131 = arith.constant 1.000000e+00 : f32
    %519 = vector.broadcast %cst_131 : f32 to vector<2x32xf32>
    %520 = arith.addf %519, %518 : vector<2x32xf32>
    %521 = arith.divf %519, %520 : vector<2x32xf32>
    %522 = vector.extract_strided_slice %512 {offsets = [0, 32], sizes = [2, 32], strides = [1, 1]} : vector<2x96xf32> to vector<2x32xf32>
    %523 = vector.extract_strided_slice %513 {offsets = [0, 32], sizes = [2, 32], strides = [1, 1]} : vector<2x96xf32> to vector<2x32xf32>
    %524 = arith.addf %522, %523 : vector<2x32xf32>
    %525 = arith.negf %524 : vector<2x32xf32>
    %526 = math.exp %525 : vector<2x32xf32>
    %cst_132 = arith.constant 1.000000e+00 : f32
    %527 = vector.broadcast %cst_132 : f32 to vector<2x32xf32>
    %528 = arith.addf %527, %526 : vector<2x32xf32>
    %529 = arith.divf %527, %528 : vector<2x32xf32>
    %530 = vector.extract_strided_slice %512 {offsets = [0, 64], sizes = [2, 32], strides = [1, 1]} : vector<2x96xf32> to vector<2x32xf32>
    %531 = vector.extract_strided_slice %513 {offsets = [0, 64], sizes = [2, 32], strides = [1, 1]} : vector<2x96xf32> to vector<2x32xf32>
    %532 = vector.broadcast %26 : vector<1x32xf32> to vector<2x32xf32>
    %533 = arith.addf %531, %532 : vector<2x32xf32>
    %534 = arith.mulf %521, %533 : vector<2x32xf32>
    %535 = arith.addf %530, %534 : vector<2x32xf32>
    %536 = math.tanh %535 : vector<2x32xf32>
    %cst_133 = arith.constant 1.000000e+00 : f32
    %537 = vector.broadcast %cst_133 : f32 to vector<2x32xf32>
    %538 = arith.subf %537, %529 : vector<2x32xf32>
    %539 = arith.mulf %538, %536 : vector<2x32xf32>
    %540 = arith.mulf %529, %473 : vector<2x32xf32>
    %541 = arith.addf %539, %540 : vector<2x32xf32>
    %c7_134 = arith.constant 7 : index
    %c0_135 = arith.constant 0 : index
    %c0_136 = arith.constant 0 : index
    %542 = vector.load %arg7[%c7_134, %c0_135, %c0_136] : memref<8x2x32xf32, #tpu.memory_space<vmem>>, vector<1x2x32xf32>
    %543 = vector.shape_cast %542 : vector<1x2x32xf32> to vector<2x32xf32>
    %544 = vector.shape_cast %541 : vector<2x32xf32> to vector<1x2x32xf32>
    tpu.vector_store %arg7[%c7_134, %c0_135, %c0_136], %544 {strides = array<i32>} : memref<8x2x32xf32, #tpu.memory_space<vmem>>, vector<1x2x32xf32>,
    %545 = vector.extract_strided_slice %22 {offsets = [0, 0, 0], sizes = [1, 2, 96], strides = [1, 1, 1]} : vector<8x2x96xf32> to vector<1x2x96xf32>
    %546 = vector.shape_cast %545 : vector<1x2x96xf32> to vector<2x96xf32>
    %cst_137 = arith.constant dense<0.000000e+00> : vector<2x96xf32>
    %547 = tpu.matmul %507, %30, %cst_137 {dimension_numbers = #tpu.dot_dimension_numbers<[1], [0], [0], [1], [0, 0, 1, 1], [], []>} : vector<2x32xf32>, vector<32x96xf32>, vector<2x96xf32> -> vector<2x96xf32>
    %548 = vector.extract_strided_slice %546 {offsets = [0, 0], sizes = [2, 32], strides = [1, 1]} : vector<2x96xf32> to vector<2x32xf32>
    %549 = vector.extract_strided_slice %547 {offsets = [0, 0], sizes = [2, 32], strides = [1, 1]} : vector<2x96xf32> to vector<2x32xf32>
    %550 = arith.addf %548, %549 : vector<2x32xf32>
    %551 = arith.negf %550 : vector<2x32xf32>
    %552 = math.exp %551 : vector<2x32xf32>
    %cst_138 = arith.constant 1.000000e+00 : f32
    %553 = vector.broadcast %cst_138 : f32 to vector<2x32xf32>
    %554 = arith.addf %553, %552 : vector<2x32xf32>
    %555 = arith.divf %553, %554 : vector<2x32xf32>
    %556 = vector.extract_strided_slice %546 {offsets = [0, 32], sizes = [2, 32], strides = [1, 1]} : vector<2x96xf32> to vector<2x32xf32>
    %557 = vector.extract_strided_slice %547 {offsets = [0, 32], sizes = [2, 32], strides = [1, 1]} : vector<2x96xf32> to vector<2x32xf32>
    %558 = arith.addf %556, %557 : vector<2x32xf32>
    %559 = arith.negf %558 : vector<2x32xf32>
    %560 = math.exp %559 : vector<2x32xf32>
    %cst_139 = arith.constant 1.000000e+00 : f32
    %561 = vector.broadcast %cst_139 : f32 to vector<2x32xf32>
    %562 = arith.addf %561, %560 : vector<2x32xf32>
    %563 = arith.divf %561, %562 : vector<2x32xf32>
    %564 = vector.extract_strided_slice %546 {offsets = [0, 64], sizes = [2, 32], strides = [1, 1]} : vector<2x96xf32> to vector<2x32xf32>
    %565 = vector.extract_strided_slice %547 {offsets = [0, 64], sizes = [2, 32], strides = [1, 1]} : vector<2x96xf32> to vector<2x32xf32>
    %566 = vector.broadcast %32 : vector<1x32xf32> to vector<2x32xf32>
    %567 = arith.addf %565, %566 : vector<2x32xf32>
    %568 = arith.mulf %555, %567 : vector<2x32xf32>
    %569 = arith.addf %564, %568 : vector<2x32xf32>
    %570 = math.tanh %569 : vector<2x32xf32>
    %cst_140 = arith.constant 1.000000e+00 : f32
    %571 = vector.broadcast %cst_140 : f32 to vector<2x32xf32>
    %572 = arith.subf %571, %563 : vector<2x32xf32>
    %573 = arith.mulf %572, %570 : vector<2x32xf32>
    %574 = arith.mulf %563, %507 : vector<2x32xf32>
    %575 = arith.addf %573, %574 : vector<2x32xf32>
    %c0_141 = arith.constant 0 : index
    %c0_142 = arith.constant 0 : index
    %c0_143 = arith.constant 0 : index
    %576 = vector.load %arg8[%c0_141, %c0_142, %c0_143] : memref<8x2x32xf32, #tpu.memory_space<vmem>>, vector<1x2x32xf32>
    %577 = vector.shape_cast %576 : vector<1x2x32xf32> to vector<2x32xf32>
    %578 = vector.shape_cast %575 : vector<2x32xf32> to vector<1x2x32xf32>
    tpu.vector_store %arg8[%c0_141, %c0_142, %c0_143], %578 {strides = array<i32>} : memref<8x2x32xf32, #tpu.memory_space<vmem>>, vector<1x2x32xf32>,
    %c0_144 = arith.constant 0 : index
    %c0_145 = arith.constant 0 : index
    %c0_146 = arith.constant 0 : index
    %579 = vector.load %arg9[%c0_144, %c0_145, %c0_146] : memref<2x2x32xf32, #tpu.memory_space<vmem>>, vector<1x2x32xf32>
    %580 = vector.shape_cast %579 : vector<1x2x32xf32> to vector<2x32xf32>
    %581 = vector.shape_cast %541 : vector<2x32xf32> to vector<1x2x32xf32>
    tpu.vector_store %arg9[%c0_144, %c0_145, %c0_146], %581 {strides = array<i32>} : memref<2x2x32xf32, #tpu.memory_space<vmem>>, vector<1x2x32xf32>,
    %c1_147 = arith.constant 1 : index
    %c0_148 = arith.constant 0 : index
    %c0_149 = arith.constant 0 : index
    %582 = vector.load %arg9[%c1_147, %c0_148, %c0_149] : memref<2x2x32xf32, #tpu.memory_space<vmem>>, vector<1x2x32xf32>
    %583 = vector.shape_cast %582 : vector<1x2x32xf32> to vector<2x32xf32>
    %584 = vector.shape_cast %575 : vector<2x32xf32> to vector<1x2x32xf32>
    tpu.vector_store %arg9[%c1_147, %c0_148, %c0_149], %584 {strides = array<i32>} : memref<2x2x32xf32, #tpu.memory_space<vmem>>, vector<1x2x32xf32>,
    return
  }
  func.func @transform_0(%arg0: i32) -> (i32, i32, i32) {
    %c0_i32 = arith.constant 0 : i32
    %c0_i32_0 = arith.constant 0 : i32
    %c0_i32_1 = arith.constant 0 : i32
    return %arg0, %c0_i32, %c0_i32_0 : i32, i32, i32
  }
  func.func @transform_1(%arg0: i32) -> (i32, i32, i32) {
    %c0_i32 = arith.constant 0 : i32
    %0 = arith.subi %c0_i32, %arg0 : i32
    %c0_i32_0 = arith.constant 0 : i32
    %c0_i32_1 = arith.constant 0 : i32
    %c0_i32_2 = arith.constant 0 : i32
    return %0, %c0_i32_0, %c0_i32_1 : i32, i32, i32
  }
  func.func @transform_2(%arg0: i32) -> (i32, i32, i32, i32) {
    %c0_i32 = arith.constant 0 : i32
    %c0_i32_0 = arith.constant 0 : i32
    %c0_i32_1 = arith.constant 0 : i32
    %c0_i32_2 = arith.constant 0 : i32
    %c0_i32_3 = arith.constant 0 : i32
    return %c0_i32, %c0_i32_0, %c0_i32_1, %c0_i32_2 : i32, i32, i32, i32
  }
  func.func @transform_3(%arg0: i32) -> (i32, i32, i32) {
    %c0_i32 = arith.constant 0 : i32
    %c0_i32_0 = arith.constant 0 : i32
    %c0_i32_1 = arith.constant 0 : i32
    %c0_i32_2 = arith.constant 0 : i32
    return %c0_i32, %c0_i32_0, %c0_i32_1 : i32, i32, i32
  }
  func.func @transform_4(%arg0: i32) -> (i32, i32, i32) {
    %c0_i32 = arith.constant 0 : i32
    %c0_i32_0 = arith.constant 0 : i32
    %c0_i32_1 = arith.constant 0 : i32
    %c0_i32_2 = arith.constant 0 : i32
    return %c0_i32, %c0_i32_0, %c0_i32_1 : i32, i32, i32
  }
  func.func @transform_5(%arg0: i32) -> (i32, i32, i32) {
    %c0_i32 = arith.constant 0 : i32
    %c0_i32_0 = arith.constant 0 : i32
    %c0_i32_1 = arith.constant 0 : i32
    %c0_i32_2 = arith.constant 0 : i32
    return %c0_i32, %c0_i32_0, %c0_i32_1 : i32, i32, i32
  }
  func.func @transform_6(%arg0: i32) -> (i32, i32, i32) {
    %c0_i32 = arith.constant 0 : i32
    %c0_i32_0 = arith.constant 0 : i32
    %c0_i32_1 = arith.constant 0 : i32
    return %arg0, %c0_i32, %c0_i32_0 : i32, i32, i32
  }
  func.func @transform_7(%arg0: i32) -> (i32, i32, i32) {
    %c0_i32 = arith.constant 0 : i32
    %0 = arith.subi %c0_i32, %arg0 : i32
    %c0_i32_0 = arith.constant 0 : i32
    %c0_i32_1 = arith.constant 0 : i32
    %c0_i32_2 = arith.constant 0 : i32
    return %0, %c0_i32_0, %c0_i32_1 : i32, i32, i32
  }
  func.func @transform_8(%arg0: i32) -> (i32, i32, i32) {
    %c0_i32 = arith.constant 0 : i32
    %c0_i32_0 = arith.constant 0 : i32
    %c0_i32_1 = arith.constant 0 : i32
    %c0_i32_2 = arith.constant 0 : i32
    return %c0_i32, %c0_i32_0, %c0_i32_1 : i32, i32, i32
  }
}

module attributes {stable_mosaic.version = 11 : i64} {
  func.func @kernel(%arg0: i32, %arg1: memref<8x2x32xf32, #tpu.memory_space<vmem>>, %arg2: memref<8x2x32xf32, #tpu.memory_space<vmem>>, %arg3: memref<8x2x32xf32, #tpu.memory_space<vmem>>, %arg4: memref<8x2x32xf32, #tpu.memory_space<vmem>>, %arg5: memref<2x2x32x96xf32, #tpu.memory_space<vmem>>, %arg6: memref<2x1x96xf32, #tpu.memory_space<vmem>>, %arg7: memref<2x32x96xf32, #tpu.memory_space<vmem>>, %arg8: memref<2x1x32xf32, #tpu.memory_space<vmem>>, %arg9: memref<8x2x32xf32, #tpu.memory_space<vmem>>, %arg10: memref<8x2x32xf32, #tpu.memory_space<vmem>>, %arg11: memref<2x2x32xf32, #tpu.memory_space<vmem>>) attributes {dimension_semantics = [#tpu.dimension_semantics<arbitrary>], iteration_bounds = array<i64: 1>, scalar_prefetch = 0 : i64, scratch_operands = 0 : i64, tpu.core_type = #tpu.core_type<tc>, window_params = [{transform_indices = @transform_0, window_bounds = array<i64: 8, 2, 32>}, {transform_indices = @transform_1, window_bounds = array<i64: 8, 2, 32>}, {transform_indices = @transform_2, window_bounds = array<i64: 8, 2, 32>}, {transform_indices = @transform_3, window_bounds = array<i64: 8, 2, 32>}, {pipeline_mode = #tpu.pipeline_mode<synchronous>, transform_indices = @transform_4, window_bounds = array<i64: 2, 2, 32, 96>}, {pipeline_mode = #tpu.pipeline_mode<synchronous>, transform_indices = @transform_5, window_bounds = array<i64: 2, 1, 96>}, {pipeline_mode = #tpu.pipeline_mode<synchronous>, transform_indices = @transform_6, window_bounds = array<i64: 2, 32, 96>}, {pipeline_mode = #tpu.pipeline_mode<synchronous>, transform_indices = @transform_7, window_bounds = array<i64: 2, 1, 32>}, {transform_indices = @transform_8, window_bounds = array<i64: 8, 2, 32>}, {transform_indices = @transform_9, window_bounds = array<i64: 8, 2, 32>}, {pipeline_mode = #tpu.pipeline_mode<synchronous>, transform_indices = @transform_10, window_bounds = array<i64: 2, 2, 32>}]} {
    %c0_i32 = arith.constant 0 : i32
    %0 = arith.cmpi eq, %arg0, %c0_i32 : i32
    %1 = arith.extui %0 : i1 to i32
    %c0_i32_0 = arith.constant 0 : i32
    %2 = arith.cmpi ne, %1, %c0_i32_0 : i32
    scf.if %2 {
      %cst_166 = arith.constant 0.000000e+00 : f32
      %597 = vector.broadcast %cst_166 : f32 to vector<2x2x32xf32>
      %c0_167 = arith.constant 0 : index
      %c0_168 = arith.constant 0 : index
      %c0_169 = arith.constant 0 : index
      %598 = vector.load %arg11[%c0_167, %c0_168, %c0_169] : memref<2x2x32xf32, #tpu.memory_space<vmem>>, vector<2x2x32xf32>
      tpu.vector_store %arg11[%c0_167, %c0_168, %c0_169], %597 {strides = array<i32>} : memref<2x2x32xf32, #tpu.memory_space<vmem>>, vector<2x2x32xf32>,
    } else {
    }
    %c0 = arith.constant 0 : index
    %c0_1 = arith.constant 0 : index
    %c0_2 = arith.constant 0 : index
    %3 = vector.load %arg1[%c0, %c0_1, %c0_2] : memref<8x2x32xf32, #tpu.memory_space<vmem>>, vector<8x2x32xf32>
    %4 = vector.shape_cast %3 : vector<8x2x32xf32> to vector<16x32xf32>
    %c0_3 = arith.constant 0 : index
    %c0_4 = arith.constant 0 : index
    %c0_5 = arith.constant 0 : index
    %c0_6 = arith.constant 0 : index
    %5 = vector.load %arg5[%c0_3, %c0_4, %c0_5, %c0_6] : memref<2x2x32x96xf32, #tpu.memory_space<vmem>>, vector<1x1x32x96xf32>
    %6 = vector.shape_cast %5 : vector<1x1x32x96xf32> to vector<32x96xf32>
    %cst = arith.constant dense<0.000000e+00> : vector<16x96xf32>
    %7 = tpu.matmul %4, %6, %cst {dimension_numbers = #tpu.dot_dimension_numbers<[1], [0], [0], [1], [0, 0, 1, 1], [], []>} : vector<16x32xf32>, vector<32x96xf32>, vector<16x96xf32> -> vector<16x96xf32>
    %c0_7 = arith.constant 0 : index
    %c0_8 = arith.constant 0 : index
    %c0_9 = arith.constant 0 : index
    %8 = vector.load %arg2[%c0_7, %c0_8, %c0_9] : memref<8x2x32xf32, #tpu.memory_space<vmem>>, vector<8x2x32xf32>
    %9 = vector.shape_cast %8 : vector<8x2x32xf32> to vector<16x32xf32>
    %c0_10 = arith.constant 0 : index
    %c1 = arith.constant 1 : index
    %c0_11 = arith.constant 0 : index
    %c0_12 = arith.constant 0 : index
    %10 = vector.load %arg5[%c0_10, %c1, %c0_11, %c0_12] : memref<2x2x32x96xf32, #tpu.memory_space<vmem>>, vector<1x1x32x96xf32>
    %11 = vector.shape_cast %10 : vector<1x1x32x96xf32> to vector<32x96xf32>
    %cst_13 = arith.constant dense<0.000000e+00> : vector<16x96xf32>
    %12 = tpu.matmul %9, %11, %cst_13 {dimension_numbers = #tpu.dot_dimension_numbers<[1], [0], [0], [1], [0, 0, 1, 1], [], []>} : vector<16x32xf32>, vector<32x96xf32>, vector<16x96xf32> -> vector<16x96xf32>
    %13 = arith.addf %7, %12 : vector<16x96xf32>
    %c0_14 = arith.constant 0 : index
    %c0_15 = arith.constant 0 : index
    %c0_16 = arith.constant 0 : index
    %14 = vector.load %arg6[%c0_14, %c0_15, %c0_16] : memref<2x1x96xf32, #tpu.memory_space<vmem>>, vector<1x1x96xf32>
    %15 = vector.shape_cast %14 : vector<1x1x96xf32> to vector<1x96xf32>
    %16 = vector.broadcast %15 : vector<1x96xf32> to vector<16x96xf32>
    %17 = arith.addf %13, %16 : vector<16x96xf32>
    %18 = vector.shape_cast %17 : vector<16x96xf32> to vector<8x2x96xf32>
    %c0_17 = arith.constant 0 : index
    %c0_18 = arith.constant 0 : index
    %c0_19 = arith.constant 0 : index
    %19 = vector.load %arg3[%c0_17, %c0_18, %c0_19] : memref<8x2x32xf32, #tpu.memory_space<vmem>>, vector<8x2x32xf32>
    %20 = vector.shape_cast %19 : vector<8x2x32xf32> to vector<16x32xf32>
    %c1_20 = arith.constant 1 : index
    %c0_21 = arith.constant 0 : index
    %c0_22 = arith.constant 0 : index
    %c0_23 = arith.constant 0 : index
    %21 = vector.load %arg5[%c1_20, %c0_21, %c0_22, %c0_23] : memref<2x2x32x96xf32, #tpu.memory_space<vmem>>, vector<1x1x32x96xf32>
    %22 = vector.shape_cast %21 : vector<1x1x32x96xf32> to vector<32x96xf32>
    %cst_24 = arith.constant dense<0.000000e+00> : vector<16x96xf32>
    %23 = tpu.matmul %20, %22, %cst_24 {dimension_numbers = #tpu.dot_dimension_numbers<[1], [0], [0], [1], [0, 0, 1, 1], [], []>} : vector<16x32xf32>, vector<32x96xf32>, vector<16x96xf32> -> vector<16x96xf32>
    %c0_25 = arith.constant 0 : index
    %c0_26 = arith.constant 0 : index
    %c0_27 = arith.constant 0 : index
    %24 = vector.load %arg4[%c0_25, %c0_26, %c0_27] : memref<8x2x32xf32, #tpu.memory_space<vmem>>, vector<8x2x32xf32>
    %25 = vector.shape_cast %24 : vector<8x2x32xf32> to vector<16x32xf32>
    %c1_28 = arith.constant 1 : index
    %c1_29 = arith.constant 1 : index
    %c0_30 = arith.constant 0 : index
    %c0_31 = arith.constant 0 : index
    %26 = vector.load %arg5[%c1_28, %c1_29, %c0_30, %c0_31] : memref<2x2x32x96xf32, #tpu.memory_space<vmem>>, vector<1x1x32x96xf32>
    %27 = vector.shape_cast %26 : vector<1x1x32x96xf32> to vector<32x96xf32>
    %cst_32 = arith.constant dense<0.000000e+00> : vector<16x96xf32>
    %28 = tpu.matmul %25, %27, %cst_32 {dimension_numbers = #tpu.dot_dimension_numbers<[1], [0], [0], [1], [0, 0, 1, 1], [], []>} : vector<16x32xf32>, vector<32x96xf32>, vector<16x96xf32> -> vector<16x96xf32>
    %29 = arith.addf %23, %28 : vector<16x96xf32>
    %c1_33 = arith.constant 1 : index
    %c0_34 = arith.constant 0 : index
    %c0_35 = arith.constant 0 : index
    %30 = vector.load %arg6[%c1_33, %c0_34, %c0_35] : memref<2x1x96xf32, #tpu.memory_space<vmem>>, vector<1x1x96xf32>
    %31 = vector.shape_cast %30 : vector<1x1x96xf32> to vector<1x96xf32>
    %32 = vector.broadcast %31 : vector<1x96xf32> to vector<16x96xf32>
    %33 = arith.addf %29, %32 : vector<16x96xf32>
    %34 = vector.shape_cast %33 : vector<16x96xf32> to vector<8x2x96xf32>
    %c0_36 = arith.constant 0 : index
    %c0_37 = arith.constant 0 : index
    %c0_38 = arith.constant 0 : index
    %35 = vector.load %arg7[%c0_36, %c0_37, %c0_38] : memref<2x32x96xf32, #tpu.memory_space<vmem>>, vector<1x32x96xf32>
    %36 = vector.shape_cast %35 : vector<1x32x96xf32> to vector<32x96xf32>
    %c0_39 = arith.constant 0 : index
    %c0_40 = arith.constant 0 : index
    %c0_41 = arith.constant 0 : index
    %37 = vector.load %arg8[%c0_39, %c0_40, %c0_41] : memref<2x1x32xf32, #tpu.memory_space<vmem>>, vector<1x1x32xf32>
    %38 = vector.shape_cast %37 : vector<1x1x32xf32> to vector<1x32xf32>
    %c0_42 = arith.constant 0 : index
    %c0_43 = arith.constant 0 : index
    %c0_44 = arith.constant 0 : index
    %39 = vector.load %arg11[%c0_42, %c0_43, %c0_44] : memref<2x2x32xf32, #tpu.memory_space<vmem>>, vector<1x2x32xf32>
    %40 = vector.shape_cast %39 : vector<1x2x32xf32> to vector<2x32xf32>
    %c1_45 = arith.constant 1 : index
    %c0_46 = arith.constant 0 : index
    %c0_47 = arith.constant 0 : index
    %41 = vector.load %arg7[%c1_45, %c0_46, %c0_47] : memref<2x32x96xf32, #tpu.memory_space<vmem>>, vector<1x32x96xf32>
    %42 = vector.shape_cast %41 : vector<1x32x96xf32> to vector<32x96xf32>
    %c1_48 = arith.constant 1 : index
    %c0_49 = arith.constant 0 : index
    %c0_50 = arith.constant 0 : index
    %43 = vector.load %arg8[%c1_48, %c0_49, %c0_50] : memref<2x1x32xf32, #tpu.memory_space<vmem>>, vector<1x1x32xf32>
    %44 = vector.shape_cast %43 : vector<1x1x32xf32> to vector<1x32xf32>
    %c1_51 = arith.constant 1 : index
    %c0_52 = arith.constant 0 : index
    %c0_53 = arith.constant 0 : index
    %45 = vector.load %arg11[%c1_51, %c0_52, %c0_53] : memref<2x2x32xf32, #tpu.memory_space<vmem>>, vector<1x2x32xf32>
    %46 = vector.shape_cast %45 : vector<1x2x32xf32> to vector<2x32xf32>
    %47 = vector.extract_strided_slice %18 {offsets = [0, 0, 0], sizes = [1, 2, 96], strides = [1, 1, 1]} : vector<8x2x96xf32> to vector<1x2x96xf32>
    %48 = vector.shape_cast %47 : vector<1x2x96xf32> to vector<2x96xf32>
    %cst_54 = arith.constant dense<0.000000e+00> : vector<2x96xf32>
    %49 = tpu.matmul %40, %36, %cst_54 {dimension_numbers = #tpu.dot_dimension_numbers<[1], [0], [0], [1], [0, 0, 1, 1], [], []>} : vector<2x32xf32>, vector<32x96xf32>, vector<2x96xf32> -> vector<2x96xf32>
    %50 = vector.extract_strided_slice %48 {offsets = [0, 0], sizes = [2, 32], strides = [1, 1]} : vector<2x96xf32> to vector<2x32xf32>
    %51 = vector.extract_strided_slice %49 {offsets = [0, 0], sizes = [2, 32], strides = [1, 1]} : vector<2x96xf32> to vector<2x32xf32>
    %52 = arith.addf %50, %51 : vector<2x32xf32>
    %53 = arith.negf %52 : vector<2x32xf32>
    %54 = math.exp %53 : vector<2x32xf32>
    %cst_55 = arith.constant 1.000000e+00 : f32
    %55 = vector.broadcast %cst_55 : f32 to vector<2x32xf32>
    %56 = arith.addf %55, %54 : vector<2x32xf32>
    %57 = arith.divf %55, %56 : vector<2x32xf32>
    %58 = vector.extract_strided_slice %48 {offsets = [0, 32], sizes = [2, 32], strides = [1, 1]} : vector<2x96xf32> to vector<2x32xf32>
    %59 = vector.extract_strided_slice %49 {offsets = [0, 32], sizes = [2, 32], strides = [1, 1]} : vector<2x96xf32> to vector<2x32xf32>
    %60 = arith.addf %58, %59 : vector<2x32xf32>
    %61 = arith.negf %60 : vector<2x32xf32>
    %62 = math.exp %61 : vector<2x32xf32>
    %cst_56 = arith.constant 1.000000e+00 : f32
    %63 = vector.broadcast %cst_56 : f32 to vector<2x32xf32>
    %64 = arith.addf %63, %62 : vector<2x32xf32>
    %65 = arith.divf %63, %64 : vector<2x32xf32>
    %66 = vector.extract_strided_slice %48 {offsets = [0, 64], sizes = [2, 32], strides = [1, 1]} : vector<2x96xf32> to vector<2x32xf32>
    %67 = vector.extract_strided_slice %49 {offsets = [0, 64], sizes = [2, 32], strides = [1, 1]} : vector<2x96xf32> to vector<2x32xf32>
    %68 = vector.broadcast %38 : vector<1x32xf32> to vector<2x32xf32>
    %69 = arith.addf %67, %68 : vector<2x32xf32>
    %70 = arith.mulf %57, %69 : vector<2x32xf32>
    %71 = arith.addf %66, %70 : vector<2x32xf32>
    %72 = math.tanh %71 : vector<2x32xf32>
    %cst_57 = arith.constant 1.000000e+00 : f32
    %73 = vector.broadcast %cst_57 : f32 to vector<2x32xf32>
    %74 = arith.subf %73, %65 : vector<2x32xf32>
    %75 = arith.mulf %74, %72 : vector<2x32xf32>
    %76 = arith.mulf %65, %40 : vector<2x32xf32>
    %77 = arith.addf %75, %76 : vector<2x32xf32>
    %c0_58 = arith.constant 0 : index
    %c0_59 = arith.constant 0 : index
    %c0_60 = arith.constant 0 : index
    %78 = vector.load %arg9[%c0_58, %c0_59, %c0_60] : memref<8x2x32xf32, #tpu.memory_space<vmem>>, vector<1x2x32xf32>
    %79 = vector.shape_cast %78 : vector<1x2x32xf32> to vector<2x32xf32>
    %80 = vector.shape_cast %77 : vector<2x32xf32> to vector<1x2x32xf32>
    tpu.vector_store %arg9[%c0_58, %c0_59, %c0_60], %80 {strides = array<i32>} : memref<8x2x32xf32, #tpu.memory_space<vmem>>, vector<1x2x32xf32>,
    %81 = vector.extract_strided_slice %34 {offsets = [7, 0, 0], sizes = [1, 2, 96], strides = [1, 1, 1]} : vector<8x2x96xf32> to vector<1x2x96xf32>
    %82 = vector.shape_cast %81 : vector<1x2x96xf32> to vector<2x96xf32>
    %cst_61 = arith.constant dense<0.000000e+00> : vector<2x96xf32>
    %83 = tpu.matmul %46, %42, %cst_61 {dimension_numbers = #tpu.dot_dimension_numbers<[1], [0], [0], [1], [0, 0, 1, 1], [], []>} : vector<2x32xf32>, vector<32x96xf32>, vector<2x96xf32> -> vector<2x96xf32>
    %84 = vector.extract_strided_slice %82 {offsets = [0, 0], sizes = [2, 32], strides = [1, 1]} : vector<2x96xf32> to vector<2x32xf32>
    %85 = vector.extract_strided_slice %83 {offsets = [0, 0], sizes = [2, 32], strides = [1, 1]} : vector<2x96xf32> to vector<2x32xf32>
    %86 = arith.addf %84, %85 : vector<2x32xf32>
    %87 = arith.negf %86 : vector<2x32xf32>
    %88 = math.exp %87 : vector<2x32xf32>
    %cst_62 = arith.constant 1.000000e+00 : f32
    %89 = vector.broadcast %cst_62 : f32 to vector<2x32xf32>
    %90 = arith.addf %89, %88 : vector<2x32xf32>
    %91 = arith.divf %89, %90 : vector<2x32xf32>
    %92 = vector.extract_strided_slice %82 {offsets = [0, 32], sizes = [2, 32], strides = [1, 1]} : vector<2x96xf32> to vector<2x32xf32>
    %93 = vector.extract_strided_slice %83 {offsets = [0, 32], sizes = [2, 32], strides = [1, 1]} : vector<2x96xf32> to vector<2x32xf32>
    %94 = arith.addf %92, %93 : vector<2x32xf32>
    %95 = arith.negf %94 : vector<2x32xf32>
    %96 = math.exp %95 : vector<2x32xf32>
    %cst_63 = arith.constant 1.000000e+00 : f32
    %97 = vector.broadcast %cst_63 : f32 to vector<2x32xf32>
    %98 = arith.addf %97, %96 : vector<2x32xf32>
    %99 = arith.divf %97, %98 : vector<2x32xf32>
    %100 = vector.extract_strided_slice %82 {offsets = [0, 64], sizes = [2, 32], strides = [1, 1]} : vector<2x96xf32> to vector<2x32xf32>
    %101 = vector.extract_strided_slice %83 {offsets = [0, 64], sizes = [2, 32], strides = [1, 1]} : vector<2x96xf32> to vector<2x32xf32>
    %102 = vector.broadcast %44 : vector<1x32xf32> to vector<2x32xf32>
    %103 = arith.addf %101, %102 : vector<2x32xf32>
    %104 = arith.mulf %91, %103 : vector<2x32xf32>
    %105 = arith.addf %100, %104 : vector<2x32xf32>
    %106 = math.tanh %105 : vector<2x32xf32>
    %cst_64 = arith.constant 1.000000e+00 : f32
    %107 = vector.broadcast %cst_64 : f32 to vector<2x32xf32>
    %108 = arith.subf %107, %99 : vector<2x32xf32>
    %109 = arith.mulf %108, %106 : vector<2x32xf32>
    %110 = arith.mulf %99, %46 : vector<2x32xf32>
    %111 = arith.addf %109, %110 : vector<2x32xf32>
    %c7 = arith.constant 7 : index
    %c0_65 = arith.constant 0 : index
    %c0_66 = arith.constant 0 : index
    %112 = vector.load %arg10[%c7, %c0_65, %c0_66] : memref<8x2x32xf32, #tpu.memory_space<vmem>>, vector<1x2x32xf32>
    %113 = vector.shape_cast %112 : vector<1x2x32xf32> to vector<2x32xf32>
    %114 = vector.shape_cast %111 : vector<2x32xf32> to vector<1x2x32xf32>
    tpu.vector_store %arg10[%c7, %c0_65, %c0_66], %114 {strides = array<i32>} : memref<8x2x32xf32, #tpu.memory_space<vmem>>, vector<1x2x32xf32>,
    %115 = vector.extract_strided_slice %18 {offsets = [1, 0, 0], sizes = [1, 2, 96], strides = [1, 1, 1]} : vector<8x2x96xf32> to vector<1x2x96xf32>
    %116 = vector.shape_cast %115 : vector<1x2x96xf32> to vector<2x96xf32>
    %cst_67 = arith.constant dense<0.000000e+00> : vector<2x96xf32>
    %117 = tpu.matmul %77, %36, %cst_67 {dimension_numbers = #tpu.dot_dimension_numbers<[1], [0], [0], [1], [0, 0, 1, 1], [], []>} : vector<2x32xf32>, vector<32x96xf32>, vector<2x96xf32> -> vector<2x96xf32>
    %118 = vector.extract_strided_slice %116 {offsets = [0, 0], sizes = [2, 32], strides = [1, 1]} : vector<2x96xf32> to vector<2x32xf32>
    %119 = vector.extract_strided_slice %117 {offsets = [0, 0], sizes = [2, 32], strides = [1, 1]} : vector<2x96xf32> to vector<2x32xf32>
    %120 = arith.addf %118, %119 : vector<2x32xf32>
    %121 = arith.negf %120 : vector<2x32xf32>
    %122 = math.exp %121 : vector<2x32xf32>
    %cst_68 = arith.constant 1.000000e+00 : f32
    %123 = vector.broadcast %cst_68 : f32 to vector<2x32xf32>
    %124 = arith.addf %123, %122 : vector<2x32xf32>
    %125 = arith.divf %123, %124 : vector<2x32xf32>
    %126 = vector.extract_strided_slice %116 {offsets = [0, 32], sizes = [2, 32], strides = [1, 1]} : vector<2x96xf32> to vector<2x32xf32>
    %127 = vector.extract_strided_slice %117 {offsets = [0, 32], sizes = [2, 32], strides = [1, 1]} : vector<2x96xf32> to vector<2x32xf32>
    %128 = arith.addf %126, %127 : vector<2x32xf32>
    %129 = arith.negf %128 : vector<2x32xf32>
    %130 = math.exp %129 : vector<2x32xf32>
    %cst_69 = arith.constant 1.000000e+00 : f32
    %131 = vector.broadcast %cst_69 : f32 to vector<2x32xf32>
    %132 = arith.addf %131, %130 : vector<2x32xf32>
    %133 = arith.divf %131, %132 : vector<2x32xf32>
    %134 = vector.extract_strided_slice %116 {offsets = [0, 64], sizes = [2, 32], strides = [1, 1]} : vector<2x96xf32> to vector<2x32xf32>
    %135 = vector.extract_strided_slice %117 {offsets = [0, 64], sizes = [2, 32], strides = [1, 1]} : vector<2x96xf32> to vector<2x32xf32>
    %136 = vector.broadcast %38 : vector<1x32xf32> to vector<2x32xf32>
    %137 = arith.addf %135, %136 : vector<2x32xf32>
    %138 = arith.mulf %125, %137 : vector<2x32xf32>
    %139 = arith.addf %134, %138 : vector<2x32xf32>
    %140 = math.tanh %139 : vector<2x32xf32>
    %cst_70 = arith.constant 1.000000e+00 : f32
    %141 = vector.broadcast %cst_70 : f32 to vector<2x32xf32>
    %142 = arith.subf %141, %133 : vector<2x32xf32>
    %143 = arith.mulf %142, %140 : vector<2x32xf32>
    %144 = arith.mulf %133, %77 : vector<2x32xf32>
    %145 = arith.addf %143, %144 : vector<2x32xf32>
    %c1_71 = arith.constant 1 : index
    %c0_72 = arith.constant 0 : index
    %c0_73 = arith.constant 0 : index
    %146 = vector.load %arg9[%c1_71, %c0_72, %c0_73] : memref<8x2x32xf32, #tpu.memory_space<vmem>>, vector<1x2x32xf32>
    %147 = vector.shape_cast %146 : vector<1x2x32xf32> to vector<2x32xf32>
    %148 = vector.shape_cast %145 : vector<2x32xf32> to vector<1x2x32xf32>
    tpu.vector_store %arg9[%c1_71, %c0_72, %c0_73], %148 {strides = array<i32>} : memref<8x2x32xf32, #tpu.memory_space<vmem>>, vector<1x2x32xf32>,
    %149 = vector.extract_strided_slice %34 {offsets = [6, 0, 0], sizes = [1, 2, 96], strides = [1, 1, 1]} : vector<8x2x96xf32> to vector<1x2x96xf32>
    %150 = vector.shape_cast %149 : vector<1x2x96xf32> to vector<2x96xf32>
    %cst_74 = arith.constant dense<0.000000e+00> : vector<2x96xf32>
    %151 = tpu.matmul %111, %42, %cst_74 {dimension_numbers = #tpu.dot_dimension_numbers<[1], [0], [0], [1], [0, 0, 1, 1], [], []>} : vector<2x32xf32>, vector<32x96xf32>, vector<2x96xf32> -> vector<2x96xf32>
    %152 = vector.extract_strided_slice %150 {offsets = [0, 0], sizes = [2, 32], strides = [1, 1]} : vector<2x96xf32> to vector<2x32xf32>
    %153 = vector.extract_strided_slice %151 {offsets = [0, 0], sizes = [2, 32], strides = [1, 1]} : vector<2x96xf32> to vector<2x32xf32>
    %154 = arith.addf %152, %153 : vector<2x32xf32>
    %155 = arith.negf %154 : vector<2x32xf32>
    %156 = math.exp %155 : vector<2x32xf32>
    %cst_75 = arith.constant 1.000000e+00 : f32
    %157 = vector.broadcast %cst_75 : f32 to vector<2x32xf32>
    %158 = arith.addf %157, %156 : vector<2x32xf32>
    %159 = arith.divf %157, %158 : vector<2x32xf32>
    %160 = vector.extract_strided_slice %150 {offsets = [0, 32], sizes = [2, 32], strides = [1, 1]} : vector<2x96xf32> to vector<2x32xf32>
    %161 = vector.extract_strided_slice %151 {offsets = [0, 32], sizes = [2, 32], strides = [1, 1]} : vector<2x96xf32> to vector<2x32xf32>
    %162 = arith.addf %160, %161 : vector<2x32xf32>
    %163 = arith.negf %162 : vector<2x32xf32>
    %164 = math.exp %163 : vector<2x32xf32>
    %cst_76 = arith.constant 1.000000e+00 : f32
    %165 = vector.broadcast %cst_76 : f32 to vector<2x32xf32>
    %166 = arith.addf %165, %164 : vector<2x32xf32>
    %167 = arith.divf %165, %166 : vector<2x32xf32>
    %168 = vector.extract_strided_slice %150 {offsets = [0, 64], sizes = [2, 32], strides = [1, 1]} : vector<2x96xf32> to vector<2x32xf32>
    %169 = vector.extract_strided_slice %151 {offsets = [0, 64], sizes = [2, 32], strides = [1, 1]} : vector<2x96xf32> to vector<2x32xf32>
    %170 = vector.broadcast %44 : vector<1x32xf32> to vector<2x32xf32>
    %171 = arith.addf %169, %170 : vector<2x32xf32>
    %172 = arith.mulf %159, %171 : vector<2x32xf32>
    %173 = arith.addf %168, %172 : vector<2x32xf32>
    %174 = math.tanh %173 : vector<2x32xf32>
    %cst_77 = arith.constant 1.000000e+00 : f32
    %175 = vector.broadcast %cst_77 : f32 to vector<2x32xf32>
    %176 = arith.subf %175, %167 : vector<2x32xf32>
    %177 = arith.mulf %176, %174 : vector<2x32xf32>
    %178 = arith.mulf %167, %111 : vector<2x32xf32>
    %179 = arith.addf %177, %178 : vector<2x32xf32>
    %c6 = arith.constant 6 : index
    %c0_78 = arith.constant 0 : index
    %c0_79 = arith.constant 0 : index
    %180 = vector.load %arg10[%c6, %c0_78, %c0_79] : memref<8x2x32xf32, #tpu.memory_space<vmem>>, vector<1x2x32xf32>
    %181 = vector.shape_cast %180 : vector<1x2x32xf32> to vector<2x32xf32>
    %182 = vector.shape_cast %179 : vector<2x32xf32> to vector<1x2x32xf32>
    tpu.vector_store %arg10[%c6, %c0_78, %c0_79], %182 {strides = array<i32>} : memref<8x2x32xf32, #tpu.memory_space<vmem>>, vector<1x2x32xf32>,
    %183 = vector.extract_strided_slice %18 {offsets = [2, 0, 0], sizes = [1, 2, 96], strides = [1, 1, 1]} : vector<8x2x96xf32> to vector<1x2x96xf32>
    %184 = vector.shape_cast %183 : vector<1x2x96xf32> to vector<2x96xf32>
    %cst_80 = arith.constant dense<0.000000e+00> : vector<2x96xf32>
    %185 = tpu.matmul %145, %36, %cst_80 {dimension_numbers = #tpu.dot_dimension_numbers<[1], [0], [0], [1], [0, 0, 1, 1], [], []>} : vector<2x32xf32>, vector<32x96xf32>, vector<2x96xf32> -> vector<2x96xf32>
    %186 = vector.extract_strided_slice %184 {offsets = [0, 0], sizes = [2, 32], strides = [1, 1]} : vector<2x96xf32> to vector<2x32xf32>
    %187 = vector.extract_strided_slice %185 {offsets = [0, 0], sizes = [2, 32], strides = [1, 1]} : vector<2x96xf32> to vector<2x32xf32>
    %188 = arith.addf %186, %187 : vector<2x32xf32>
    %189 = arith.negf %188 : vector<2x32xf32>
    %190 = math.exp %189 : vector<2x32xf32>
    %cst_81 = arith.constant 1.000000e+00 : f32
    %191 = vector.broadcast %cst_81 : f32 to vector<2x32xf32>
    %192 = arith.addf %191, %190 : vector<2x32xf32>
    %193 = arith.divf %191, %192 : vector<2x32xf32>
    %194 = vector.extract_strided_slice %184 {offsets = [0, 32], sizes = [2, 32], strides = [1, 1]} : vector<2x96xf32> to vector<2x32xf32>
    %195 = vector.extract_strided_slice %185 {offsets = [0, 32], sizes = [2, 32], strides = [1, 1]} : vector<2x96xf32> to vector<2x32xf32>
    %196 = arith.addf %194, %195 : vector<2x32xf32>
    %197 = arith.negf %196 : vector<2x32xf32>
    %198 = math.exp %197 : vector<2x32xf32>
    %cst_82 = arith.constant 1.000000e+00 : f32
    %199 = vector.broadcast %cst_82 : f32 to vector<2x32xf32>
    %200 = arith.addf %199, %198 : vector<2x32xf32>
    %201 = arith.divf %199, %200 : vector<2x32xf32>
    %202 = vector.extract_strided_slice %184 {offsets = [0, 64], sizes = [2, 32], strides = [1, 1]} : vector<2x96xf32> to vector<2x32xf32>
    %203 = vector.extract_strided_slice %185 {offsets = [0, 64], sizes = [2, 32], strides = [1, 1]} : vector<2x96xf32> to vector<2x32xf32>
    %204 = vector.broadcast %38 : vector<1x32xf32> to vector<2x32xf32>
    %205 = arith.addf %203, %204 : vector<2x32xf32>
    %206 = arith.mulf %193, %205 : vector<2x32xf32>
    %207 = arith.addf %202, %206 : vector<2x32xf32>
    %208 = math.tanh %207 : vector<2x32xf32>
    %cst_83 = arith.constant 1.000000e+00 : f32
    %209 = vector.broadcast %cst_83 : f32 to vector<2x32xf32>
    %210 = arith.subf %209, %201 : vector<2x32xf32>
    %211 = arith.mulf %210, %208 : vector<2x32xf32>
    %212 = arith.mulf %201, %145 : vector<2x32xf32>
    %213 = arith.addf %211, %212 : vector<2x32xf32>
    %c2 = arith.constant 2 : index
    %c0_84 = arith.constant 0 : index
    %c0_85 = arith.constant 0 : index
    %214 = vector.load %arg9[%c2, %c0_84, %c0_85] : memref<8x2x32xf32, #tpu.memory_space<vmem>>, vector<1x2x32xf32>
    %215 = vector.shape_cast %214 : vector<1x2x32xf32> to vector<2x32xf32>
    %216 = vector.shape_cast %213 : vector<2x32xf32> to vector<1x2x32xf32>
    tpu.vector_store %arg9[%c2, %c0_84, %c0_85], %216 {strides = array<i32>} : memref<8x2x32xf32, #tpu.memory_space<vmem>>, vector<1x2x32xf32>,
    %217 = vector.extract_strided_slice %34 {offsets = [5, 0, 0], sizes = [1, 2, 96], strides = [1, 1, 1]} : vector<8x2x96xf32> to vector<1x2x96xf32>
    %218 = vector.shape_cast %217 : vector<1x2x96xf32> to vector<2x96xf32>
    %cst_86 = arith.constant dense<0.000000e+00> : vector<2x96xf32>
    %219 = tpu.matmul %179, %42, %cst_86 {dimension_numbers = #tpu.dot_dimension_numbers<[1], [0], [0], [1], [0, 0, 1, 1], [], []>} : vector<2x32xf32>, vector<32x96xf32>, vector<2x96xf32> -> vector<2x96xf32>
    %220 = vector.extract_strided_slice %218 {offsets = [0, 0], sizes = [2, 32], strides = [1, 1]} : vector<2x96xf32> to vector<2x32xf32>
    %221 = vector.extract_strided_slice %219 {offsets = [0, 0], sizes = [2, 32], strides = [1, 1]} : vector<2x96xf32> to vector<2x32xf32>
    %222 = arith.addf %220, %221 : vector<2x32xf32>
    %223 = arith.negf %222 : vector<2x32xf32>
    %224 = math.exp %223 : vector<2x32xf32>
    %cst_87 = arith.constant 1.000000e+00 : f32
    %225 = vector.broadcast %cst_87 : f32 to vector<2x32xf32>
    %226 = arith.addf %225, %224 : vector<2x32xf32>
    %227 = arith.divf %225, %226 : vector<2x32xf32>
    %228 = vector.extract_strided_slice %218 {offsets = [0, 32], sizes = [2, 32], strides = [1, 1]} : vector<2x96xf32> to vector<2x32xf32>
    %229 = vector.extract_strided_slice %219 {offsets = [0, 32], sizes = [2, 32], strides = [1, 1]} : vector<2x96xf32> to vector<2x32xf32>
    %230 = arith.addf %228, %229 : vector<2x32xf32>
    %231 = arith.negf %230 : vector<2x32xf32>
    %232 = math.exp %231 : vector<2x32xf32>
    %cst_88 = arith.constant 1.000000e+00 : f32
    %233 = vector.broadcast %cst_88 : f32 to vector<2x32xf32>
    %234 = arith.addf %233, %232 : vector<2x32xf32>
    %235 = arith.divf %233, %234 : vector<2x32xf32>
    %236 = vector.extract_strided_slice %218 {offsets = [0, 64], sizes = [2, 32], strides = [1, 1]} : vector<2x96xf32> to vector<2x32xf32>
    %237 = vector.extract_strided_slice %219 {offsets = [0, 64], sizes = [2, 32], strides = [1, 1]} : vector<2x96xf32> to vector<2x32xf32>
    %238 = vector.broadcast %44 : vector<1x32xf32> to vector<2x32xf32>
    %239 = arith.addf %237, %238 : vector<2x32xf32>
    %240 = arith.mulf %227, %239 : vector<2x32xf32>
    %241 = arith.addf %236, %240 : vector<2x32xf32>
    %242 = math.tanh %241 : vector<2x32xf32>
    %cst_89 = arith.constant 1.000000e+00 : f32
    %243 = vector.broadcast %cst_89 : f32 to vector<2x32xf32>
    %244 = arith.subf %243, %235 : vector<2x32xf32>
    %245 = arith.mulf %244, %242 : vector<2x32xf32>
    %246 = arith.mulf %235, %179 : vector<2x32xf32>
    %247 = arith.addf %245, %246 : vector<2x32xf32>
    %c5 = arith.constant 5 : index
    %c0_90 = arith.constant 0 : index
    %c0_91 = arith.constant 0 : index
    %248 = vector.load %arg10[%c5, %c0_90, %c0_91] : memref<8x2x32xf32, #tpu.memory_space<vmem>>, vector<1x2x32xf32>
    %249 = vector.shape_cast %248 : vector<1x2x32xf32> to vector<2x32xf32>
    %250 = vector.shape_cast %247 : vector<2x32xf32> to vector<1x2x32xf32>
    tpu.vector_store %arg10[%c5, %c0_90, %c0_91], %250 {strides = array<i32>} : memref<8x2x32xf32, #tpu.memory_space<vmem>>, vector<1x2x32xf32>,
    %251 = vector.extract_strided_slice %18 {offsets = [3, 0, 0], sizes = [1, 2, 96], strides = [1, 1, 1]} : vector<8x2x96xf32> to vector<1x2x96xf32>
    %252 = vector.shape_cast %251 : vector<1x2x96xf32> to vector<2x96xf32>
    %cst_92 = arith.constant dense<0.000000e+00> : vector<2x96xf32>
    %253 = tpu.matmul %213, %36, %cst_92 {dimension_numbers = #tpu.dot_dimension_numbers<[1], [0], [0], [1], [0, 0, 1, 1], [], []>} : vector<2x32xf32>, vector<32x96xf32>, vector<2x96xf32> -> vector<2x96xf32>
    %254 = vector.extract_strided_slice %252 {offsets = [0, 0], sizes = [2, 32], strides = [1, 1]} : vector<2x96xf32> to vector<2x32xf32>
    %255 = vector.extract_strided_slice %253 {offsets = [0, 0], sizes = [2, 32], strides = [1, 1]} : vector<2x96xf32> to vector<2x32xf32>
    %256 = arith.addf %254, %255 : vector<2x32xf32>
    %257 = arith.negf %256 : vector<2x32xf32>
    %258 = math.exp %257 : vector<2x32xf32>
    %cst_93 = arith.constant 1.000000e+00 : f32
    %259 = vector.broadcast %cst_93 : f32 to vector<2x32xf32>
    %260 = arith.addf %259, %258 : vector<2x32xf32>
    %261 = arith.divf %259, %260 : vector<2x32xf32>
    %262 = vector.extract_strided_slice %252 {offsets = [0, 32], sizes = [2, 32], strides = [1, 1]} : vector<2x96xf32> to vector<2x32xf32>
    %263 = vector.extract_strided_slice %253 {offsets = [0, 32], sizes = [2, 32], strides = [1, 1]} : vector<2x96xf32> to vector<2x32xf32>
    %264 = arith.addf %262, %263 : vector<2x32xf32>
    %265 = arith.negf %264 : vector<2x32xf32>
    %266 = math.exp %265 : vector<2x32xf32>
    %cst_94 = arith.constant 1.000000e+00 : f32
    %267 = vector.broadcast %cst_94 : f32 to vector<2x32xf32>
    %268 = arith.addf %267, %266 : vector<2x32xf32>
    %269 = arith.divf %267, %268 : vector<2x32xf32>
    %270 = vector.extract_strided_slice %252 {offsets = [0, 64], sizes = [2, 32], strides = [1, 1]} : vector<2x96xf32> to vector<2x32xf32>
    %271 = vector.extract_strided_slice %253 {offsets = [0, 64], sizes = [2, 32], strides = [1, 1]} : vector<2x96xf32> to vector<2x32xf32>
    %272 = vector.broadcast %38 : vector<1x32xf32> to vector<2x32xf32>
    %273 = arith.addf %271, %272 : vector<2x32xf32>
    %274 = arith.mulf %261, %273 : vector<2x32xf32>
    %275 = arith.addf %270, %274 : vector<2x32xf32>
    %276 = math.tanh %275 : vector<2x32xf32>
    %cst_95 = arith.constant 1.000000e+00 : f32
    %277 = vector.broadcast %cst_95 : f32 to vector<2x32xf32>
    %278 = arith.subf %277, %269 : vector<2x32xf32>
    %279 = arith.mulf %278, %276 : vector<2x32xf32>
    %280 = arith.mulf %269, %213 : vector<2x32xf32>
    %281 = arith.addf %279, %280 : vector<2x32xf32>
    %c3 = arith.constant 3 : index
    %c0_96 = arith.constant 0 : index
    %c0_97 = arith.constant 0 : index
    %282 = vector.load %arg9[%c3, %c0_96, %c0_97] : memref<8x2x32xf32, #tpu.memory_space<vmem>>, vector<1x2x32xf32>
    %283 = vector.shape_cast %282 : vector<1x2x32xf32> to vector<2x32xf32>
    %284 = vector.shape_cast %281 : vector<2x32xf32> to vector<1x2x32xf32>
    tpu.vector_store %arg9[%c3, %c0_96, %c0_97], %284 {strides = array<i32>} : memref<8x2x32xf32, #tpu.memory_space<vmem>>, vector<1x2x32xf32>,
    %285 = vector.extract_strided_slice %34 {offsets = [4, 0, 0], sizes = [1, 2, 96], strides = [1, 1, 1]} : vector<8x2x96xf32> to vector<1x2x96xf32>
    %286 = vector.shape_cast %285 : vector<1x2x96xf32> to vector<2x96xf32>
    %cst_98 = arith.constant dense<0.000000e+00> : vector<2x96xf32>
    %287 = tpu.matmul %247, %42, %cst_98 {dimension_numbers = #tpu.dot_dimension_numbers<[1], [0], [0], [1], [0, 0, 1, 1], [], []>} : vector<2x32xf32>, vector<32x96xf32>, vector<2x96xf32> -> vector<2x96xf32>
    %288 = vector.extract_strided_slice %286 {offsets = [0, 0], sizes = [2, 32], strides = [1, 1]} : vector<2x96xf32> to vector<2x32xf32>
    %289 = vector.extract_strided_slice %287 {offsets = [0, 0], sizes = [2, 32], strides = [1, 1]} : vector<2x96xf32> to vector<2x32xf32>
    %290 = arith.addf %288, %289 : vector<2x32xf32>
    %291 = arith.negf %290 : vector<2x32xf32>
    %292 = math.exp %291 : vector<2x32xf32>
    %cst_99 = arith.constant 1.000000e+00 : f32
    %293 = vector.broadcast %cst_99 : f32 to vector<2x32xf32>
    %294 = arith.addf %293, %292 : vector<2x32xf32>
    %295 = arith.divf %293, %294 : vector<2x32xf32>
    %296 = vector.extract_strided_slice %286 {offsets = [0, 32], sizes = [2, 32], strides = [1, 1]} : vector<2x96xf32> to vector<2x32xf32>
    %297 = vector.extract_strided_slice %287 {offsets = [0, 32], sizes = [2, 32], strides = [1, 1]} : vector<2x96xf32> to vector<2x32xf32>
    %298 = arith.addf %296, %297 : vector<2x32xf32>
    %299 = arith.negf %298 : vector<2x32xf32>
    %300 = math.exp %299 : vector<2x32xf32>
    %cst_100 = arith.constant 1.000000e+00 : f32
    %301 = vector.broadcast %cst_100 : f32 to vector<2x32xf32>
    %302 = arith.addf %301, %300 : vector<2x32xf32>
    %303 = arith.divf %301, %302 : vector<2x32xf32>
    %304 = vector.extract_strided_slice %286 {offsets = [0, 64], sizes = [2, 32], strides = [1, 1]} : vector<2x96xf32> to vector<2x32xf32>
    %305 = vector.extract_strided_slice %287 {offsets = [0, 64], sizes = [2, 32], strides = [1, 1]} : vector<2x96xf32> to vector<2x32xf32>
    %306 = vector.broadcast %44 : vector<1x32xf32> to vector<2x32xf32>
    %307 = arith.addf %305, %306 : vector<2x32xf32>
    %308 = arith.mulf %295, %307 : vector<2x32xf32>
    %309 = arith.addf %304, %308 : vector<2x32xf32>
    %310 = math.tanh %309 : vector<2x32xf32>
    %cst_101 = arith.constant 1.000000e+00 : f32
    %311 = vector.broadcast %cst_101 : f32 to vector<2x32xf32>
    %312 = arith.subf %311, %303 : vector<2x32xf32>
    %313 = arith.mulf %312, %310 : vector<2x32xf32>
    %314 = arith.mulf %303, %247 : vector<2x32xf32>
    %315 = arith.addf %313, %314 : vector<2x32xf32>
    %c4 = arith.constant 4 : index
    %c0_102 = arith.constant 0 : index
    %c0_103 = arith.constant 0 : index
    %316 = vector.load %arg10[%c4, %c0_102, %c0_103] : memref<8x2x32xf32, #tpu.memory_space<vmem>>, vector<1x2x32xf32>
    %317 = vector.shape_cast %316 : vector<1x2x32xf32> to vector<2x32xf32>
    %318 = vector.shape_cast %315 : vector<2x32xf32> to vector<1x2x32xf32>
    tpu.vector_store %arg10[%c4, %c0_102, %c0_103], %318 {strides = array<i32>} : memref<8x2x32xf32, #tpu.memory_space<vmem>>, vector<1x2x32xf32>,
    %319 = vector.extract_strided_slice %18 {offsets = [4, 0, 0], sizes = [1, 2, 96], strides = [1, 1, 1]} : vector<8x2x96xf32> to vector<1x2x96xf32>
    %320 = vector.shape_cast %319 : vector<1x2x96xf32> to vector<2x96xf32>
    %cst_104 = arith.constant dense<0.000000e+00> : vector<2x96xf32>
    %321 = tpu.matmul %281, %36, %cst_104 {dimension_numbers = #tpu.dot_dimension_numbers<[1], [0], [0], [1], [0, 0, 1, 1], [], []>} : vector<2x32xf32>, vector<32x96xf32>, vector<2x96xf32> -> vector<2x96xf32>
    %322 = vector.extract_strided_slice %320 {offsets = [0, 0], sizes = [2, 32], strides = [1, 1]} : vector<2x96xf32> to vector<2x32xf32>
    %323 = vector.extract_strided_slice %321 {offsets = [0, 0], sizes = [2, 32], strides = [1, 1]} : vector<2x96xf32> to vector<2x32xf32>
    %324 = arith.addf %322, %323 : vector<2x32xf32>
    %325 = arith.negf %324 : vector<2x32xf32>
    %326 = math.exp %325 : vector<2x32xf32>
    %cst_105 = arith.constant 1.000000e+00 : f32
    %327 = vector.broadcast %cst_105 : f32 to vector<2x32xf32>
    %328 = arith.addf %327, %326 : vector<2x32xf32>
    %329 = arith.divf %327, %328 : vector<2x32xf32>
    %330 = vector.extract_strided_slice %320 {offsets = [0, 32], sizes = [2, 32], strides = [1, 1]} : vector<2x96xf32> to vector<2x32xf32>
    %331 = vector.extract_strided_slice %321 {offsets = [0, 32], sizes = [2, 32], strides = [1, 1]} : vector<2x96xf32> to vector<2x32xf32>
    %332 = arith.addf %330, %331 : vector<2x32xf32>
    %333 = arith.negf %332 : vector<2x32xf32>
    %334 = math.exp %333 : vector<2x32xf32>
    %cst_106 = arith.constant 1.000000e+00 : f32
    %335 = vector.broadcast %cst_106 : f32 to vector<2x32xf32>
    %336 = arith.addf %335, %334 : vector<2x32xf32>
    %337 = arith.divf %335, %336 : vector<2x32xf32>
    %338 = vector.extract_strided_slice %320 {offsets = [0, 64], sizes = [2, 32], strides = [1, 1]} : vector<2x96xf32> to vector<2x32xf32>
    %339 = vector.extract_strided_slice %321 {offsets = [0, 64], sizes = [2, 32], strides = [1, 1]} : vector<2x96xf32> to vector<2x32xf32>
    %340 = vector.broadcast %38 : vector<1x32xf32> to vector<2x32xf32>
    %341 = arith.addf %339, %340 : vector<2x32xf32>
    %342 = arith.mulf %329, %341 : vector<2x32xf32>
    %343 = arith.addf %338, %342 : vector<2x32xf32>
    %344 = math.tanh %343 : vector<2x32xf32>
    %cst_107 = arith.constant 1.000000e+00 : f32
    %345 = vector.broadcast %cst_107 : f32 to vector<2x32xf32>
    %346 = arith.subf %345, %337 : vector<2x32xf32>
    %347 = arith.mulf %346, %344 : vector<2x32xf32>
    %348 = arith.mulf %337, %281 : vector<2x32xf32>
    %349 = arith.addf %347, %348 : vector<2x32xf32>
    %c4_108 = arith.constant 4 : index
    %c0_109 = arith.constant 0 : index
    %c0_110 = arith.constant 0 : index
    %350 = vector.load %arg9[%c4_108, %c0_109, %c0_110] : memref<8x2x32xf32, #tpu.memory_space<vmem>>, vector<1x2x32xf32>
    %351 = vector.shape_cast %350 : vector<1x2x32xf32> to vector<2x32xf32>
    %352 = vector.shape_cast %349 : vector<2x32xf32> to vector<1x2x32xf32>
    tpu.vector_store %arg9[%c4_108, %c0_109, %c0_110], %352 {strides = array<i32>} : memref<8x2x32xf32, #tpu.memory_space<vmem>>, vector<1x2x32xf32>,
    %353 = vector.extract_strided_slice %34 {offsets = [3, 0, 0], sizes = [1, 2, 96], strides = [1, 1, 1]} : vector<8x2x96xf32> to vector<1x2x96xf32>
    %354 = vector.shape_cast %353 : vector<1x2x96xf32> to vector<2x96xf32>
    %cst_111 = arith.constant dense<0.000000e+00> : vector<2x96xf32>
    %355 = tpu.matmul %315, %42, %cst_111 {dimension_numbers = #tpu.dot_dimension_numbers<[1], [0], [0], [1], [0, 0, 1, 1], [], []>} : vector<2x32xf32>, vector<32x96xf32>, vector<2x96xf32> -> vector<2x96xf32>
    %356 = vector.extract_strided_slice %354 {offsets = [0, 0], sizes = [2, 32], strides = [1, 1]} : vector<2x96xf32> to vector<2x32xf32>
    %357 = vector.extract_strided_slice %355 {offsets = [0, 0], sizes = [2, 32], strides = [1, 1]} : vector<2x96xf32> to vector<2x32xf32>
    %358 = arith.addf %356, %357 : vector<2x32xf32>
    %359 = arith.negf %358 : vector<2x32xf32>
    %360 = math.exp %359 : vector<2x32xf32>
    %cst_112 = arith.constant 1.000000e+00 : f32
    %361 = vector.broadcast %cst_112 : f32 to vector<2x32xf32>
    %362 = arith.addf %361, %360 : vector<2x32xf32>
    %363 = arith.divf %361, %362 : vector<2x32xf32>
    %364 = vector.extract_strided_slice %354 {offsets = [0, 32], sizes = [2, 32], strides = [1, 1]} : vector<2x96xf32> to vector<2x32xf32>
    %365 = vector.extract_strided_slice %355 {offsets = [0, 32], sizes = [2, 32], strides = [1, 1]} : vector<2x96xf32> to vector<2x32xf32>
    %366 = arith.addf %364, %365 : vector<2x32xf32>
    %367 = arith.negf %366 : vector<2x32xf32>
    %368 = math.exp %367 : vector<2x32xf32>
    %cst_113 = arith.constant 1.000000e+00 : f32
    %369 = vector.broadcast %cst_113 : f32 to vector<2x32xf32>
    %370 = arith.addf %369, %368 : vector<2x32xf32>
    %371 = arith.divf %369, %370 : vector<2x32xf32>
    %372 = vector.extract_strided_slice %354 {offsets = [0, 64], sizes = [2, 32], strides = [1, 1]} : vector<2x96xf32> to vector<2x32xf32>
    %373 = vector.extract_strided_slice %355 {offsets = [0, 64], sizes = [2, 32], strides = [1, 1]} : vector<2x96xf32> to vector<2x32xf32>
    %374 = vector.broadcast %44 : vector<1x32xf32> to vector<2x32xf32>
    %375 = arith.addf %373, %374 : vector<2x32xf32>
    %376 = arith.mulf %363, %375 : vector<2x32xf32>
    %377 = arith.addf %372, %376 : vector<2x32xf32>
    %378 = math.tanh %377 : vector<2x32xf32>
    %cst_114 = arith.constant 1.000000e+00 : f32
    %379 = vector.broadcast %cst_114 : f32 to vector<2x32xf32>
    %380 = arith.subf %379, %371 : vector<2x32xf32>
    %381 = arith.mulf %380, %378 : vector<2x32xf32>
    %382 = arith.mulf %371, %315 : vector<2x32xf32>
    %383 = arith.addf %381, %382 : vector<2x32xf32>
    %c3_115 = arith.constant 3 : index
    %c0_116 = arith.constant 0 : index
    %c0_117 = arith.constant 0 : index
    %384 = vector.load %arg10[%c3_115, %c0_116, %c0_117] : memref<8x2x32xf32, #tpu.memory_space<vmem>>, vector<1x2x32xf32>
    %385 = vector.shape_cast %384 : vector<1x2x32xf32> to vector<2x32xf32>
    %386 = vector.shape_cast %383 : vector<2x32xf32> to vector<1x2x32xf32>
    tpu.vector_store %arg10[%c3_115, %c0_116, %c0_117], %386 {strides = array<i32>} : memref<8x2x32xf32, #tpu.memory_space<vmem>>, vector<1x2x32xf32>,
    %387 = vector.extract_strided_slice %18 {offsets = [5, 0, 0], sizes = [1, 2, 96], strides = [1, 1, 1]} : vector<8x2x96xf32> to vector<1x2x96xf32>
    %388 = vector.shape_cast %387 : vector<1x2x96xf32> to vector<2x96xf32>
    %cst_118 = arith.constant dense<0.000000e+00> : vector<2x96xf32>
    %389 = tpu.matmul %349, %36, %cst_118 {dimension_numbers = #tpu.dot_dimension_numbers<[1], [0], [0], [1], [0, 0, 1, 1], [], []>} : vector<2x32xf32>, vector<32x96xf32>, vector<2x96xf32> -> vector<2x96xf32>
    %390 = vector.extract_strided_slice %388 {offsets = [0, 0], sizes = [2, 32], strides = [1, 1]} : vector<2x96xf32> to vector<2x32xf32>
    %391 = vector.extract_strided_slice %389 {offsets = [0, 0], sizes = [2, 32], strides = [1, 1]} : vector<2x96xf32> to vector<2x32xf32>
    %392 = arith.addf %390, %391 : vector<2x32xf32>
    %393 = arith.negf %392 : vector<2x32xf32>
    %394 = math.exp %393 : vector<2x32xf32>
    %cst_119 = arith.constant 1.000000e+00 : f32
    %395 = vector.broadcast %cst_119 : f32 to vector<2x32xf32>
    %396 = arith.addf %395, %394 : vector<2x32xf32>
    %397 = arith.divf %395, %396 : vector<2x32xf32>
    %398 = vector.extract_strided_slice %388 {offsets = [0, 32], sizes = [2, 32], strides = [1, 1]} : vector<2x96xf32> to vector<2x32xf32>
    %399 = vector.extract_strided_slice %389 {offsets = [0, 32], sizes = [2, 32], strides = [1, 1]} : vector<2x96xf32> to vector<2x32xf32>
    %400 = arith.addf %398, %399 : vector<2x32xf32>
    %401 = arith.negf %400 : vector<2x32xf32>
    %402 = math.exp %401 : vector<2x32xf32>
    %cst_120 = arith.constant 1.000000e+00 : f32
    %403 = vector.broadcast %cst_120 : f32 to vector<2x32xf32>
    %404 = arith.addf %403, %402 : vector<2x32xf32>
    %405 = arith.divf %403, %404 : vector<2x32xf32>
    %406 = vector.extract_strided_slice %388 {offsets = [0, 64], sizes = [2, 32], strides = [1, 1]} : vector<2x96xf32> to vector<2x32xf32>
    %407 = vector.extract_strided_slice %389 {offsets = [0, 64], sizes = [2, 32], strides = [1, 1]} : vector<2x96xf32> to vector<2x32xf32>
    %408 = vector.broadcast %38 : vector<1x32xf32> to vector<2x32xf32>
    %409 = arith.addf %407, %408 : vector<2x32xf32>
    %410 = arith.mulf %397, %409 : vector<2x32xf32>
    %411 = arith.addf %406, %410 : vector<2x32xf32>
    %412 = math.tanh %411 : vector<2x32xf32>
    %cst_121 = arith.constant 1.000000e+00 : f32
    %413 = vector.broadcast %cst_121 : f32 to vector<2x32xf32>
    %414 = arith.subf %413, %405 : vector<2x32xf32>
    %415 = arith.mulf %414, %412 : vector<2x32xf32>
    %416 = arith.mulf %405, %349 : vector<2x32xf32>
    %417 = arith.addf %415, %416 : vector<2x32xf32>
    %c5_122 = arith.constant 5 : index
    %c0_123 = arith.constant 0 : index
    %c0_124 = arith.constant 0 : index
    %418 = vector.load %arg9[%c5_122, %c0_123, %c0_124] : memref<8x2x32xf32, #tpu.memory_space<vmem>>, vector<1x2x32xf32>
    %419 = vector.shape_cast %418 : vector<1x2x32xf32> to vector<2x32xf32>
    %420 = vector.shape_cast %417 : vector<2x32xf32> to vector<1x2x32xf32>
    tpu.vector_store %arg9[%c5_122, %c0_123, %c0_124], %420 {strides = array<i32>} : memref<8x2x32xf32, #tpu.memory_space<vmem>>, vector<1x2x32xf32>,
    %421 = vector.extract_strided_slice %34 {offsets = [2, 0, 0], sizes = [1, 2, 96], strides = [1, 1, 1]} : vector<8x2x96xf32> to vector<1x2x96xf32>
    %422 = vector.shape_cast %421 : vector<1x2x96xf32> to vector<2x96xf32>
    %cst_125 = arith.constant dense<0.000000e+00> : vector<2x96xf32>
    %423 = tpu.matmul %383, %42, %cst_125 {dimension_numbers = #tpu.dot_dimension_numbers<[1], [0], [0], [1], [0, 0, 1, 1], [], []>} : vector<2x32xf32>, vector<32x96xf32>, vector<2x96xf32> -> vector<2x96xf32>
    %424 = vector.extract_strided_slice %422 {offsets = [0, 0], sizes = [2, 32], strides = [1, 1]} : vector<2x96xf32> to vector<2x32xf32>
    %425 = vector.extract_strided_slice %423 {offsets = [0, 0], sizes = [2, 32], strides = [1, 1]} : vector<2x96xf32> to vector<2x32xf32>
    %426 = arith.addf %424, %425 : vector<2x32xf32>
    %427 = arith.negf %426 : vector<2x32xf32>
    %428 = math.exp %427 : vector<2x32xf32>
    %cst_126 = arith.constant 1.000000e+00 : f32
    %429 = vector.broadcast %cst_126 : f32 to vector<2x32xf32>
    %430 = arith.addf %429, %428 : vector<2x32xf32>
    %431 = arith.divf %429, %430 : vector<2x32xf32>
    %432 = vector.extract_strided_slice %422 {offsets = [0, 32], sizes = [2, 32], strides = [1, 1]} : vector<2x96xf32> to vector<2x32xf32>
    %433 = vector.extract_strided_slice %423 {offsets = [0, 32], sizes = [2, 32], strides = [1, 1]} : vector<2x96xf32> to vector<2x32xf32>
    %434 = arith.addf %432, %433 : vector<2x32xf32>
    %435 = arith.negf %434 : vector<2x32xf32>
    %436 = math.exp %435 : vector<2x32xf32>
    %cst_127 = arith.constant 1.000000e+00 : f32
    %437 = vector.broadcast %cst_127 : f32 to vector<2x32xf32>
    %438 = arith.addf %437, %436 : vector<2x32xf32>
    %439 = arith.divf %437, %438 : vector<2x32xf32>
    %440 = vector.extract_strided_slice %422 {offsets = [0, 64], sizes = [2, 32], strides = [1, 1]} : vector<2x96xf32> to vector<2x32xf32>
    %441 = vector.extract_strided_slice %423 {offsets = [0, 64], sizes = [2, 32], strides = [1, 1]} : vector<2x96xf32> to vector<2x32xf32>
    %442 = vector.broadcast %44 : vector<1x32xf32> to vector<2x32xf32>
    %443 = arith.addf %441, %442 : vector<2x32xf32>
    %444 = arith.mulf %431, %443 : vector<2x32xf32>
    %445 = arith.addf %440, %444 : vector<2x32xf32>
    %446 = math.tanh %445 : vector<2x32xf32>
    %cst_128 = arith.constant 1.000000e+00 : f32
    %447 = vector.broadcast %cst_128 : f32 to vector<2x32xf32>
    %448 = arith.subf %447, %439 : vector<2x32xf32>
    %449 = arith.mulf %448, %446 : vector<2x32xf32>
    %450 = arith.mulf %439, %383 : vector<2x32xf32>
    %451 = arith.addf %449, %450 : vector<2x32xf32>
    %c2_129 = arith.constant 2 : index
    %c0_130 = arith.constant 0 : index
    %c0_131 = arith.constant 0 : index
    %452 = vector.load %arg10[%c2_129, %c0_130, %c0_131] : memref<8x2x32xf32, #tpu.memory_space<vmem>>, vector<1x2x32xf32>
    %453 = vector.shape_cast %452 : vector<1x2x32xf32> to vector<2x32xf32>
    %454 = vector.shape_cast %451 : vector<2x32xf32> to vector<1x2x32xf32>
    tpu.vector_store %arg10[%c2_129, %c0_130, %c0_131], %454 {strides = array<i32>} : memref<8x2x32xf32, #tpu.memory_space<vmem>>, vector<1x2x32xf32>,
    %455 = vector.extract_strided_slice %18 {offsets = [6, 0, 0], sizes = [1, 2, 96], strides = [1, 1, 1]} : vector<8x2x96xf32> to vector<1x2x96xf32>
    %456 = vector.shape_cast %455 : vector<1x2x96xf32> to vector<2x96xf32>
    %cst_132 = arith.constant dense<0.000000e+00> : vector<2x96xf32>
    %457 = tpu.matmul %417, %36, %cst_132 {dimension_numbers = #tpu.dot_dimension_numbers<[1], [0], [0], [1], [0, 0, 1, 1], [], []>} : vector<2x32xf32>, vector<32x96xf32>, vector<2x96xf32> -> vector<2x96xf32>
    %458 = vector.extract_strided_slice %456 {offsets = [0, 0], sizes = [2, 32], strides = [1, 1]} : vector<2x96xf32> to vector<2x32xf32>
    %459 = vector.extract_strided_slice %457 {offsets = [0, 0], sizes = [2, 32], strides = [1, 1]} : vector<2x96xf32> to vector<2x32xf32>
    %460 = arith.addf %458, %459 : vector<2x32xf32>
    %461 = arith.negf %460 : vector<2x32xf32>
    %462 = math.exp %461 : vector<2x32xf32>
    %cst_133 = arith.constant 1.000000e+00 : f32
    %463 = vector.broadcast %cst_133 : f32 to vector<2x32xf32>
    %464 = arith.addf %463, %462 : vector<2x32xf32>
    %465 = arith.divf %463, %464 : vector<2x32xf32>
    %466 = vector.extract_strided_slice %456 {offsets = [0, 32], sizes = [2, 32], strides = [1, 1]} : vector<2x96xf32> to vector<2x32xf32>
    %467 = vector.extract_strided_slice %457 {offsets = [0, 32], sizes = [2, 32], strides = [1, 1]} : vector<2x96xf32> to vector<2x32xf32>
    %468 = arith.addf %466, %467 : vector<2x32xf32>
    %469 = arith.negf %468 : vector<2x32xf32>
    %470 = math.exp %469 : vector<2x32xf32>
    %cst_134 = arith.constant 1.000000e+00 : f32
    %471 = vector.broadcast %cst_134 : f32 to vector<2x32xf32>
    %472 = arith.addf %471, %470 : vector<2x32xf32>
    %473 = arith.divf %471, %472 : vector<2x32xf32>
    %474 = vector.extract_strided_slice %456 {offsets = [0, 64], sizes = [2, 32], strides = [1, 1]} : vector<2x96xf32> to vector<2x32xf32>
    %475 = vector.extract_strided_slice %457 {offsets = [0, 64], sizes = [2, 32], strides = [1, 1]} : vector<2x96xf32> to vector<2x32xf32>
    %476 = vector.broadcast %38 : vector<1x32xf32> to vector<2x32xf32>
    %477 = arith.addf %475, %476 : vector<2x32xf32>
    %478 = arith.mulf %465, %477 : vector<2x32xf32>
    %479 = arith.addf %474, %478 : vector<2x32xf32>
    %480 = math.tanh %479 : vector<2x32xf32>
    %cst_135 = arith.constant 1.000000e+00 : f32
    %481 = vector.broadcast %cst_135 : f32 to vector<2x32xf32>
    %482 = arith.subf %481, %473 : vector<2x32xf32>
    %483 = arith.mulf %482, %480 : vector<2x32xf32>
    %484 = arith.mulf %473, %417 : vector<2x32xf32>
    %485 = arith.addf %483, %484 : vector<2x32xf32>
    %c6_136 = arith.constant 6 : index
    %c0_137 = arith.constant 0 : index
    %c0_138 = arith.constant 0 : index
    %486 = vector.load %arg9[%c6_136, %c0_137, %c0_138] : memref<8x2x32xf32, #tpu.memory_space<vmem>>, vector<1x2x32xf32>
    %487 = vector.shape_cast %486 : vector<1x2x32xf32> to vector<2x32xf32>
    %488 = vector.shape_cast %485 : vector<2x32xf32> to vector<1x2x32xf32>
    tpu.vector_store %arg9[%c6_136, %c0_137, %c0_138], %488 {strides = array<i32>} : memref<8x2x32xf32, #tpu.memory_space<vmem>>, vector<1x2x32xf32>,
    %489 = vector.extract_strided_slice %34 {offsets = [1, 0, 0], sizes = [1, 2, 96], strides = [1, 1, 1]} : vector<8x2x96xf32> to vector<1x2x96xf32>
    %490 = vector.shape_cast %489 : vector<1x2x96xf32> to vector<2x96xf32>
    %cst_139 = arith.constant dense<0.000000e+00> : vector<2x96xf32>
    %491 = tpu.matmul %451, %42, %cst_139 {dimension_numbers = #tpu.dot_dimension_numbers<[1], [0], [0], [1], [0, 0, 1, 1], [], []>} : vector<2x32xf32>, vector<32x96xf32>, vector<2x96xf32> -> vector<2x96xf32>
    %492 = vector.extract_strided_slice %490 {offsets = [0, 0], sizes = [2, 32], strides = [1, 1]} : vector<2x96xf32> to vector<2x32xf32>
    %493 = vector.extract_strided_slice %491 {offsets = [0, 0], sizes = [2, 32], strides = [1, 1]} : vector<2x96xf32> to vector<2x32xf32>
    %494 = arith.addf %492, %493 : vector<2x32xf32>
    %495 = arith.negf %494 : vector<2x32xf32>
    %496 = math.exp %495 : vector<2x32xf32>
    %cst_140 = arith.constant 1.000000e+00 : f32
    %497 = vector.broadcast %cst_140 : f32 to vector<2x32xf32>
    %498 = arith.addf %497, %496 : vector<2x32xf32>
    %499 = arith.divf %497, %498 : vector<2x32xf32>
    %500 = vector.extract_strided_slice %490 {offsets = [0, 32], sizes = [2, 32], strides = [1, 1]} : vector<2x96xf32> to vector<2x32xf32>
    %501 = vector.extract_strided_slice %491 {offsets = [0, 32], sizes = [2, 32], strides = [1, 1]} : vector<2x96xf32> to vector<2x32xf32>
    %502 = arith.addf %500, %501 : vector<2x32xf32>
    %503 = arith.negf %502 : vector<2x32xf32>
    %504 = math.exp %503 : vector<2x32xf32>
    %cst_141 = arith.constant 1.000000e+00 : f32
    %505 = vector.broadcast %cst_141 : f32 to vector<2x32xf32>
    %506 = arith.addf %505, %504 : vector<2x32xf32>
    %507 = arith.divf %505, %506 : vector<2x32xf32>
    %508 = vector.extract_strided_slice %490 {offsets = [0, 64], sizes = [2, 32], strides = [1, 1]} : vector<2x96xf32> to vector<2x32xf32>
    %509 = vector.extract_strided_slice %491 {offsets = [0, 64], sizes = [2, 32], strides = [1, 1]} : vector<2x96xf32> to vector<2x32xf32>
    %510 = vector.broadcast %44 : vector<1x32xf32> to vector<2x32xf32>
    %511 = arith.addf %509, %510 : vector<2x32xf32>
    %512 = arith.mulf %499, %511 : vector<2x32xf32>
    %513 = arith.addf %508, %512 : vector<2x32xf32>
    %514 = math.tanh %513 : vector<2x32xf32>
    %cst_142 = arith.constant 1.000000e+00 : f32
    %515 = vector.broadcast %cst_142 : f32 to vector<2x32xf32>
    %516 = arith.subf %515, %507 : vector<2x32xf32>
    %517 = arith.mulf %516, %514 : vector<2x32xf32>
    %518 = arith.mulf %507, %451 : vector<2x32xf32>
    %519 = arith.addf %517, %518 : vector<2x32xf32>
    %c1_143 = arith.constant 1 : index
    %c0_144 = arith.constant 0 : index
    %c0_145 = arith.constant 0 : index
    %520 = vector.load %arg10[%c1_143, %c0_144, %c0_145] : memref<8x2x32xf32, #tpu.memory_space<vmem>>, vector<1x2x32xf32>
    %521 = vector.shape_cast %520 : vector<1x2x32xf32> to vector<2x32xf32>
    %522 = vector.shape_cast %519 : vector<2x32xf32> to vector<1x2x32xf32>
    tpu.vector_store %arg10[%c1_143, %c0_144, %c0_145], %522 {strides = array<i32>} : memref<8x2x32xf32, #tpu.memory_space<vmem>>, vector<1x2x32xf32>,
    %523 = vector.extract_strided_slice %18 {offsets = [7, 0, 0], sizes = [1, 2, 96], strides = [1, 1, 1]} : vector<8x2x96xf32> to vector<1x2x96xf32>
    %524 = vector.shape_cast %523 : vector<1x2x96xf32> to vector<2x96xf32>
    %cst_146 = arith.constant dense<0.000000e+00> : vector<2x96xf32>
    %525 = tpu.matmul %485, %36, %cst_146 {dimension_numbers = #tpu.dot_dimension_numbers<[1], [0], [0], [1], [0, 0, 1, 1], [], []>} : vector<2x32xf32>, vector<32x96xf32>, vector<2x96xf32> -> vector<2x96xf32>
    %526 = vector.extract_strided_slice %524 {offsets = [0, 0], sizes = [2, 32], strides = [1, 1]} : vector<2x96xf32> to vector<2x32xf32>
    %527 = vector.extract_strided_slice %525 {offsets = [0, 0], sizes = [2, 32], strides = [1, 1]} : vector<2x96xf32> to vector<2x32xf32>
    %528 = arith.addf %526, %527 : vector<2x32xf32>
    %529 = arith.negf %528 : vector<2x32xf32>
    %530 = math.exp %529 : vector<2x32xf32>
    %cst_147 = arith.constant 1.000000e+00 : f32
    %531 = vector.broadcast %cst_147 : f32 to vector<2x32xf32>
    %532 = arith.addf %531, %530 : vector<2x32xf32>
    %533 = arith.divf %531, %532 : vector<2x32xf32>
    %534 = vector.extract_strided_slice %524 {offsets = [0, 32], sizes = [2, 32], strides = [1, 1]} : vector<2x96xf32> to vector<2x32xf32>
    %535 = vector.extract_strided_slice %525 {offsets = [0, 32], sizes = [2, 32], strides = [1, 1]} : vector<2x96xf32> to vector<2x32xf32>
    %536 = arith.addf %534, %535 : vector<2x32xf32>
    %537 = arith.negf %536 : vector<2x32xf32>
    %538 = math.exp %537 : vector<2x32xf32>
    %cst_148 = arith.constant 1.000000e+00 : f32
    %539 = vector.broadcast %cst_148 : f32 to vector<2x32xf32>
    %540 = arith.addf %539, %538 : vector<2x32xf32>
    %541 = arith.divf %539, %540 : vector<2x32xf32>
    %542 = vector.extract_strided_slice %524 {offsets = [0, 64], sizes = [2, 32], strides = [1, 1]} : vector<2x96xf32> to vector<2x32xf32>
    %543 = vector.extract_strided_slice %525 {offsets = [0, 64], sizes = [2, 32], strides = [1, 1]} : vector<2x96xf32> to vector<2x32xf32>
    %544 = vector.broadcast %38 : vector<1x32xf32> to vector<2x32xf32>
    %545 = arith.addf %543, %544 : vector<2x32xf32>
    %546 = arith.mulf %533, %545 : vector<2x32xf32>
    %547 = arith.addf %542, %546 : vector<2x32xf32>
    %548 = math.tanh %547 : vector<2x32xf32>
    %cst_149 = arith.constant 1.000000e+00 : f32
    %549 = vector.broadcast %cst_149 : f32 to vector<2x32xf32>
    %550 = arith.subf %549, %541 : vector<2x32xf32>
    %551 = arith.mulf %550, %548 : vector<2x32xf32>
    %552 = arith.mulf %541, %485 : vector<2x32xf32>
    %553 = arith.addf %551, %552 : vector<2x32xf32>
    %c7_150 = arith.constant 7 : index
    %c0_151 = arith.constant 0 : index
    %c0_152 = arith.constant 0 : index
    %554 = vector.load %arg9[%c7_150, %c0_151, %c0_152] : memref<8x2x32xf32, #tpu.memory_space<vmem>>, vector<1x2x32xf32>
    %555 = vector.shape_cast %554 : vector<1x2x32xf32> to vector<2x32xf32>
    %556 = vector.shape_cast %553 : vector<2x32xf32> to vector<1x2x32xf32>
    tpu.vector_store %arg9[%c7_150, %c0_151, %c0_152], %556 {strides = array<i32>} : memref<8x2x32xf32, #tpu.memory_space<vmem>>, vector<1x2x32xf32>,
    %557 = vector.extract_strided_slice %34 {offsets = [0, 0, 0], sizes = [1, 2, 96], strides = [1, 1, 1]} : vector<8x2x96xf32> to vector<1x2x96xf32>
    %558 = vector.shape_cast %557 : vector<1x2x96xf32> to vector<2x96xf32>
    %cst_153 = arith.constant dense<0.000000e+00> : vector<2x96xf32>
    %559 = tpu.matmul %519, %42, %cst_153 {dimension_numbers = #tpu.dot_dimension_numbers<[1], [0], [0], [1], [0, 0, 1, 1], [], []>} : vector<2x32xf32>, vector<32x96xf32>, vector<2x96xf32> -> vector<2x96xf32>
    %560 = vector.extract_strided_slice %558 {offsets = [0, 0], sizes = [2, 32], strides = [1, 1]} : vector<2x96xf32> to vector<2x32xf32>
    %561 = vector.extract_strided_slice %559 {offsets = [0, 0], sizes = [2, 32], strides = [1, 1]} : vector<2x96xf32> to vector<2x32xf32>
    %562 = arith.addf %560, %561 : vector<2x32xf32>
    %563 = arith.negf %562 : vector<2x32xf32>
    %564 = math.exp %563 : vector<2x32xf32>
    %cst_154 = arith.constant 1.000000e+00 : f32
    %565 = vector.broadcast %cst_154 : f32 to vector<2x32xf32>
    %566 = arith.addf %565, %564 : vector<2x32xf32>
    %567 = arith.divf %565, %566 : vector<2x32xf32>
    %568 = vector.extract_strided_slice %558 {offsets = [0, 32], sizes = [2, 32], strides = [1, 1]} : vector<2x96xf32> to vector<2x32xf32>
    %569 = vector.extract_strided_slice %559 {offsets = [0, 32], sizes = [2, 32], strides = [1, 1]} : vector<2x96xf32> to vector<2x32xf32>
    %570 = arith.addf %568, %569 : vector<2x32xf32>
    %571 = arith.negf %570 : vector<2x32xf32>
    %572 = math.exp %571 : vector<2x32xf32>
    %cst_155 = arith.constant 1.000000e+00 : f32
    %573 = vector.broadcast %cst_155 : f32 to vector<2x32xf32>
    %574 = arith.addf %573, %572 : vector<2x32xf32>
    %575 = arith.divf %573, %574 : vector<2x32xf32>
    %576 = vector.extract_strided_slice %558 {offsets = [0, 64], sizes = [2, 32], strides = [1, 1]} : vector<2x96xf32> to vector<2x32xf32>
    %577 = vector.extract_strided_slice %559 {offsets = [0, 64], sizes = [2, 32], strides = [1, 1]} : vector<2x96xf32> to vector<2x32xf32>
    %578 = vector.broadcast %44 : vector<1x32xf32> to vector<2x32xf32>
    %579 = arith.addf %577, %578 : vector<2x32xf32>
    %580 = arith.mulf %567, %579 : vector<2x32xf32>
    %581 = arith.addf %576, %580 : vector<2x32xf32>
    %582 = math.tanh %581 : vector<2x32xf32>
    %cst_156 = arith.constant 1.000000e+00 : f32
    %583 = vector.broadcast %cst_156 : f32 to vector<2x32xf32>
    %584 = arith.subf %583, %575 : vector<2x32xf32>
    %585 = arith.mulf %584, %582 : vector<2x32xf32>
    %586 = arith.mulf %575, %519 : vector<2x32xf32>
    %587 = arith.addf %585, %586 : vector<2x32xf32>
    %c0_157 = arith.constant 0 : index
    %c0_158 = arith.constant 0 : index
    %c0_159 = arith.constant 0 : index
    %588 = vector.load %arg10[%c0_157, %c0_158, %c0_159] : memref<8x2x32xf32, #tpu.memory_space<vmem>>, vector<1x2x32xf32>
    %589 = vector.shape_cast %588 : vector<1x2x32xf32> to vector<2x32xf32>
    %590 = vector.shape_cast %587 : vector<2x32xf32> to vector<1x2x32xf32>
    tpu.vector_store %arg10[%c0_157, %c0_158, %c0_159], %590 {strides = array<i32>} : memref<8x2x32xf32, #tpu.memory_space<vmem>>, vector<1x2x32xf32>,
    %c0_160 = arith.constant 0 : index
    %c0_161 = arith.constant 0 : index
    %c0_162 = arith.constant 0 : index
    %591 = vector.load %arg11[%c0_160, %c0_161, %c0_162] : memref<2x2x32xf32, #tpu.memory_space<vmem>>, vector<1x2x32xf32>
    %592 = vector.shape_cast %591 : vector<1x2x32xf32> to vector<2x32xf32>
    %593 = vector.shape_cast %553 : vector<2x32xf32> to vector<1x2x32xf32>
    tpu.vector_store %arg11[%c0_160, %c0_161, %c0_162], %593 {strides = array<i32>} : memref<2x2x32xf32, #tpu.memory_space<vmem>>, vector<1x2x32xf32>,
    %c1_163 = arith.constant 1 : index
    %c0_164 = arith.constant 0 : index
    %c0_165 = arith.constant 0 : index
    %594 = vector.load %arg11[%c1_163, %c0_164, %c0_165] : memref<2x2x32xf32, #tpu.memory_space<vmem>>, vector<1x2x32xf32>
    %595 = vector.shape_cast %594 : vector<1x2x32xf32> to vector<2x32xf32>
    %596 = vector.shape_cast %587 : vector<2x32xf32> to vector<1x2x32xf32>
    tpu.vector_store %arg11[%c1_163, %c0_164, %c0_165], %596 {strides = array<i32>} : memref<2x2x32xf32, #tpu.memory_space<vmem>>, vector<1x2x32xf32>,
    return
  }
  func.func @transform_0(%arg0: i32) -> (i32, i32, i32) {
    %c0_i32 = arith.constant 0 : i32
    %c0_i32_0 = arith.constant 0 : i32
    %c0_i32_1 = arith.constant 0 : i32
    return %arg0, %c0_i32, %c0_i32_0 : i32, i32, i32
  }
  func.func @transform_1(%arg0: i32) -> (i32, i32, i32) {
    %c0_i32 = arith.constant 0 : i32
    %c0_i32_0 = arith.constant 0 : i32
    %c0_i32_1 = arith.constant 0 : i32
    return %arg0, %c0_i32, %c0_i32_0 : i32, i32, i32
  }
  func.func @transform_2(%arg0: i32) -> (i32, i32, i32) {
    %c0_i32 = arith.constant 0 : i32
    %0 = arith.subi %c0_i32, %arg0 : i32
    %c0_i32_0 = arith.constant 0 : i32
    %c0_i32_1 = arith.constant 0 : i32
    %c0_i32_2 = arith.constant 0 : i32
    return %0, %c0_i32_0, %c0_i32_1 : i32, i32, i32
  }
  func.func @transform_3(%arg0: i32) -> (i32, i32, i32) {
    %c0_i32 = arith.constant 0 : i32
    %0 = arith.subi %c0_i32, %arg0 : i32
    %c0_i32_0 = arith.constant 0 : i32
    %c0_i32_1 = arith.constant 0 : i32
    %c0_i32_2 = arith.constant 0 : i32
    return %0, %c0_i32_0, %c0_i32_1 : i32, i32, i32
  }
  func.func @transform_4(%arg0: i32) -> (i32, i32, i32, i32) {
    %c0_i32 = arith.constant 0 : i32
    %c0_i32_0 = arith.constant 0 : i32
    %c0_i32_1 = arith.constant 0 : i32
    %c0_i32_2 = arith.constant 0 : i32
    %c0_i32_3 = arith.constant 0 : i32
    return %c0_i32, %c0_i32_0, %c0_i32_1, %c0_i32_2 : i32, i32, i32, i32
  }
  func.func @transform_5(%arg0: i32) -> (i32, i32, i32) {
    %c0_i32 = arith.constant 0 : i32
    %c0_i32_0 = arith.constant 0 : i32
    %c0_i32_1 = arith.constant 0 : i32
    %c0_i32_2 = arith.constant 0 : i32
    return %c0_i32, %c0_i32_0, %c0_i32_1 : i32, i32, i32
  }
  func.func @transform_6(%arg0: i32) -> (i32, i32, i32) {
    %c0_i32 = arith.constant 0 : i32
    %c0_i32_0 = arith.constant 0 : i32
    %c0_i32_1 = arith.constant 0 : i32
    %c0_i32_2 = arith.constant 0 : i32
    return %c0_i32, %c0_i32_0, %c0_i32_1 : i32, i32, i32
  }
  func.func @transform_7(%arg0: i32) -> (i32, i32, i32) {
    %c0_i32 = arith.constant 0 : i32
    %c0_i32_0 = arith.constant 0 : i32
    %c0_i32_1 = arith.constant 0 : i32
    %c0_i32_2 = arith.constant 0 : i32
    return %c0_i32, %c0_i32_0, %c0_i32_1 : i32, i32, i32
  }
  func.func @transform_8(%arg0: i32) -> (i32, i32, i32) {
    %c0_i32 = arith.constant 0 : i32
    %c0_i32_0 = arith.constant 0 : i32
    %c0_i32_1 = arith.constant 0 : i32
    return %arg0, %c0_i32, %c0_i32_0 : i32, i32, i32
  }
  func.func @transform_9(%arg0: i32) -> (i32, i32, i32) {
    %c0_i32 = arith.constant 0 : i32
    %0 = arith.subi %c0_i32, %arg0 : i32
    %c0_i32_0 = arith.constant 0 : i32
    %c0_i32_1 = arith.constant 0 : i32
    %c0_i32_2 = arith.constant 0 : i32
    return %0, %c0_i32_0, %c0_i32_1 : i32, i32, i32
  }
  func.func @transform_10(%arg0: i32) -> (i32, i32, i32) {
    %c0_i32 = arith.constant 0 : i32
    %c0_i32_0 = arith.constant 0 : i32
    %c0_i32_1 = arith.constant 0 : i32
    %c0_i32_2 = arith.constant 0 : i32
    return %c0_i32, %c0_i32_0, %c0_i32_1 : i32, i32, i32
  }
}

</mosaic_0001>

<bundles_post_ra>
// kernel: bert_gru_sentiment_forward.5
= control target key start
LH: loop header
LB: loop body
LE: loop exit
PB: predicated region body
PF: predicated region fallthrough
CT: control target
= control target key end

     0   :  { %s189_s0 = inlined_call_operand.vmem [shape: f32[2,2,32], index: 0, kind: input, shape index: {}]   ;;  %s190_s1 = inlined_call_operand.vmem [shape: f32[2,32,2], index: 1, kind: input, shape index: {}]   ;;  %s191_s2 = inlined_call_operand.vmem [shape: f32[1,2], index: 2, kind: input, shape index: {}]   ;;  %s192_s3 = inlined_call_operand.hbm [shape: f32[2,2], index: 3, kind: output, shape index: {}]  }
   0x1   :  { %v101_v0 = vld [vmem:[%s190_s1 + $0x38] sm:$0xff]  ;;  %v100_v2 = vld [vmem:[%s190_s1 + $0x30] sm:$0xff]  ;;  %v99_v4 = vld [vmem:[%s190_s1 + $0x28] sm:$0xff] }
   0x2   :  { %v19_v1 = vld [vmem:[%s190_s1 + $0x18] sm:$0xff]  ;;  %43 = vmatpush.msra.mxu0 %v101_v0  ;;  %v18_v3 = vld [vmem:[%s190_s1 + $0x10] sm:$0xff]  ;;  %v17_v5 = vld [vmem:[%s190_s1 + $0x8] sm:$0xff] }
   0x3   :  { %66 = vmatpush.msra.mxu1 %v19_v1 }
   0x4   :  { %44 = vmatpush.msra.mxu0 %v100_v2 }
   0x5   :  { %67 = vmatpush.msra.mxu1 %v18_v3 }
   0x6   :  { %8 = vsyncpa [#allocation3], 0  ;;  %v98_v6 = vld [vmem:[%s190_s1 + $0x20] sm:$0xff]  ;;  %45 = vmatpush.msra.mxu0 %v99_v4  ;;  %vm27_vm0 = vcmask 261120   ;;  %s88_s10 = sshll.u32 %s192_s3, 4  ;;  %vm79_vm1 = vcmask 9216   ;;  %s89_s10 = int_to_ptr.hbm [resolvable:$true] %s88_s10 }
   0x7   :  { %v16_v7 = vld [vmem:[%s190_s1] sm:$0xff]  ;;  %68 = vmatpush.msra.mxu1 %v17_v5  ;;  %s132_s1 = smov [#allocation2]  }
   0x8   :  { %v97_v8 = vld [vmem:[%s189_s0 + $0x2] sm:$0x3]  ;;  %v15_v9 = vld [vmem:[%s189_s0] sm:$0x3]  ;;  %46 = vmatpush.msra.mxu0 %v98_v6  ;;  %s86_s7 = sshll.u32 %s132_s1, 4  ;;  %s87_s7 = int_to_ptr.vmem [resolvable:$true] %s86_s7 }
   0x9   :  { %69 = vmatpush.msra.mxu1 %v16_v7  ;;  %102 = vmatmul.msk.f32.vlgmr.msra.gmra.mxu0 %vm27_vm0, %v97_v8  ;;  %v105_v10 = vld [vmem:[%s191_s2] ss:$0 sm:$0xff] }
   0xa   :  { %103 = vmatmul.msk.f32.vlgmr.msra.gmra.mxu1 %vm27_vm0, %v15_v9 }
  0x86   :  { %v48_v11 = vpop.f32.mrf.mxu0 }
  0x87   :  { %v71_v12 = vpop.f32.mrf.mxu1 }
  0x88   :  { %v72_v13 = vadd.f32 %v71_v12, %v48_v11 }
  0x8a   :  { %v78_v14 = vadd.f32 %v105_v10, %v72_v13 }
  0x8c   :  { %80 = vst.msk [vmem:[#allocation2] sm:$0x3] %vm79_vm1, %v78_v14 }
  0x8d   :  { %91 = dma.vmem_to_hbm [thread:$0]  %s87_s7, 32, %s89_s10, [#allocation3]  }
  0x8e   :  { %130 = dma.done.wait [#allocation3], 32  }
  0x8f   :  { %131 = vsyncadd [#allocation3], 4294967264 }
  0x90   :  { %96 = vsyncpa [#allocation3], 1 }

// kernel: bert_gru_sentiment_forward.3
= control target key start
LH: loop header
LB: loop body
LE: loop exit
PB: predicated region body
PF: predicated region fallthrough
CT: control target
= control target key end

     0   :  { %vm67_vm0 = vcmask 254976   ;;  %v1703_v5 = vmov 0.0   ;;  %vm111_vm1 = vcmask 261120   ;;  %s1704_s9 = smov 64   ;;  %s2293_s0 = inlined_call_operand.vmem [shape: f32[8,2,32], index: 0, kind: input, shape index: {}, may-alias: {0,1}]   ;;  %s2294_s1 = inlined_call_operand.vmem [shape: f32[8,2,32], index: 1, kind: input, shape index: {}, may-alias: {0,1}]   ;;  %s2295_s2 = inlined_call_operand.vmem [shape: f32[2,1,32,96], index: 2, kind: input, shape index: {}]   ;;  %s2296_s3 = inlined_call_operand.vmem [shape: f32[2,1,96], index: 3, kind: input, shape index: {}]   ;;  %s2297_s4 = inlined_call_operand.vmem [shape: f32[2,32,96], index: 4, kind: input, shape index: {}]   ;;  %s2298_s5 = inlined_call_operand.vmem [shape: f32[2,1,32], index: 5, kind: input, shape index: {}]   ;;  %s2299_s6 = inlined_call_operand.vmem [shape: f32[8,2,32], index: 6, kind: output, shape index: {0}]   ;;  %s2300_s7 = inlined_call_operand.vmem [shape: f32[8,2,32], index: 7, kind: output, shape index: {1}]   ;;  %s2301_s8 = inlined_call_operand.hbm [shape: f32[2,2,32], index: 8, kind: output, shape index: {2}]  }
   0x1   :  { %v1757_v0 = vld [vmem:[%s2297_s4 + $0x18] sm:$0xff]  ;;  %v1762_v1 = vld [vmem:[%s2297_s4 + $0x10] sm:$0xff]  ;;  %v1771_v3 = vld [vmem:[%s2297_s4 + $0x8] sm:$0xff]  ;;  %68 = vst.msk [vmem:[#allocation2] sm:$0x3] %vm67_vm0, %v1703_v5 }
   0x2   :  { %v81_v2 = vld [vmem:[%s2295_s2 + $0x18] sm:$0xff]  ;;  %267 = vmatpush.msra.mxu2 %v1757_v0  ;;  %v80_v4 = vld [vmem:[%s2295_s2 + $0x10] sm:$0xff]  ;;  %v1780_v6 = vld [vmem:[%s2297_s4] sm:$0xff]  ;;  %69 = vst.msk [vmem:[#allocation2 + $0x2] sm:$0x3] %vm67_vm0, %v1703_v5 }
   0x3   :  { %128 = vmatpush.msra.mxu0 %v81_v2  ;;  %v79_v7 = vld [vmem:[%s2295_s2 + $0x8] sm:$0xff]  ;;  %v1789_v8 = vld [vmem:[%s2297_s4 + $0x38] sm:$0xff]  ;;  %v78_v9 = vld [vmem:[%s2295_s2] sm:$0xff] }
   0x4   :  { %268 = vmatpush.msra.mxu2 %v1762_v1  ;;  %v1798_v10 = vld [vmem:[%s2297_s4 + $0x30] sm:$0xff]  ;;  %v70_v11 = vld [vmem:[%s2293_s0] sm:$0x3]  ;;  %v71_v12 = vld [vmem:[%s2293_s0 + $0x2] sm:$0x3]  ;;  %346 = vmatpush.msra.mxu3 %v1789_v8 }
   0x5   :  { %129 = vmatpush.msra.mxu0 %v80_v4  ;;  %v72_v13 = vld [vmem:[%s2293_s0 + $0x4] sm:$0x3]  ;;  %v73_v14 = vld [vmem:[%s2293_s0 + $0x6] sm:$0x3]  ;;  %94 = vst [vmem:[#allocation1] ss:$4 sm:$0xff] %v70_v11 }
   0x6   :  { %269 = vmatpush.msra.mxu2 %v1771_v3  ;;  %96 = vst [vmem:[#allocation1 + $0x1] ss:$4 sm:$0xff] %v71_v12  ;;  %v1817_v15 = vld [vmem:[%s2297_s4 + $0x28] sm:$0xff]  ;;  %v1516_v16 = vld [vmem:[%s2295_s2 + $0x38] sm:$0xff]  ;;  %347 = vmatpush.msra.mxu3 %v1798_v10  ;;  %v1515_v17 = vld [vmem:[%s2295_s2 + $0x30] sm:$0xff] }
   0x7   :  { %130 = vmatpush.msra.mxu0 %v79_v7  ;;  %98 = vst [vmem:[#allocation1 + $0x2] ss:$4 sm:$0xff] %v72_v13  ;;  %212 = vmatpush.msra.mxu1 %v1516_v16  ;;  %v1830_v18 = vld [vmem:[%s2297_s4 + $0x20] sm:$0xff]  ;;  %v1514_v19 = vld [vmem:[%s2295_s2 + $0x28] sm:$0xff] }
   0x8   :  { %270 = vmatpush.msra.mxu2 %v1780_v6  ;;  %100 = vst [vmem:[#allocation1 + $0x3] ss:$4 sm:$0xff] %v73_v14  ;;  %v1835_v20 = vld [vmem:[#allocation2] sm:$0x3]  ;;  %348 = vmatpush.msra.mxu3 %v1817_v15  ;;  %v1513_v21 = vld [vmem:[%s2295_s2 + $0x20] sm:$0xff] }
   0x9   :  { %131 = vmatpush.msra.mxu0 %v78_v9  ;;  %213 = vmatpush.msra.mxu1 %v1515_v17  ;;  %v1843_v22 = vld [vmem:[#allocation2 + $0x2] sm:$0x3]  ;;  %v1577_v23 = vld [vmem:[%s2298_s5] ss:$0 sm:$0xff]  ;;  %v74_v24 = vld [vmem:[%s2293_s0 + $0x8] sm:$0x3] }
   0xa   :  { %1525 = vmatmul.msk.f32.vlgmr.msra.gmra.mxu2 %vm111_vm1, %v1835_v20  ;;  %349 = vmatpush.msra.mxu3 %v1830_v18  ;;  %v75_v25 = vld [vmem:[%s2293_s0 + $0xa] sm:$0x3]  ;;  %v76_v26 = vld [vmem:[%s2293_s0 + $0xc] sm:$0x3]  ;;  %v153_v27 = vld [vmem:[%s2294_s1] sm:$0x3] }
   0xb   :  { %576 = vmatpush.msrb.mxu0 %v1757_v0  ;;  %214 = vmatpush.msra.mxu1 %v1514_v19  ;;  %v77_v28 = vld [vmem:[%s2293_s0 + $0xe] sm:$0x3]  ;;  %102 = vst [vmem:[#allocation1 + $0x20] ss:$4 sm:$0xff] %v74_v24  ;;  %v154_v29 = vld [vmem:[%s2294_s1 + $0x2] sm:$0x3] }
   0xc   :  { %1527 = vmatmul.msk.f32.vlgmr.msra.gmra.mxu3 %vm111_vm1, %v1843_v22  ;;  %297 = vrot.lane.b32.xlu0 %v1577_v23, %s1704_s9  ;;  %v155_v30 = vld [vmem:[%s2294_s1 + $0x4] sm:$0x3]  ;;  %104 = vst [vmem:[#allocation1 + $0x21] ss:$4 sm:$0xff] %v75_v25  ;;  %v156_v31 = vld [vmem:[%s2294_s1 + $0x6] sm:$0x3] }
   0xd   :  { %215 = vmatpush.msra.mxu1 %v1513_v21  ;;  %428 = vmatpush.msrb.mxu2 %v1757_v0  ;;  %106 = vst [vmem:[#allocation1 + $0x22] ss:$4 sm:$0xff] %v76_v26  ;;  %v1578_v33 = vld [vmem:[%s2298_s5 + $0x1] ss:$0 sm:$0xff] }
   0xe   :  { %502 = vmatpush.msrb.mxu3 %v1789_v8  ;;  %577 = vmatpush.msrb.mxu0 %v1762_v1  ;;  %108 = vst [vmem:[#allocation1 + $0x23] ss:$4 sm:$0xff] %v77_v28 }
   0xf   :  { %v109_v32 = vld.sshfl [vmem:[#allocation1] sm:$0xff pattern:$0x73625140]  ;;  %429 = vmatpush.msrb.mxu2 %v1762_v1  ;;  %650 = vmatpush.msrb.mxu1 %v1789_v8 }
  0x10   :  { %1511 = vmatmul.msk.f32.vlgmr.msra.gmra.mxu0 %vm111_vm1, %v109_v32  ;;  %179 = vst [vmem:[#allocation1] ss:$4 sm:$0xff] %v153_v27  ;;  %503 = vmatpush.msrb.mxu3 %v1798_v10 }
  0x11   :  { %181 = vst [vmem:[#allocation1 + $0x1] ss:$4 sm:$0xff] %v154_v29  ;;  %430 = vmatpush.msrb.mxu2 %v1771_v3  ;;  %578 = vmatpush.msrb.mxu0 %v1771_v3 }
  0x12   :  { %183 = vst [vmem:[#allocation1 + $0x2] ss:$4 sm:$0xff] %v155_v30  ;;  %504 = vmatpush.msrb.mxu3 %v1817_v15  ;;  %651 = vmatpush.msrb.mxu1 %v1798_v10 }
  0x13   :  { %14 = vsyncpa [#allocation3], 0  ;;  %185 = vst [vmem:[#allocation1 + $0x3] ss:$4 sm:$0xff] %v156_v31  ;;  %431 = vmatpush.msrb.mxu2 %v1780_v6  ;;  %579 = vmatpush.msrb.mxu0 %v1780_v6  ;;  %v157_v34 = vld [vmem:[%s2294_s1 + $0x8] sm:$0x3] }
  0x14   :  { %376 = vrot.lane.b32.xlu0 %v1578_v33, %s1704_s9  ;;  %505 = vmatpush.msrb.mxu3 %v1830_v18  ;;  %v158_v35 = vld [vmem:[%s2294_s1 + $0xa] sm:$0x3]  ;;  %v159_v37 = vld [vmem:[%s2294_s1 + $0xc] sm:$0x3]  ;;  %v160_v38 = vld [vmem:[%s2294_s1 + $0xe] sm:$0x3] }
  0x15   :  { %652 = vmatpush.msrb.mxu1 %v1817_v15  ;;  %724 = vmatpush.msra.mxu2 %v1757_v0  ;;  %v110_v36 = vld.sshfl [vmem:[#allocation1 + $0x20] sm:$0xff pattern:$0x73625140]  ;;  %s1705_s26 = smov 32   ;;  %s1475_s12 = sshll.u32 %s2301_s8, 4  ;;  %s1476_s12 = int_to_ptr.hbm [resolvable:$true] %s1475_s12 }
  0x16   :  { %798 = vmatpush.msra.mxu3 %v1789_v8  ;;  %872 = vmatpush.msra.mxu0 %v1757_v0  ;;  %187 = vst [vmem:[#allocation1 + $0x20] ss:$4 sm:$0xff] %v157_v34  ;;  %v1580_v47 = vld [vmem:[%s2296_s3 + $0x1] ss:$0 sm:$0xff]  ;;  %v1946_v50 = vld [vmem:[%s2296_s3] ss:$0 sm:$0xff] }
  0x17   :  { %653 = vmatpush.msrb.mxu1 %v1830_v18  ;;  %725 = vmatpush.msra.mxu2 %v1762_v1  ;;  %189 = vst [vmem:[#allocation1 + $0x21] ss:$4 sm:$0xff] %v158_v35  ;;  %s1706_s3 = smov 96   ;;  %s1707_s13 = smov [#allocation2]  }
  0x18   :  { %1512 = vmatmul.msk.f32.gmra.mxu0 %vm111_vm1, %v110_v36  ;;  %799 = vmatpush.msra.mxu3 %v1798_v10  ;;  %191 = vst [vmem:[#allocation1 + $0x22] ss:$4 sm:$0xff] %v159_v37  ;;  %s1473_s14 = sshll.u32 %s1707_s13, 4  ;;  %s1474_s14 = int_to_ptr.vmem [resolvable:$true] %s1473_s14 }
  0x19   :  { %726 = vmatpush.msra.mxu2 %v1771_v3  ;;  %873 = vmatpush.msra.mxu0 %v1762_v1  ;;  %193 = vst [vmem:[#allocation1 + $0x23] ss:$4 sm:$0xff] %v160_v38 }
  0x1a   :  { %v194_v39 = vld.sshfl [vmem:[#allocation1] sm:$0xff pattern:$0x73625140]  ;;  %800 = vmatpush.msra.mxu3 %v1817_v15 }
  0x1b   :  { %1518 = vmatmul.msk.f32.vlgmr.msra.gmra.mxu1 %vm111_vm1, %v194_v39  ;;  %727 = vmatpush.msra.mxu2 %v1780_v6 }
  0x1c   :  { %801 = vmatpush.msra.mxu3 %v1830_v18  ;;  %874 = vmatpush.msra.mxu0 %v1771_v3 }
  0x1d   :  { %946 = vmatpush.msra.mxu1 %v1789_v8 }
  0x1e   :  { %875 = vmatpush.msra.mxu0 %v1780_v6 }
  0x1f   :  { %947 = vmatpush.msra.mxu1 %v1798_v10 }
  0x20   :  { %v195_v40 = vld.sshfl [vmem:[#allocation1 + $0x20] sm:$0xff pattern:$0x73625140] }
  0x21   :  { %948 = vmatpush.msra.mxu1 %v1817_v15 }
  0x23   :  { %1519 = vmatmul.msk.f32.gmra.mxu1 %vm111_vm1, %v195_v40 }
  0x24   :  { %949 = vmatpush.msra.mxu1 %v1830_v18 }
  0x7e   :  { %v1928_v41 = vpop.permute.xlu0 %297 }
  0x86   :  { %v1932_v44 = vpop.permute.xlu0 %376 }
  0x8d   :  { %v272_v42 = vpop.f32.mrf.mxu2  ;;  %v133_v51 = vpop.f32.mrf.mxu0 }
  0x8e   :  { %v300_v43 = vadd.f32 %v1928_v41, %v272_v42  ;;  %v1949_v52 = vadd.f32 %v1946_v50, %v133_v51 }
  0x8f   :  { %v351_v45 = vpop.f32.mrf.mxu3 }
  0x90   :  { %302 = vrot.lane.b32.xlu1 %v300_v43, %s1704_s9  ;;  %v379_v46 = vadd.f32 %v1932_v44, %v351_v45  ;;  %v275_v54 = vadd.f32 %v272_v42, %v1949_v52 }
  0x92   :  { %v1526_v56 = vmul.f32 -1.442695, %v275_v54 }
  0x94   :  { %1581 = vpow2.f32 %v1526_v56 }
  0x98   :  { %v217_v48 = vpop.f32.mrf.mxu1  ;;  %381 = vrot.lane.b32.xlu1 %v379_v46, %s1704_s9 }
  0x99   :  { %v1939_v49 = vadd.f32 %v1580_v47, %v217_v48 }
  0x9a   :  { %v1582_v60 = vpop.eup %1581 }
  0x9b   :  { %v279_v61 = vadd.f32 1.0, %v1582_v60 }
  0x9d   :  { %v291_v14 = vand.u32 2147483648, %v279_v61  ;;  %vm285_vm3 = vweird.f32 %v279_v61  ;;  %v289_v16 = vand.u32 2147483647, %v279_v61 }
  0x9f   :  { %vm290_vm5 = vcmp.eq.f32.partialorder %v289_v16, 8.507059e+37 }
  0xa0   :  { %318 = vrot.lane.b32.xlu1 %v1835_v20, %s1705_s26  ;;  %v220_v53 = vpop.f32.mrf.mxu1  ;;  %v292_v20 = vor.u32 1.1754944e-38, %v291_v14 }
  0xa1   :  { %v1952_v55 = vadd.f32 %v1580_v47, %v220_v53 }
  0xa3   :  { %v230_v57 = vrot.slane %v1952_v55, 6 }
  0xa5   :  { %v354_v58 = vadd.f32 %v351_v45, %v230_v57 }
  0xa7   :  { %v1528_v59 = vmul.f32 -1.442695, %v354_v58 }
  0xa9   :  { %1583 = vpow2.f32 %v1528_v59 }
  0xaa   :  { %1585 = vrcp.f32 %v279_v61 }
  0xaf   :  { %v1584_v62 = vpop.eup %1583 }
  0xb0   :  { %v358_v63 = vadd.f32 1.0, %v1584_v62  ;;  %v1586_v2 = vpop.eup %1585  ;;  %v141_v62 = vrot.slane %v1949_v52, 2 }
  0xb1   :  { %v281_v4 = vmul.f32 %v1586_v2, %v279_v61  ;;  %vm286_vm2 = vweird.f32 %v1586_v2 }
  0xb2   :  { %1587 = vrcp.f32 %v358_v63  ;;  %vm287_vm4 = vmor %vm285_vm3, %vm286_vm2  ;;  %vm364_vm6 = vweird.f32 %v358_v63  ;;  %v370_v24 = vand.u32 2147483648, %v358_v63  ;;  %v368_v27 = vand.u32 2147483647, %v358_v63 }
  0xb3   :  { %v282_v5 = vsub.f32 1.0, %v281_v4 }
  0xb4   :  { %v371_v28 = vor.u32 1.1754944e-38, %v370_v24  ;;  %vm369_vm9 = vcmp.eq.f32.partialorder %v368_v27, 8.507059e+37 }
  0xb5   :  { %v283_v9 = vmul.f32 %v1586_v2, %v282_v5 }
  0xb7   :  { %v284_v12 = vadd.f32 %v1586_v2, %v283_v9 }
  0xb8   :  { %v1588_v7 = vpop.eup %1587 }
  0xb9   :  { %v360_v11 = vmul.f32 %v1588_v7, %v358_v63  ;;  %v288_v17 = vsel %vm287_vm4, %v1586_v2, %v284_v12  ;;  %vm365_vm7 = vweird.f32 %v1588_v7 }
  0xba   :  { %v293_v23 = vsel %vm290_vm5, %v292_v20, %v288_v17  ;;  %vm366_vm8 = vmor %vm364_vm6, %vm365_vm7 }
  0xbb   :  { %v361_v13 = vsub.f32 1.0, %v360_v11  ;;  %v312_v40 = vsub.f32 1.0, %v293_v23 }
  0xbd   :  { %v362_v19 = vmul.f32 %v1588_v7, %v361_v13 }
  0xbf   :  { %v363_v26 = vadd.f32 %v1588_v7, %v362_v19 }
  0xc1   :  { %v367_v29 = vsel %vm366_vm8, %v1588_v7, %v363_v26 }
  0xc2   :  { %v372_v30 = vsel %vm369_vm9, %v371_v28, %v367_v29 }
  0xc3   :  { %v391_v48 = vsub.f32 1.0, %v372_v30 }
 0x102   :  { %v303_v21 = vpop.permute.xlu1 %302 }
 0x103   :  { %v305_v25 = vmul.f32 %v303_v21, %v293_v23 }
 0x105   :  { %307 = vrot.lane.b32.xlu2 %v305_v25, %s1704_s9 }
 0x10a   :  { %v382_v31 = vpop.permute.xlu1 %381 }
 0x10b   :  { %v384_v32 = vmul.f32 %v382_v31, %v372_v30 }
 0x10d   :  { %386 = vrot.lane.b32.xlu2 %v384_v32, %s1704_s9 }
 0x112   :  { %v319_v39 = vpop.permute.xlu1 %318 }
 0x113   :  { %v321_v43 = vmul.f32 %v319_v39, %v293_v23 }
 0x15f   :  { %v308_v33 = vpop.permute.xlu2 %307 }
 0x160   :  { %v310_v34 = vadd.f32 %v308_v33, %v1949_v52 }
 0x162   :  { %1589 = vtanh.f32 %v310_v34 }
 0x167   :  { %v387_v35 = vpop.permute.xlu2 %386 }
 0x168   :  { %v1590_v36 = vpop.eup %1589  ;;  %v389_v37 = vadd.f32 %v387_v35, %v230_v57 }
 0x169   :  { %314 = vrot.lane.b32.xlu0 %v1590_v36, %s1706_s3 }
 0x16a   :  { %1591 = vtanh.f32 %v389_v37  ;;  %v229_v37 = vrot.slane %v1952_v55, 4 }
 0x170   :  { %v1592_v38 = vpop.eup %1591 }
 0x171   :  { %397 = vrot.lane.b32.xlu0 %v1843_v22, %s1705_s26  ;;  %393 = vrot.lane.b32.xlu2 %v1592_v38, %s1706_s3 }
 0x1cb   :  { %v394_v47 = vpop.permute.xlu2 %393 }
 0x1cc   :  { %v396_v53 = vmul.f32 %v394_v47, %v391_v48 }
 0x1db   :  { %v315_v42 = vpop.permute.xlu0 %314 }
 0x1dc   :  { %v317_v45 = vmul.f32 %v315_v42, %v312_v40 }
 0x1de   :  { %v322_v46 = vadd.f32 %v321_v43, %v317_v45 }
 0x1e0   :  { %324 = vst [vmem:[#allocation1] ss:$4 sm:$0xff] %v322_v46 }
 0x1e3   :  { %v398_v51 = vpop.permute.xlu0 %397 }
 0x1e4   :  { %v400_v54 = vmul.f32 %v398_v51, %v372_v30 }
 0x1e6   :  { %v1962_v56 = vadd.f32 %v400_v54, %v396_v53 }
 0x1e7   :  { %v1964_v57 = vld.sshfl [vmem:[#allocation1] sm:$0xff pattern:$0x73625140] }
 0x1e8   :  { %403 = vst [vmem:[#allocation1] ss:$4 sm:$0xff] %v1962_v56 }
 0x1ef   :  { %v1967_v22 = vld.sshfl [vmem:[#allocation1] sm:$0xff pattern:$0x73625140] }
 0x1f0   :  { %410 = vst [vmem:[#allocation1] ss:$4 sm:$0xff] %v322_v46 }
 0x1f7   :  { %v411_v58 = vld.sshfl [vmem:[#allocation1] sm:$0xff pattern:$0x73625140] }
 0x1f8   :  { %412 = vrot.lane.b32.xlu1 %v411_v58, %s1706_s3 }
 0x26a   :  { %v413_v59 = vpop.permute.xlu1 %412 }
 0x26b   :  { %1530 = vmatmul.msk.f32.vlgmr.msrb.gmra.mxu2 %vm111_vm1, %v413_v59 }
 0x26c   :  { %1020 = vmatpush.msrb.mxu2 %v1757_v0 }
 0x26e   :  { %1021 = vmatpush.msrb.mxu2 %v1762_v1 }
 0x270   :  { %1022 = vmatpush.msrb.mxu2 %v1771_v3 }
 0x272   :  { %1023 = vmatpush.msrb.mxu2 %v1780_v6 }
 0x2ee   :  { %v433_v60 = vpop.f32.mrf.mxu2 }
 0x2ef   :  { %v456_v61 = vadd.f32 %v433_v60, %v1928_v41  ;;  %v436_v63 = vadd.f32 %v433_v60, %v141_v62 }
 0x2f1   :  { %458 = vrot.lane.b32.xlu2 %v456_v61, %s1704_s9  ;;  %v1531_v2 = vmul.f32 -1.442695, %v436_v63 }
 0x2f3   :  { %1593 = vpow2.f32 %v1531_v2 }
 0x2f9   :  { %v1594_v4 = vpop.eup %1593 }
 0x2fa   :  { %v440_v5 = vadd.f32 1.0, %v1594_v4 }
 0x2fc   :  { %1595 = vrcp.f32 %v440_v5  ;;  %v452_v14 = vand.u32 2147483648, %v440_v5  ;;  %vm446_vm11 = vweird.f32 %v440_v5  ;;  %v450_v16 = vand.u32 2147483647, %v440_v5 }
 0x2fe   :  { %v453_v19 = vor.u32 1.1754944e-38, %v452_v14  ;;  %vm451_vm13 = vcmp.eq.f32.partialorder %v450_v16, 8.507059e+37 }
 0x302   :  { %v1596_v7 = vpop.eup %1595 }
 0x303   :  { %v442_v9 = vmul.f32 %v1596_v7, %v440_v5  ;;  %vm447_vm10 = vweird.f32 %v1596_v7 }
 0x304   :  { %vm448_vm12 = vmor %vm446_vm11, %vm447_vm10 }
 0x305   :  { %v443_v11 = vsub.f32 1.0, %v442_v9 }
 0x307   :  { %v444_v12 = vmul.f32 %v1596_v7, %v443_v11 }
 0x309   :  { %v445_v13 = vadd.f32 %v1596_v7, %v444_v12 }
 0x30b   :  { %v449_v17 = vsel %vm448_vm12, %v1596_v7, %v445_v13 }
 0x30c   :  { %v454_v21 = vsel %vm451_vm13, %v453_v19, %v449_v17  ;;  %v142_v19 = vrot.slane %v1949_v52, 4 }
 0x30d   :  { %v468_v27 = vsub.f32 1.0, %v454_v21  ;;  %v474_v29 = vmul.f32 %v454_v21, %v322_v46 }
 0x34b   :  { %v459_v20 = vpop.permute.xlu2 %458 }
 0x34c   :  { %v461_v23 = vmul.f32 %v459_v20, %v454_v21 }
 0x34e   :  { %463 = vrot.lane.b32.xlu0 %v461_v23, %s1704_s9 }
 0x3c0   :  { %v464_v24 = vpop.permute.xlu0 %463 }
 0x3c1   :  { %v466_v25 = vadd.f32 %v464_v24, %v141_v62 }
 0x3c3   :  { %1597 = vtanh.f32 %v466_v25 }
 0x3c9   :  { %v1598_v26 = vpop.eup %1597 }
 0x3ca   :  { %470 = vrot.lane.b32.xlu1 %v1598_v26, %s1706_s3 }
 0x43c   :  { %v471_v28 = vpop.permute.xlu1 %470 }
 0x43d   :  { %v473_v30 = vmul.f32 %v471_v28, %v468_v27 }
 0x43f   :  { %v1980_v31 = vadd.f32 %v474_v29, %v473_v30 }
 0x441   :  { %477 = vst [vmem:[#allocation1] ss:$4 sm:$0xff] %v1980_v31 }
 0x448   :  { %v1983_v32 = vld.sshfl [vmem:[#allocation1] sm:$0xff pattern:$0x73625140] }
 0x449   :  { %484 = vst [vmem:[#allocation1] ss:$4 sm:$0xff] %v1962_v56 }
 0x450   :  { %v485_v33 = vld.sshfl [vmem:[#allocation1] sm:$0xff pattern:$0x73625140] }
 0x451   :  { %486 = vrot.lane.b32.xlu2 %v485_v33, %s1706_s3 }
 0x4ab   :  { %v487_v34 = vpop.permute.xlu2 %486 }
 0x4ac   :  { %1533 = vmatmul.msk.f32.vlgmr.msrb.gmra.mxu3 %vm111_vm1, %v487_v34 }
 0x4ad   :  { %1094 = vmatpush.msrb.mxu3 %v1789_v8 }
 0x4af   :  { %1095 = vmatpush.msrb.mxu3 %v1798_v10 }
 0x4b1   :  { %1096 = vmatpush.msrb.mxu3 %v1817_v15 }
 0x4b3   :  { %1097 = vmatpush.msrb.mxu3 %v1830_v18 }
 0x52f   :  { %v507_v35 = vpop.f32.mrf.mxu3 }
 0x530   :  { %v530_v36 = vadd.f32 %v507_v35, %v1932_v44  ;;  %v510_v38 = vadd.f32 %v507_v35, %v229_v37 }
 0x532   :  { %532 = vrot.lane.b32.xlu0 %v530_v36, %s1704_s9  ;;  %v1534_v39 = vmul.f32 -1.442695, %v510_v38 }
 0x534   :  { %1599 = vpow2.f32 %v1534_v39 }
 0x53a   :  { %v1600_v40 = vpop.eup %1599 }
 0x53b   :  { %v514_v42 = vadd.f32 1.0, %v1600_v40 }
 0x53d   :  { %1601 = vrcp.f32 %v514_v42  ;;  %v526_v51 = vand.u32 2147483648, %v514_v42  ;;  %vm520_vm15 = vweird.f32 %v514_v42  ;;  %v524_v53 = vand.u32 2147483647, %v514_v42 }
 0x53f   :  { %v527_v58 = vor.u32 1.1754944e-38, %v526_v51  ;;  %vm525_vm3 = vcmp.eq.f32.partialorder %v524_v53, 8.507059e+37 }
 0x543   :  { %v1602_v43 = vpop.eup %1601 }
 0x544   :  { %v516_v45 = vmul.f32 %v1602_v43, %v514_v42  ;;  %vm521_vm14 = vweird.f32 %v1602_v43 }
 0x545   :  { %vm522_vm2 = vmor %vm520_vm15, %vm521_vm14 }
 0x546   :  { %v517_v46 = vsub.f32 1.0, %v516_v45 }
 0x548   :  { %v518_v47 = vmul.f32 %v1602_v43, %v517_v46 }
 0x54a   :  { %v519_v48 = vadd.f32 %v1602_v43, %v518_v47 }
 0x54c   :  { %v523_v54 = vsel %vm522_vm2, %v1602_v43, %v519_v48 }
 0x54d   :  { %v528_v60 = vsel %vm525_vm3, %v527_v58, %v523_v54 }
 0x54e   :  { %v542_v4 = vsub.f32 1.0, %v528_v60  ;;  %v548_v7 = vmul.f32 %v528_v60, %v1962_v56  ;;  %v2010_v56 = vpop.f32.mrf.mxu0 }
 0x5a4   :  { %v533_v59 = vpop.permute.xlu0 %532 }
 0x5a5   :  { %v535_v61 = vmul.f32 %v533_v59, %v528_v60  ;;  %v228_v59 = vrot.slane %v1952_v55, 2 }
 0x5a7   :  { %537 = vrot.lane.b32.xlu1 %v535_v61, %s1704_s9 }
 0x619   :  { %v538_v62 = vpop.permute.xlu1 %537 }
 0x61a   :  { %v540_v63 = vadd.f32 %v538_v62, %v229_v37 }
 0x61c   :  { %1603 = vtanh.f32 %v540_v63 }
 0x622   :  { %v1604_v2 = vpop.eup %1603 }
 0x623   :  { %544 = vrot.lane.b32.xlu2 %v1604_v2, %s1706_s3 }
 0x67d   :  { %v545_v5 = vpop.permute.xlu2 %544 }
 0x67e   :  { %v547_v9 = vmul.f32 %v545_v5, %v542_v4 }
 0x680   :  { %v1998_v11 = vadd.f32 %v548_v7, %v547_v9 }
 0x682   :  { %551 = vst [vmem:[#allocation1] ss:$4 sm:$0xff] %v1998_v11 }
 0x689   :  { %v2001_v12 = vld.sshfl [vmem:[#allocation1] sm:$0xff pattern:$0x73625140] }
 0x68a   :  { %558 = vst [vmem:[#allocation1] ss:$4 sm:$0xff] %v1980_v31 }
 0x691   :  { %v559_v13 = vld.sshfl [vmem:[#allocation1] sm:$0xff pattern:$0x73625140] }
 0x692   :  { %560 = vrot.lane.b32.xlu0 %v559_v13, %s1706_s3 }
 0x704   :  { %v561_v14 = vpop.permute.xlu0 %560 }
 0x705   :  { %1536 = vmatmul.msk.f32.vlgmr.msrb.gmra.mxu0 %vm111_vm1, %v561_v14 }
 0x706   :  { %1168 = vmatpush.msrb.mxu0 %v1757_v0 }
 0x708   :  { %1169 = vmatpush.msrb.mxu0 %v1762_v1 }
 0x70a   :  { %1170 = vmatpush.msrb.mxu0 %v1771_v3 }
 0x70c   :  { %1171 = vmatpush.msrb.mxu0 %v1780_v6 }
 0x782   :  { %v581_v16 = vpop.f32.mrf.mxu0 }
 0x783   :  { %v604_v17 = vadd.f32 %v581_v16, %v1928_v41  ;;  %v584_v20 = vadd.f32 %v581_v16, %v142_v19 }
 0x785   :  { %606 = vrot.lane.b32.xlu1 %v604_v17, %s1704_s9  ;;  %v1537_v21 = vmul.f32 -1.442695, %v584_v20 }
 0x787   :  { %1605 = vpow2.f32 %v1537_v21 }
 0x78d   :  { %v1606_v23 = vpop.eup %1605 }
 0x78e   :  { %v588_v24 = vadd.f32 1.0, %v1606_v23 }
 0x790   :  { %1607 = vrcp.f32 %v588_v24  ;;  %v600_v30 = vand.u32 2147483648, %v588_v24  ;;  %vm594_vm5 = vweird.f32 %v588_v24  ;;  %v598_v33 = vand.u32 2147483647, %v588_v24 }
 0x792   :  { %v601_v35 = vor.u32 1.1754944e-38, %v600_v30  ;;  %vm599_vm7 = vcmp.eq.f32.partialorder %v598_v33, 8.507059e+37 }
 0x796   :  { %v1608_v25 = vpop.eup %1607 }
 0x797   :  { %v590_v26 = vmul.f32 %v1608_v25, %v588_v24  ;;  %vm595_vm4 = vweird.f32 %v1608_v25 }
 0x798   :  { %vm596_vm6 = vmor %vm594_vm5, %vm595_vm4 }
 0x799   :  { %v591_v27 = vsub.f32 1.0, %v590_v26 }
 0x79b   :  { %v592_v28 = vmul.f32 %v1608_v25, %v591_v27 }
 0x79d   :  { %v593_v29 = vadd.f32 %v1608_v25, %v592_v28 }
 0x79f   :  { %v597_v34 = vsel %vm596_vm6, %v1608_v25, %v593_v29 }
 0x7a0   :  { %v602_v37 = vsel %vm599_vm7, %v601_v35, %v597_v34 }
 0x7a1   :  { %v616_v43 = vsub.f32 1.0, %v602_v37  ;;  %v622_v46 = vmul.f32 %v602_v37, %v1980_v31 }
 0x7f7   :  { %v607_v36 = vpop.permute.xlu1 %606 }
 0x7f8   :  { %v609_v38 = vmul.f32 %v607_v36, %v602_v37  ;;  %v143_v37 = vrot.slane %v1949_v52, 6 }
 0x7fa   :  { %611 = vrot.lane.b32.xlu2 %v609_v38, %s1704_s9 }
 0x854   :  { %v612_v39 = vpop.permute.xlu2 %611 }
 0x855   :  { %v614_v40 = vadd.f32 %v612_v39, %v142_v19 }
 0x857   :  { %1609 = vtanh.f32 %v614_v40 }
 0x85d   :  { %v1610_v42 = vpop.eup %1609 }
 0x85e   :  { %618 = vrot.lane.b32.xlu0 %v1610_v42, %s1706_s3 }
 0x8d0   :  { %v619_v45 = vpop.permute.xlu0 %618 }
 0x8d1   :  { %v621_v47 = vmul.f32 %v619_v45, %v616_v43 }
 0x8d3   :  { %v2018_v48 = vadd.f32 %v622_v46, %v621_v47 }
 0x8d5   :  { %625 = vst [vmem:[#allocation1] ss:$4 sm:$0xff] %v2018_v48 }
 0x8dc   :  { %v2021_v51 = vld.sshfl [vmem:[#allocation1] sm:$0xff pattern:$0x73625140] }
 0x8dd   :  { %632 = vst [vmem:[#allocation1] ss:$4 sm:$0xff] %v1998_v11 }
 0x8e4   :  { %v633_v53 = vld.sshfl [vmem:[#allocation1] sm:$0xff pattern:$0x73625140] }
 0x8e5   :  { %634 = vrot.lane.b32.xlu1 %v633_v53, %s1706_s3 }
 0x957   :  { %v635_v54 = vpop.permute.xlu1 %634 }
 0x958   :  { %1539 = vmatmul.msk.f32.vlgmr.msrb.gmra.mxu1 %vm111_vm1, %v635_v54 }
 0x959   :  { %1242 = vmatpush.msrb.mxu1 %v1789_v8 }
 0x95b   :  { %1243 = vmatpush.msrb.mxu1 %v1798_v10 }
 0x95d   :  { %1244 = vmatpush.msrb.mxu1 %v1817_v15 }
 0x95f   :  { %1245 = vmatpush.msrb.mxu1 %v1830_v18 }
 0x9d5   :  { %v655_v31 = vpop.f32.mrf.mxu1 }
 0x9d6   :  { %v678_v58 = vadd.f32 %v655_v31, %v1932_v44  ;;  %v658_v60 = vadd.f32 %v655_v31, %v228_v59 }
 0x9d8   :  { %680 = vrot.lane.b32.xlu2 %v678_v58, %s1704_s9  ;;  %v1540_v61 = vmul.f32 -1.442695, %v658_v60 }
 0x9da   :  { %1611 = vpow2.f32 %v1540_v61 }
 0x9e0   :  { %v1612_v62 = vpop.eup %1611 }
 0x9e1   :  { %v662_v63 = vadd.f32 1.0, %v1612_v62 }
 0x9e3   :  { %1613 = vrcp.f32 %v662_v63  ;;  %v674_v13 = vand.u32 2147483648, %v662_v63  ;;  %vm668_vm9 = vweird.f32 %v662_v63  ;;  %v672_v14 = vand.u32 2147483647, %v662_v63 }
 0x9e5   :  { %v675_v17 = vor.u32 1.1754944e-38, %v674_v13  ;;  %vm673_vm11 = vcmp.eq.f32.partialorder %v672_v14, 8.507059e+37 }
 0x9e9   :  { %v1614_v2 = vpop.eup %1613 }
 0x9ea   :  { %v664_v4 = vmul.f32 %v1614_v2, %v662_v63  ;;  %vm669_vm8 = vweird.f32 %v1614_v2 }
 0x9eb   :  { %vm670_vm10 = vmor %vm668_vm9, %vm669_vm8 }
 0x9ec   :  { %v665_v5 = vsub.f32 1.0, %v664_v4 }
 0x9ee   :  { %v666_v7 = vmul.f32 %v1614_v2, %v665_v5 }
 0x9f0   :  { %v667_v9 = vadd.f32 %v1614_v2, %v666_v7 }
 0x9f2   :  { %v671_v16 = vsel %vm670_vm10, %v1614_v2, %v667_v9 }
 0x9f3   :  { %v676_v20 = vsel %vm673_vm11, %v675_v17, %v671_v16 }
 0x9f4   :  { %v690_v26 = vsub.f32 1.0, %v676_v20  ;;  %v696_v28 = vmul.f32 %v676_v20, %v1998_v11 }
 0xa32   :  { %v681_v19 = vpop.permute.xlu2 %680 }
 0xa33   :  { %v683_v21 = vmul.f32 %v681_v19, %v676_v20 }
 0xa35   :  { %685 = vrot.lane.b32.xlu0 %v683_v21, %s1704_s9 }
 0xaa7   :  { %v686_v23 = vpop.permute.xlu0 %685 }
 0xaa8   :  { %v688_v24 = vadd.f32 %v686_v23, %v228_v59 }
 0xaaa   :  { %1615 = vtanh.f32 %v688_v24 }
 0xab0   :  { %v1616_v25 = vpop.eup %1615 }
 0xab1   :  { %692 = vrot.lane.b32.xlu1 %v1616_v25, %s1706_s3 }
 0xb23   :  { %v693_v27 = vpop.permute.xlu1 %692 }
 0xb24   :  { %v695_v29 = vmul.f32 %v693_v27, %v690_v26 }
 0xb26   :  { %v2036_v30 = vadd.f32 %v696_v28, %v695_v29 }
 0xb28   :  { %699 = vst [vmem:[#allocation1] ss:$4 sm:$0xff] %v2036_v30 }
 0xb2f   :  { %v2039_v33 = vld.sshfl [vmem:[#allocation1] sm:$0xff pattern:$0x73625140] }
 0xb30   :  { %706 = vst [vmem:[#allocation1] ss:$4 sm:$0xff] %v2018_v48 }
 0xb37   :  { %v707_v34 = vld.sshfl [vmem:[#allocation1] sm:$0xff pattern:$0x73625140] }
 0xb38   :  { %708 = vrot.lane.b32.xlu2 %v707_v34, %s1706_s3 }
 0xb92   :  { %v709_v35 = vpop.permute.xlu2 %708 }
 0xb93   :  { %1542 = vmatmul.msk.f32.vlgmr.msra.gmra.mxu2 %vm111_vm1, %v709_v35 }
 0xb94   :  { %1316 = vmatpush.msra.mxu2 %v1757_v0 }
 0xb96   :  { %1317 = vmatpush.msra.mxu2 %v1762_v1 }
 0xb98   :  { %1318 = vmatpush.msra.mxu2 %v1771_v3 }
 0xb9a   :  { %1319 = vmatpush.msra.mxu2 %v1780_v6 }
 0xc16   :  { %v729_v11 = vpop.f32.mrf.mxu2 }
 0xc17   :  { %v752_v36 = vadd.f32 %v729_v11, %v1928_v41  ;;  %v732_v38 = vadd.f32 %v729_v11, %v143_v37 }
 0xc19   :  { %754 = vrot.lane.b32.xlu0 %v752_v36, %s1704_s9  ;;  %v1543_v39 = vmul.f32 -1.442695, %v732_v38 }
 0xc1b   :  { %1617 = vpow2.f32 %v1543_v39 }
 0xc21   :  { %v1618_v40 = vpop.eup %1617 }
 0xc22   :  { %v736_v42 = vadd.f32 1.0, %v1618_v40 }
 0xc24   :  { %1619 = vrcp.f32 %v736_v42  ;;  %v748_v6 = vand.u32 2147483648, %v736_v42  ;;  %vm742_vm13 = vweird.f32 %v736_v42  ;;  %v746_v46 = vand.u32 2147483647, %v736_v42 }
 0xc26   :  { %v749_v53 = vor.u32 1.1754944e-38, %v748_v6  ;;  %vm747_vm15 = vcmp.eq.f32.partialorder %v746_v46, 8.507059e+37 }
 0xc2a   :  { %v1620_v0 = vpop.eup %1619 }
 0xc2b   :  { %v738_v43 = vmul.f32 %v1620_v0, %v736_v42  ;;  %vm743_vm12 = vweird.f32 %v1620_v0 }
 0xc2c   :  { %vm744_vm14 = vmor %vm742_vm13, %vm743_vm12 }
 0xc2d   :  { %v739_v1 = vsub.f32 1.0, %v738_v43 }
 0xc2f   :  { %v740_v45 = vmul.f32 %v1620_v0, %v739_v1 }
 0xc31   :  { %v741_v3 = vadd.f32 %v1620_v0, %v740_v45 }
 0xc33   :  { %v745_v47 = vsel %vm744_vm14, %v1620_v0, %v741_v3 }
 0xc34   :  { %v750_v54 = vsel %vm747_vm15, %v749_v53, %v745_v47 }
 0xc35   :  { %v764_v61 = vsub.f32 1.0, %v750_v54  ;;  %v770_v63 = vmul.f32 %v750_v54, %v2018_v48 }
 0xc8b   :  { %v755_v52 = vpop.permute.xlu0 %754 }
 0xc8c   :  { %v757_v31 = vmul.f32 %v755_v52, %v750_v54 }
 0xc8e   :  { %759 = vrot.lane.b32.xlu1 %v757_v31, %s1704_s9 }
 0xd00   :  { %v760_v58 = vpop.permute.xlu1 %759 }
 0xd01   :  { %v762_v59 = vadd.f32 %v760_v58, %v143_v37 }
 0xd03   :  { %1621 = vtanh.f32 %v762_v59 }
 0xd09   :  { %v1622_v60 = vpop.eup %1621 }
 0xd0a   :  { %766 = vrot.lane.b32.xlu2 %v1622_v60, %s1706_s3 }
 0xd64   :  { %v767_v62 = vpop.permute.xlu2 %766 }
 0xd65   :  { %v769_v2 = vmul.f32 %v767_v62, %v764_v61 }
 0xd67   :  { %v2054_v4 = vadd.f32 %v770_v63, %v769_v2 }
 0xd69   :  { %773 = vst [vmem:[#allocation1] ss:$4 sm:$0xff] %v2054_v4 }
 0xd70   :  { %v2057_v5 = vld.sshfl [vmem:[#allocation1] sm:$0xff pattern:$0x73625140] }
 0xd71   :  { %780 = vst [vmem:[#allocation1] ss:$4 sm:$0xff] %v2036_v30 }
 0xd78   :  { %v781_v7 = vld.sshfl [vmem:[#allocation1] sm:$0xff pattern:$0x73625140] }
 0xd79   :  { %782 = vrot.lane.b32.xlu0 %v781_v7, %s1706_s3 }
 0xdeb   :  { %v783_v9 = vpop.permute.xlu0 %782 }
 0xdec   :  { %1545 = vmatmul.msk.f32.vlgmr.msra.gmra.mxu3 %vm111_vm1, %v783_v9 }
 0xded   :  { %1390 = vmatpush.msra.mxu3 %v1789_v8 }
 0xdef   :  { %1391 = vmatpush.msra.mxu3 %v1798_v10 }
 0xdf1   :  { %1392 = vmatpush.msra.mxu3 %v1817_v15 }
 0xdf3   :  { %1393 = vmatpush.msra.mxu3 %v1830_v18 }
 0xe6f   :  { %v803_v48 = vpop.f32.mrf.mxu3 }
 0xe70   :  { %v826_v13 = vadd.f32 %v803_v48, %v1932_v44  ;;  %v806_v14 = vadd.f32 %v803_v48, %v1952_v55 }
 0xe72   :  { %828 = vrot.lane.b32.xlu1 %v826_v13, %s1704_s9  ;;  %v1546_v16 = vmul.f32 -1.442695, %v806_v14 }
 0xe74   :  { %1623 = vpow2.f32 %v1546_v16 }
 0xe7a   :  { %v1624_v17 = vpop.eup %1623 }
 0xe7b   :  { %v810_v19 = vadd.f32 1.0, %v1624_v17 }
 0xe7d   :  { %1625 = vrcp.f32 %v810_v19  ;;  %v822_v15 = vand.u32 2147483648, %v810_v19  ;;  %vm816_vm3 = vweird.f32 %v810_v19  ;;  %v820_v18 = vand.u32 2147483647, %v810_v19 }
 0xe7f   :  { %v823_v25 = vor.u32 1.1754944e-38, %v822_v15  ;;  %vm821_vm5 = vcmp.eq.f32.partialorder %v820_v18, 8.507059e+37 }
 0xe83   :  { %v1626_v20 = vpop.eup %1625 }
 0xe84   :  { %v812_v8 = vmul.f32 %v1626_v20, %v810_v19  ;;  %vm817_vm2 = vweird.f32 %v1626_v20 }
 0xe85   :  { %vm818_vm4 = vmor %vm816_vm3, %vm817_vm2 }
 0xe86   :  { %v813_v21 = vsub.f32 1.0, %v812_v8 }
 0xe88   :  { %v814_v10 = vmul.f32 %v1626_v20, %v813_v21 }
 0xe8a   :  { %v815_v23 = vadd.f32 %v1626_v20, %v814_v10 }
 0xe8c   :  { %v819_v24 = vsel %vm818_vm4, %v1626_v20, %v815_v23 }
 0xe8d   :  { %v824_v27 = vsel %vm821_vm5, %v823_v25, %v819_v24 }
 0xe8e   :  { %v838_v11 = vsub.f32 1.0, %v824_v27  ;;  %v844_v37 = vmul.f32 %v824_v27, %v2036_v30  ;;  %v2085_v30 = vadd.f32 %v1946_v50, %v2010_v56 }
 0xee4   :  { %v829_v26 = vpop.permute.xlu1 %828 }
 0xee5   :  { %v831_v28 = vmul.f32 %v829_v26, %v824_v27 }
 0xee7   :  { %833 = vrot.lane.b32.xlu2 %v831_v28, %s1704_s9 }
 0xf41   :  { %v834_v29 = vpop.permute.xlu2 %833 }
 0xf42   :  { %v836_v34 = vadd.f32 %v834_v29, %v1952_v55 }
 0xf44   :  { %1627 = vtanh.f32 %v836_v34 }
 0xf4a   :  { %v1628_v35 = vpop.eup %1627 }
 0xf4b   :  { %840 = vrot.lane.b32.xlu0 %v1628_v35, %s1706_s3 }
 0xfbd   :  { %v841_v36 = vpop.permute.xlu0 %840 }
 0xfbe   :  { %v843_v38 = vmul.f32 %v841_v36, %v838_v11 }
 0xfc0   :  { %v2073_v39 = vadd.f32 %v844_v37, %v843_v38 }
 0xfc2   :  { %847 = vst [vmem:[#allocation1] ss:$4 sm:$0xff] %v2073_v39 }
 0xfc9   :  { %v2076_v40 = vld.sshfl [vmem:[#allocation1] sm:$0xff pattern:$0x73625140] }
 0xfca   :  { %854 = vst [vmem:[#allocation1] ss:$4 sm:$0xff] %v2054_v4 }
 0xfd1   :  { %v855_v42 = vld.sshfl [vmem:[#allocation1] sm:$0xff pattern:$0x73625140] }
 0xfd2   :  { %856 = vrot.lane.b32.xlu1 %v855_v42, %s1706_s3 }
0x1044   :  { %v857_v55 = vpop.permute.xlu1 %856 }
0x1045   :  { %1548 = vmatmul.msk.f32.vlgmr.msra.gmra.mxu0 %vm111_vm1, %v857_v55 }
0x10c2   :  { %v877_v0 = vpop.f32.mrf.mxu0 }
0x10c3   :  { %v900_v43 = vadd.f32 %v877_v0, %v1928_v41  ;;  %v880_v1 = vadd.f32 %v877_v0, %v2085_v30 }
0x10c5   :  { %902 = vrot.lane.b32.xlu2 %v900_v43, %s1704_s9  ;;  %v1549_v45 = vmul.f32 -1.442695, %v880_v1 }
0x10c7   :  { %1629 = vpow2.f32 %v1549_v45 }
0x10cd   :  { %v1630_v3 = vpop.eup %1629 }
0x10ce   :  { %v884_v6 = vadd.f32 1.0, %v1630_v3 }
0x10d0   :  { %1631 = vrcp.f32 %v884_v6  ;;  %v896_v31 = vand.u32 2147483648, %v884_v6  ;;  %vm890_vm7 = vweird.f32 %v884_v6  ;;  %v894_v58 = vand.u32 2147483647, %v884_v6 }
0x10d2   :  { %v897_v50 = vor.u32 1.1754944e-38, %v896_v31  ;;  %vm895_vm9 = vcmp.eq.f32.partialorder %v894_v58, 8.507059e+37 }
0x10d6   :  { %v1632_v46 = vpop.eup %1631 }
0x10d7   :  { %v886_v47 = vmul.f32 %v1632_v46, %v884_v6  ;;  %vm891_vm6 = vweird.f32 %v1632_v46 }
0x10d8   :  { %vm892_vm8 = vmor %vm890_vm7, %vm891_vm6 }
0x10d9   :  { %v887_v53 = vsub.f32 1.0, %v886_v47 }
0x10db   :  { %v888_v52 = vmul.f32 %v1632_v46, %v887_v53 }
0x10dd   :  { %v889_v54 = vadd.f32 %v1632_v46, %v888_v52 }
0x10df   :  { %v893_v59 = vsel %vm892_vm8, %v1632_v46, %v889_v54 }
0x10e0   :  { %v898_v60 = vsel %vm895_vm9, %v897_v50, %v893_v59 }
0x10e1   :  { %v912_v7 = vsub.f32 1.0, %v898_v60  ;;  %v918_v48 = vmul.f32 %v898_v60, %v2054_v4  ;;  %v227_v4 = vrot.slane %v1939_v49, 6 }
0x111f   :  { %v903_v56 = vpop.permute.xlu2 %902 }
0x1120   :  { %v905_v61 = vmul.f32 %v903_v56, %v898_v60 }
0x1122   :  { %907 = vrot.lane.b32.xlu0 %v905_v61, %s1704_s9 }
0x1194   :  { %v908_v62 = vpop.permute.xlu0 %907 }
0x1195   :  { %v910_v63 = vadd.f32 %v908_v62, %v2085_v30 }
0x1197   :  { %1633 = vtanh.f32 %v910_v63 }
0x119d   :  { %v1634_v2 = vpop.eup %1633 }
0x119e   :  { %914 = vrot.lane.b32.xlu1 %v1634_v2, %s1706_s3 }
0x1210   :  { %v915_v9 = vpop.permute.xlu1 %914 }
0x1211   :  { %v917_v13 = vmul.f32 %v915_v9, %v912_v7 }
0x1213   :  { %v2092_v14 = vadd.f32 %v918_v48, %v917_v13 }
0x1215   :  { %921 = vst [vmem:[#allocation1] ss:$4 sm:$0xff] %v2092_v14 }
0x121c   :  { %v2095_v16 = vld.sshfl [vmem:[#allocation1] sm:$0xff pattern:$0x73625140] }
0x121d   :  { %928 = vst [vmem:[#allocation1] ss:$4 sm:$0xff] %v2073_v39 }
0x1224   :  { %v929_v17 = vld.sshfl [vmem:[#allocation1] sm:$0xff pattern:$0x73625140] }
0x1225   :  { %930 = vrot.lane.b32.xlu2 %v929_v17, %s1706_s3 }
0x127f   :  { %v931_v19 = vpop.permute.xlu2 %930 }
0x1280   :  { %1551 = vmatmul.msk.f32.vlgmr.msra.gmra.mxu1 %vm111_vm1, %v931_v19 }
0x12fd   :  { %v951_v20 = vpop.f32.mrf.mxu1 }
0x12fe   :  { %v974_v8 = vadd.f32 %v951_v20, %v1932_v44  ;;  %v954_v21 = vadd.f32 %v951_v20, %v227_v4 }
0x1300   :  { %976 = vrot.lane.b32.xlu0 %v974_v8, %s1704_s9  ;;  %v1552_v10 = vmul.f32 -1.442695, %v954_v21 }
0x1302   :  { %1635 = vpow2.f32 %v1552_v10 }
0x1308   :  { %v1636_v23 = vpop.eup %1635 }
0x1309   :  { %v958_v15 = vadd.f32 1.0, %v1636_v23 }
0x130b   :  { %1637 = vrcp.f32 %v958_v15  ;;  %v970_v28 = vand.u32 2147483648, %v958_v15  ;;  %vm964_vm11 = vweird.f32 %v958_v15  ;;  %v968_v29 = vand.u32 2147483647, %v958_v15 }
0x130d   :  { %v971_v35 = vor.u32 1.1754944e-38, %v970_v28  ;;  %vm969_vm13 = vcmp.eq.f32.partialorder %v968_v29, 8.507059e+37 }
0x1311   :  { %v1638_v18 = vpop.eup %1637 }
0x1312   :  { %v960_v24 = vmul.f32 %v1638_v18, %v958_v15  ;;  %vm965_vm10 = vweird.f32 %v1638_v18 }
0x1313   :  { %vm966_vm12 = vmor %vm964_vm11, %vm965_vm10 }
0x1314   :  { %v961_v25 = vsub.f32 1.0, %v960_v24 }
0x1316   :  { %v962_v26 = vmul.f32 %v1638_v18, %v961_v25 }
0x1318   :  { %v963_v27 = vadd.f32 %v1638_v18, %v962_v26 }
0x131a   :  { %v967_v34 = vsel %vm966_vm12, %v1638_v18, %v963_v27 }
0x131b   :  { %v972_v36 = vsel %vm969_vm13, %v971_v35, %v967_v34 }
0x131c   :  { %v986_v0 = vsub.f32 1.0, %v972_v36  ;;  %v992_v1 = vmul.f32 %v972_v36, %v2073_v39  ;;  %v144_v39 = vrot.slane %v2085_v30, 2 }
0x1372   :  { %v977_v11 = vpop.permute.xlu0 %976 }
0x1373   :  { %v979_v37 = vmul.f32 %v977_v11, %v972_v36 }
0x1375   :  { %981 = vrot.lane.b32.xlu1 %v979_v37, %s1704_s9 }
0x13e7   :  { %v982_v38 = vpop.permute.xlu1 %981 }
0x13e8   :  { %v984_v42 = vadd.f32 %v982_v38, %v227_v4 }
0x13ea   :  { %1639 = vtanh.f32 %v984_v42 }
0x13f0   :  { %v1640_v55 = vpop.eup %1639 }
0x13f1   :  { %988 = vrot.lane.b32.xlu2 %v1640_v55, %s1706_s3 }
0x144b   :  { %v989_v43 = vpop.permute.xlu2 %988 }
0x144c   :  { %v991_v45 = vmul.f32 %v989_v43, %v986_v0 }
0x144e   :  { %v2106_v3 = vadd.f32 %v992_v1, %v991_v45 }
0x1450   :  { %995 = vst [vmem:[#allocation1] ss:$4 sm:$0xff] %v2106_v3 }
0x1457   :  { %v2109_v6 = vld.sshfl [vmem:[#allocation1] sm:$0xff pattern:$0x73625140] }
0x1458   :  { %1002 = vst [vmem:[#allocation1] ss:$4 sm:$0xff] %v2092_v14 }
0x145f   :  { %v1003_v46 = vld.sshfl [vmem:[#allocation1] sm:$0xff pattern:$0x73625140] }
0x1460   :  { %1004 = vrot.lane.b32.xlu0 %v1003_v46, %s1706_s3 }
0x14d2   :  { %v1005_v47 = vpop.permute.xlu0 %1004 }
0x14d3   :  { %1554 = vmatmul.msk.f32.vlgmr.msrb.gmra.mxu2 %vm111_vm1, %v1005_v47 }
0x1556   :  { %v1025_v53 = vpop.f32.mrf.mxu2 }
0x1557   :  { %v1048_v52 = vadd.f32 %v1025_v53, %v1928_v41  ;;  %v1028_v54 = vadd.f32 %v1025_v53, %v144_v39 }
0x1559   :  { %1050 = vrot.lane.b32.xlu1 %v1048_v52, %s1704_s9  ;;  %v1555_v31 = vmul.f32 -1.442695, %v1028_v54 }
0x155b   :  { %1641 = vpow2.f32 %v1555_v31 }
0x1561   :  { %v1642_v58 = vpop.eup %1641 }
0x1562   :  { %v1032_v59 = vadd.f32 1.0, %v1642_v58 }
0x1564   :  { %1643 = vrcp.f32 %v1032_v59  ;;  %v1044_v63 = vand.u32 2147483648, %v1032_v59  ;;  %vm1038_vm15 = vweird.f32 %v1032_v59  ;;  %v1042_v2 = vand.u32 2147483647, %v1032_v59 }
0x1566   :  { %v1045_v9 = vor.u32 1.1754944e-38, %v1044_v63  ;;  %vm1043_vm3 = vcmp.eq.f32.partialorder %v1042_v2, 8.507059e+37 }
0x156a   :  { %v1644_v50 = vpop.eup %1643 }
0x156b   :  { %v1034_v56 = vmul.f32 %v1644_v50, %v1032_v59  ;;  %vm1039_vm14 = vweird.f32 %v1644_v50 }
0x156c   :  { %vm1040_vm2 = vmor %vm1038_vm15, %vm1039_vm14 }
0x156d   :  { %v1035_v60 = vsub.f32 1.0, %v1034_v56 }
0x156f   :  { %v1036_v61 = vmul.f32 %v1644_v50, %v1035_v60 }
0x1571   :  { %v1037_v62 = vadd.f32 %v1644_v50, %v1036_v61 }
0x1573   :  { %v1041_v7 = vsel %vm1040_vm2, %v1644_v50, %v1037_v62 }
0x1574   :  { %v1046_v13 = vsel %vm1043_vm3, %v1045_v9, %v1041_v7 }
0x1575   :  { %v1060_v4 = vsub.f32 1.0, %v1046_v13  ;;  %v1066_v10 = vmul.f32 %v1046_v13, %v2092_v14  ;;  %v226_v14 = vrot.slane %v1939_v49, 4 }
0x15cb   :  { %v1051_v48 = vpop.permute.xlu1 %1050 }
0x15cc   :  { %v1053_v17 = vmul.f32 %v1051_v48, %v1046_v13 }
0x15ce   :  { %1055 = vrot.lane.b32.xlu2 %v1053_v17, %s1704_s9 }
0x1628   :  { %v1056_v19 = vpop.permute.xlu2 %1055 }
0x1629   :  { %v1058_v20 = vadd.f32 %v1056_v19, %v144_v39 }
0x162b   :  { %1645 = vtanh.f32 %v1058_v20 }
0x1631   :  { %v1646_v8 = vpop.eup %1645 }
0x1632   :  { %1062 = vrot.lane.b32.xlu0 %v1646_v8, %s1706_s3 }
0x16a4   :  { %v1063_v21 = vpop.permute.xlu0 %1062 }
0x16a5   :  { %v1065_v23 = vmul.f32 %v1063_v21, %v1060_v4 }
0x16a7   :  { %v2120_v15 = vadd.f32 %v1066_v10, %v1065_v23 }
0x16a9   :  { %1069 = vst [vmem:[#allocation1] ss:$4 sm:$0xff] %v2120_v15 }
0x16b0   :  { %v2123_v18 = vld.sshfl [vmem:[#allocation1] sm:$0xff pattern:$0x73625140] }
0x16b1   :  { %1076 = vst [vmem:[#allocation1] ss:$4 sm:$0xff] %v2106_v3 }
0x16b8   :  { %v1077_v24 = vld.sshfl [vmem:[#allocation1] sm:$0xff pattern:$0x73625140] }
0x16b9   :  { %1078 = vrot.lane.b32.xlu1 %v1077_v24, %s1706_s3 }
0x172b   :  { %v1079_v25 = vpop.permute.xlu1 %1078 }
0x172c   :  { %1557 = vmatmul.msk.f32.vlgmr.msrb.gmra.mxu3 %vm111_vm1, %v1079_v25 }
0x17af   :  { %v1099_v26 = vpop.f32.mrf.mxu3 }
0x17b0   :  { %v1122_v27 = vadd.f32 %v1099_v26, %v1932_v44  ;;  %v1102_v28 = vadd.f32 %v1099_v26, %v226_v14 }
0x17b2   :  { %1124 = vrot.lane.b32.xlu2 %v1122_v27, %s1704_s9  ;;  %v1558_v29 = vmul.f32 -1.442695, %v1102_v28 }
0x17b4   :  { %1647 = vpow2.f32 %v1558_v29 }
0x17ba   :  { %v1648_v34 = vpop.eup %1647 }
0x17bb   :  { %v1106_v35 = vadd.f32 1.0, %v1648_v34 }
0x17bd   :  { %1649 = vrcp.f32 %v1106_v35  ;;  %v1118_v55 = vand.u32 2147483648, %v1106_v35  ;;  %vm1112_vm5 = vweird.f32 %v1106_v35  ;;  %v1116_v0 = vand.u32 2147483647, %v1106_v35 }
0x17bf   :  { %v1119_v1 = vor.u32 1.1754944e-38, %v1118_v55  ;;  %vm1117_vm7 = vcmp.eq.f32.partialorder %v1116_v0, 8.507059e+37 }
0x17c3   :  { %v1650_v11 = vpop.eup %1649 }
0x17c4   :  { %v1108_v36 = vmul.f32 %v1650_v11, %v1106_v35  ;;  %vm1113_vm4 = vweird.f32 %v1650_v11 }
0x17c5   :  { %vm1114_vm6 = vmor %vm1112_vm5, %vm1113_vm4 }
0x17c6   :  { %v1109_v37 = vsub.f32 1.0, %v1108_v36 }
0x17c8   :  { %v1110_v38 = vmul.f32 %v1650_v11, %v1109_v37 }
0x17ca   :  { %v1111_v42 = vadd.f32 %v1650_v11, %v1110_v38 }
0x17cc   :  { %v1115_v43 = vsel %vm1114_vm6, %v1650_v11, %v1111_v42 }
0x17cd   :  { %v1120_v46 = vsel %vm1117_vm7, %v1119_v1, %v1115_v43 }
0x17ce   :  { %v1134_v54 = vsub.f32 1.0, %v1120_v46  ;;  %v1140_v58 = vmul.f32 %v1120_v46, %v2106_v3  ;;  %v145_v3 = vrot.slane %v2085_v30, 4 }
0x180c   :  { %v1125_v45 = vpop.permute.xlu2 %1124 }
0x180d   :  { %v1127_v47 = vmul.f32 %v1125_v45, %v1120_v46 }
0x180f   :  { %1129 = vrot.lane.b32.xlu0 %v1127_v47, %s1704_s9 }
0x1881   :  { %v1130_v53 = vpop.permute.xlu0 %1129 }
0x1882   :  { %v1132_v52 = vadd.f32 %v1130_v53, %v226_v14 }
0x1884   :  { %1651 = vtanh.f32 %v1132_v52 }
0x188a   :  { %v1652_v39 = vpop.eup %1651 }
0x188b   :  { %1136 = vrot.lane.b32.xlu1 %v1652_v39, %s1706_s3 }
0x18fd   :  { %v1137_v31 = vpop.permute.xlu1 %1136 }
0x18fe   :  { %v1139_v59 = vmul.f32 %v1137_v31, %v1134_v54 }
0x1900   :  { %v2134_v50 = vadd.f32 %v1140_v58, %v1139_v59 }
0x1902   :  { %1143 = vst [vmem:[#allocation1] ss:$4 sm:$0xff] %v2134_v50 }
0x1909   :  { %v2137_v56 = vld.sshfl [vmem:[#allocation1] sm:$0xff pattern:$0x73625140] }
0x190a   :  { %1150 = vst [vmem:[#allocation1] ss:$4 sm:$0xff] %v2120_v15 }
0x1911   :  { %v1151_v60 = vld.sshfl [vmem:[#allocation1] sm:$0xff pattern:$0x73625140] }
0x1912   :  { %1152 = vrot.lane.b32.xlu2 %v1151_v60, %s1706_s3 }
0x196c   :  { %v1153_v61 = vpop.permute.xlu2 %1152 }
0x196d   :  { %1560 = vmatmul.msk.f32.vlgmr.msrb.gmra.mxu0 %vm111_vm1, %v1153_v61 }
0x19ea   :  { %v1173_v62 = vpop.f32.mrf.mxu0 }
0x19eb   :  { %v1196_v63 = vadd.f32 %v1173_v62, %v1928_v41  ;;  %v1176_v2 = vadd.f32 %v1173_v62, %v145_v3 }
0x19ed   :  { %1198 = vrot.lane.b32.xlu0 %v1196_v63, %s1704_s9  ;;  %v1561_v7 = vmul.f32 -1.442695, %v1176_v2 }
0x19ef   :  { %1653 = vpow2.f32 %v1561_v7 }
0x19f5   :  { %v1654_v9 = vpop.eup %1653 }
0x19f6   :  { %v1180_v48 = vadd.f32 1.0, %v1654_v9 }
0x19f8   :  { %1655 = vrcp.f32 %v1180_v48  ;;  %v1192_v4 = vand.u32 2147483648, %v1180_v48  ;;  %vm1186_vm9 = vweird.f32 %v1180_v48  ;;  %v1190_v21 = vand.u32 2147483647, %v1180_v48 }
0x19fa   :  { %v1193_v23 = vor.u32 1.1754944e-38, %v1192_v4  ;;  %vm1191_vm11 = vcmp.eq.f32.partialorder %v1190_v21, 8.507059e+37 }
0x19fe   :  { %v1656_v13 = vpop.eup %1655 }
0x19ff   :  { %v1182_v17 = vmul.f32 %v1656_v13, %v1180_v48  ;;  %vm1187_vm8 = vweird.f32 %v1656_v13 }
0x1a00   :  { %vm1188_vm10 = vmor %vm1186_vm9, %vm1187_vm8 }
0x1a01   :  { %v1183_v19 = vsub.f32 1.0, %v1182_v17 }
0x1a03   :  { %v1184_v20 = vmul.f32 %v1656_v13, %v1183_v19 }
0x1a05   :  { %v1185_v8 = vadd.f32 %v1656_v13, %v1184_v20 }
0x1a07   :  { %v1189_v10 = vsel %vm1188_vm10, %v1656_v13, %v1185_v8 }
0x1a08   :  { %v1194_v25 = vsel %vm1191_vm11, %v1193_v23, %v1189_v10 }
0x1a09   :  { %v1208_v29 = vsub.f32 1.0, %v1194_v25  ;;  %v1214_v35 = vmul.f32 %v1194_v25, %v2120_v15  ;;  %v225_v15 = vrot.slane %v1939_v49, 2 }
0x1a5f   :  { %v1199_v24 = vpop.permute.xlu0 %1198 }
0x1a60   :  { %v1201_v26 = vmul.f32 %v1199_v24, %v1194_v25 }
0x1a62   :  { %1203 = vrot.lane.b32.xlu1 %v1201_v26, %s1704_s9 }
0x1ad4   :  { %v1204_v27 = vpop.permute.xlu1 %1203 }
0x1ad5   :  { %v1206_v14 = vadd.f32 %v1204_v27, %v145_v3 }
0x1ad7   :  { %1657 = vtanh.f32 %v1206_v14 }
0x1add   :  { %v1658_v28 = vpop.eup %1657 }
0x1ade   :  { %1210 = vrot.lane.b32.xlu2 %v1658_v28, %s1706_s3 }
0x1b38   :  { %v1211_v34 = vpop.permute.xlu2 %1210 }
0x1b39   :  { %v1213_v11 = vmul.f32 %v1211_v34, %v1208_v29 }
0x1b3b   :  { %v2148_v36 = vadd.f32 %v1214_v35, %v1213_v11 }
0x1b3d   :  { %1217 = vst [vmem:[#allocation1] ss:$4 sm:$0xff] %v2148_v36 }
0x1b44   :  { %v2151_v37 = vld.sshfl [vmem:[#allocation1] sm:$0xff pattern:$0x73625140] }
0x1b45   :  { %1224 = vst [vmem:[#allocation1] ss:$4 sm:$0xff] %v2134_v50 }
0x1b4c   :  { %v1225_v38 = vld.sshfl [vmem:[#allocation1] sm:$0xff pattern:$0x73625140] }
0x1b4d   :  { %1226 = vrot.lane.b32.xlu0 %v1225_v38, %s1706_s3 }
0x1bbf   :  { %v1227_v42 = vpop.permute.xlu0 %1226 }
0x1bc0   :  { %1563 = vmatmul.msk.f32.vlgmr.msrb.gmra.mxu1 %vm111_vm1, %v1227_v42 }
0x1c3d   :  { %v1247_v55 = vpop.f32.mrf.mxu1 }
0x1c3e   :  { %v1270_v0 = vadd.f32 %v1247_v55, %v1932_v44  ;;  %v1250_v43 = vadd.f32 %v1247_v55, %v225_v15 }
0x1c40   :  { %1272 = vrot.lane.b32.xlu1 %v1270_v0, %s1704_s9  ;;  %v1564_v1 = vmul.f32 -1.442695, %v1250_v43 }
0x1c42   :  { %1659 = vpow2.f32 %v1564_v1 }
0x1c48   :  { %v1660_v45 = vpop.eup %1659 }
0x1c49   :  { %v1254_v46 = vadd.f32 1.0, %v1660_v45 }
0x1c4b   :  { %1661 = vrcp.f32 %v1254_v46  ;;  %v1266_v31 = vand.u32 2147483648, %v1254_v46  ;;  %vm1260_vm13 = vweird.f32 %v1254_v46  ;;  %v1264_v58 = vand.u32 2147483647, %v1254_v46 }
0x1c4d   :  { %v1267_v60 = vor.u32 1.1754944e-38, %v1266_v31  ;;  %vm1265_vm15 = vcmp.eq.f32.partialorder %v1264_v58, 8.507059e+37 }
0x1c51   :  { %v1662_v47 = vpop.eup %1661 }
0x1c52   :  { %v1256_v53 = vmul.f32 %v1662_v47, %v1254_v46  ;;  %vm1261_vm12 = vweird.f32 %v1662_v47 }
0x1c53   :  { %vm1262_vm14 = vmor %vm1260_vm13, %vm1261_vm12 }
0x1c54   :  { %v1257_v52 = vsub.f32 1.0, %v1256_v53 }
0x1c56   :  { %v1258_v39 = vmul.f32 %v1662_v47, %v1257_v52 }
0x1c58   :  { %v1259_v54 = vadd.f32 %v1662_v47, %v1258_v39 }
0x1c5a   :  { %v1263_v59 = vsel %vm1262_vm14, %v1662_v47, %v1259_v54 }
0x1c5b   :  { %v1268_v62 = vsel %vm1265_vm15, %v1267_v60, %v1263_v59 }
0x1c5c   :  { %v1282_v9 = vsub.f32 1.0, %v1268_v62  ;;  %v1288_v13 = vmul.f32 %v1268_v62, %v2134_v50  ;;  %v146_v50 = vrot.slane %v2085_v30, 6 }
0x1cb2   :  { %v1273_v61 = vpop.permute.xlu1 %1272 }
0x1cb3   :  { %v1275_v63 = vmul.f32 %v1273_v61, %v1268_v62 }
0x1cb5   :  { %1277 = vrot.lane.b32.xlu2 %v1275_v63, %s1704_s9 }
0x1d0f   :  { %v1278_v3 = vpop.permute.xlu2 %1277 }
0x1d10   :  { %v1280_v2 = vadd.f32 %v1278_v3, %v225_v15 }
0x1d12   :  { %1663 = vtanh.f32 %v1280_v2 }
0x1d18   :  { %v1664_v7 = vpop.eup %1663 }
0x1d19   :  { %1284 = vrot.lane.b32.xlu0 %v1664_v7, %s1706_s3 }
0x1d8b   :  { %v1285_v48 = vpop.permute.xlu0 %1284 }
0x1d8c   :  { %v1287_v17 = vmul.f32 %v1285_v48, %v1282_v9 }
0x1d8e   :  { %v2162_v19 = vadd.f32 %v1288_v13, %v1287_v17 }
0x1d90   :  { %1291 = vst [vmem:[#allocation1] ss:$4 sm:$0xff] %v2162_v19 }
0x1d97   :  { %v2165_v20 = vld.sshfl [vmem:[#allocation1] sm:$0xff pattern:$0x73625140] }
0x1d98   :  { %1298 = vst [vmem:[#allocation1] ss:$4 sm:$0xff] %v2148_v36 }
0x1d9f   :  { %v1299_v8 = vld.sshfl [vmem:[#allocation1] sm:$0xff pattern:$0x73625140] }
0x1da0   :  { %1300 = vrot.lane.b32.xlu1 %v1299_v8, %s1706_s3 }
0x1e12   :  { %v1301_v4 = vpop.permute.xlu1 %1300 }
0x1e13   :  { %1566 = vmatmul.msk.f32.vlgmr.msra.gmra.mxu2 %vm111_vm1, %v1301_v4 }
0x1e96   :  { %v1321_v21 = vpop.f32.mrf.mxu2 }
0x1e97   :  { %v1344_v10 = vadd.f32 %v1321_v21, %v1928_v41  ;;  %v1324_v23 = vadd.f32 %v1321_v21, %v146_v50 }
0x1e99   :  { %1346 = vrot.lane.b32.xlu2 %v1344_v10, %s1704_s9  ;;  %v1567_v24 = vmul.f32 -1.442695, %v1324_v23 }
0x1e9b   :  { %1665 = vpow2.f32 %v1567_v24 }
0x1ea1   :  { %v1666_v25 = vpop.eup %1665 }
0x1ea2   :  { %v1328_v26 = vadd.f32 1.0, %v1666_v25 }
0x1ea4   :  { %1667 = vrcp.f32 %v1328_v26  ;;  %v1340_v35 = vand.u32 2147483648, %v1328_v26  ;;  %vm1334_vm3 = vweird.f32 %v1328_v26  ;;  %v1338_v11 = vand.u32 2147483647, %v1328_v26 }
0x1ea6   :  { %v1341_v38 = vor.u32 1.1754944e-38, %v1340_v35  ;;  %vm1339_vm5 = vcmp.eq.f32.partialorder %v1338_v11, 8.507059e+37 }
0x1eaa   :  { %v1668_v27 = vpop.eup %1667 }
0x1eab   :  { %v1330_v14 = vmul.f32 %v1668_v27, %v1328_v26  ;;  %vm1335_vm2 = vweird.f32 %v1668_v27 }
0x1eac   :  { %vm1336_vm4 = vmor %vm1334_vm3, %vm1335_vm2 }
0x1ead   :  { %v1331_v28 = vsub.f32 1.0, %v1330_v14 }
0x1eaf   :  { %v1332_v29 = vmul.f32 %v1668_v27, %v1331_v28 }
0x1eb1   :  { %v1333_v34 = vadd.f32 %v1668_v27, %v1332_v29 }
0x1eb3   :  { %v1337_v41 = vsel %vm1336_vm4, %v1668_v27, %v1333_v34 }
0x1eb4   :  { %v1342_v42 = vsel %vm1339_vm5, %v1341_v38, %v1337_v41 }
0x1eb5   :  { %v1356_v1 = vsub.f32 1.0, %v1342_v42  ;;  %v1362_v46 = vmul.f32 %v1342_v42, %v2148_v36 }
0x1ef3   :  { %v1347_v30 = vpop.permute.xlu2 %1346 }
0x1ef4   :  { %v1349_v55 = vmul.f32 %v1347_v30, %v1342_v42 }
0x1ef6   :  { %1351 = vrot.lane.b32.xlu0 %v1349_v55, %s1704_s9 }
0x1f68   :  { %v1352_v0 = vpop.permute.xlu0 %1351 }
0x1f69   :  { %v1354_v15 = vadd.f32 %v1352_v0, %v146_v50 }
0x1f6b   :  { %1669 = vtanh.f32 %v1354_v15 }
0x1f71   :  { %v1670_v43 = vpop.eup %1669 }
0x1f72   :  { %1358 = vrot.lane.b32.xlu1 %v1670_v43, %s1706_s3 }
0x1fe4   :  { %v1359_v45 = vpop.permute.xlu1 %1358 }
0x1fe5   :  { %v1361_v47 = vmul.f32 %v1359_v45, %v1356_v1 }
0x1fe7   :  { %v2176_v53 = vadd.f32 %v1362_v46, %v1361_v47 }
0x1fe9   :  { %1365 = vst [vmem:[#allocation1] ss:$4 sm:$0xff] %v2176_v53 }
0x1ff0   :  { %v1366_v52 = vld.sshfl [vmem:[#allocation1] sm:$0xff pattern:$0x73625140] }
0x1ff1   :  { %1372 = vst [vmem:[#allocation1] ss:$4 sm:$0xff] %v2162_v19 }
0x1ff8   :  { %v1373_v39 = vld.sshfl [vmem:[#allocation1] sm:$0xff pattern:$0x73625140] }
0x1ff9   :  { %1374 = vrot.lane.b32.xlu2 %v1373_v39, %s1706_s3 }
0x2053   :  { %v1375_v54 = vpop.permute.xlu2 %1374 }
0x2054   :  { %1569 = vmatmul.msk.f32.vlgmr.msra.gmra.mxu3 %vm111_vm1, %v1375_v54 }
0x20d7   :  { %v1395_v31 = vpop.f32.mrf.mxu3 }
0x20d8   :  { %v1418_v58 = vadd.f32 %v1395_v31, %v1932_v44  ;;  %v1398_v36 = vadd.f32 %v1395_v31, %v1939_v49 }
0x20da   :  { %1420 = vrot.lane.b32.xlu0 %v1418_v58, %s1704_s9  ;;  %v1570_v59 = vmul.f32 -1.442695, %v1398_v36 }
0x20dc   :  { %1671 = vpow2.f32 %v1570_v59 }
0x20e2   :  { %326 = vrot.lane.b32.xlu0 %v1964_v57, %s1706_s3  ;;  %v1672_v60 = vpop.eup %1671 }
0x20e3   :  { %v1402_v44 = vadd.f32 1.0, %v1672_v60 }
0x20e5   :  { %1673 = vrcp.f32 %v1402_v44  ;;  %vm1408_vm6 = vweird.f32 %v1402_v44  ;;  %v1412_v2 = vand.u32 2147483647, %v1402_v44 }
0x20e7   :  { %vm1413_vm8 = vcmp.eq.f32.partialorder %v1412_v2, 8.507059e+37 }
0x20ea   :  { %553 = vrot.lane.b32.xlu0 %v2001_v12, %s1706_s3  ;;  %v1414_v12 = vand.u32 2147483648, %v1402_v44 }
0x20eb   :  { %v1674_v61 = vpop.eup %1673 }
0x20ec   :  { %v1404_v62 = vmul.f32 %v1674_v61, %v1402_v44  ;;  %vm1409_vm1 = vweird.f32 %v1674_v61  ;;  %v1415_v7 = vor.u32 1.1754944e-38, %v1414_v12 }
0x20ed   :  { %vm1410_vm7 = vmor %vm1408_vm6, %vm1409_vm1 }
0x20ee   :  { %v1405_v63 = vsub.f32 1.0, %v1404_v62 }
0x20f0   :  { %v1406_v57 = vmul.f32 %v1674_v61, %v1405_v63 }
0x20f2   :  { %849 = vrot.lane.b32.xlu0 %v2076_v40, %s1706_s3  ;;  %v1407_v3 = vadd.f32 %v1674_v61, %v1406_v57 }
0x20f4   :  { %v1411_v40 = vsel %vm1410_vm7, %v1674_v61, %v1407_v3 }
0x20f5   :  { %v1416_v9 = vsel %vm1413_vm8, %v1415_v7, %v1411_v40 }
0x20f6   :  { %v1436_v23 = vmul.f32 %v1416_v9, %v2162_v19 }
0x20fa   :  { %1071 = vrot.lane.b32.xlu0 %v2123_v18, %s1706_s3 }
0x214c   :  { %v1421_v18 = vpop.permute.xlu0 %1420 }
0x214d   :  { %v1423_v48 = vmul.f32 %v1421_v18, %v1416_v9 }
0x214f   :  { %1425 = vrot.lane.b32.xlu1 %v1423_v48, %s1704_s9 }
0x2154   :  { %v327_v13 = vpop.permute.xlu0 %326 }
0x2155   :  { %330 = vst.msk [vmem:[%s2299_s6] sm:$0x3] %vm67_vm0, %v327_v13 }
0x2157   :  { %405 = vrot.lane.b32.xlu1 %v1967_v22, %s1706_s3 }
0x215c   :  { %v554_v17 = vpop.permute.xlu0 %553 }
0x215d   :  { %1535 = vst.msk [vmem:[%s2300_s7 + $0xc] sm:$0x3] %vm67_vm0, %v554_v17 }
0x215f   :  { %627 = vrot.lane.b32.xlu1 %v2021_v51, %s1706_s3 }
0x2164   :  { %v850_v8 = vpop.permute.xlu0 %849 }
0x2165   :  { %1547 = vst.msk [vmem:[%s2300_s7 + $0x8] sm:$0x3] %vm67_vm0, %v850_v8 }
0x2167   :  { %701 = vrot.lane.b32.xlu1 %v2039_v33, %s1706_s3 }
0x216c   :  { %v1072_v4 = vpop.permute.xlu0 %1071 }
0x216d   :  { %1556 = vst.msk [vmem:[%s2299_s6 + $0xa] sm:$0x3] %vm67_vm0, %v1072_v4 }
0x216f   :  { %923 = vrot.lane.b32.xlu1 %v2095_v16, %s1706_s3 }
0x2177   :  { %1145 = vrot.lane.b32.xlu1 %v2137_v56, %s1706_s3 }
0x217f   :  { %1367 = vrot.lane.b32.xlu1 %v1366_v52, %s1706_s3 }
0x21c1   :  { %v1426_v22 = vpop.permute.xlu1 %1425 }
0x21c2   :  { %v1428_v51 = vadd.f32 %v1426_v22, %v1939_v49 }
0x21c4   :  { %1675 = vtanh.f32 %v1428_v51 }
0x21c9   :  { %v406_v21 = vpop.permute.xlu1 %405 }
0x21ca   :  { %v1676_v33 = vpop.eup %1675  ;;  %1529 = vst.msk [vmem:[%s2300_s7 + $0xe] sm:$0x3] %vm67_vm0, %v406_v21 }
0x21cb   :  { %1432 = vrot.lane.b32.xlu2 %v1676_v33, %s1706_s3 }
0x21d1   :  { %v628_v10 = vpop.permute.xlu1 %627 }
0x21d2   :  { %1538 = vst.msk [vmem:[%s2299_s6 + $0x4] sm:$0x3] %vm67_vm0, %v628_v10 }
0x21d3   :  { %479 = vrot.lane.b32.xlu2 %v1983_v32, %s1706_s3 }
0x21d9   :  { %v702_v49 = vpop.permute.xlu1 %701 }
0x21da   :  { %1541 = vst.msk [vmem:[%s2300_s7 + $0xa] sm:$0x3] %vm67_vm0, %v702_v49 }
0x21db   :  { %775 = vrot.lane.b32.xlu2 %v2057_v5, %s1706_s3  ;;  %v1430_v5 = vsub.f32 1.0, %v1416_v9 }
0x21e1   :  { %v924_v16 = vpop.permute.xlu1 %923 }
0x21e2   :  { %1550 = vst.msk [vmem:[%s2299_s6 + $0x8] sm:$0x3] %vm67_vm0, %v924_v16 }
0x21e3   :  { %997 = vrot.lane.b32.xlu2 %v2109_v6, %s1706_s3 }
0x21e9   :  { %v1146_v56 = vpop.permute.xlu1 %1145 }
0x21ea   :  { %1559 = vst.msk [vmem:[%s2300_s7 + $0x4] sm:$0x3] %vm67_vm0, %v1146_v56 }
0x21eb   :  { %1219 = vrot.lane.b32.xlu2 %v2151_v37, %s1706_s3 }
0x21f1   :  { %v1368_v32 = vpop.permute.xlu1 %1367 }
0x21f2   :  { %1568 = vst.msk [vmem:[%s2299_s6 + $0xe] sm:$0x3] %vm67_vm0, %v1368_v32 }
0x2225   :  { %v1433_v50 = vpop.permute.xlu2 %1432 }
0x2226   :  { %v1435_v6 = vmul.f32 %v1433_v50, %v1430_v5 }
0x2228   :  { %v1437_v24 = vadd.f32 %v1436_v23, %v1435_v6 }
0x222a   :  { %1439 = vst [vmem:[#allocation1] ss:$4 sm:$0xff] %v1437_v24 }
0x222d   :  { %v480_v25 = vpop.permute.xlu2 %479 }
0x222e   :  { %1532 = vst.msk [vmem:[%s2299_s6 + $0x2] sm:$0x3] %vm67_vm0, %v480_v25 }
0x2231   :  { %v1440_v37 = vld.sshfl [vmem:[#allocation1] sm:$0xff pattern:$0x73625140] }
0x2232   :  { %1445 = vst [vmem:[#allocation1] ss:$4 sm:$0xff] %v2176_v53 }
0x2235   :  { %v776_v26 = vpop.permute.xlu2 %775 }
0x2236   :  { %1544 = vst.msk [vmem:[%s2299_s6 + $0x6] sm:$0x3] %vm67_vm0, %v776_v26 }
0x2239   :  { %v1446_v27 = vld.sshfl [vmem:[#allocation1] sm:$0xff pattern:$0x73625140] }
0x223a   :  { %1447 = vrot.lane.b32.xlu2 %v1446_v27, %s1706_s3  ;;  %1451 = vst [vmem:[#allocation1] ss:$4 sm:$0xff] %v1437_v24 }
0x223d   :  { %v998_v19 = vpop.permute.xlu2 %997 }
0x223e   :  { %1553 = vst.msk [vmem:[%s2300_s7 + $0x6] sm:$0x3] %vm67_vm0, %v998_v19 }
0x2241   :  { %v1452_v14 = vld.sshfl [vmem:[#allocation1] sm:$0xff pattern:$0x73625140] }
0x2242   :  { %1441 = vrot.lane.b32.xlu2 %v1440_v37, %s1706_s3  ;;  %1453 = vrot.lane.b32.xlu0 %v1452_v14, %s1706_s3 }
0x2245   :  { %v1220_v28 = vpop.permute.xlu2 %1219 }
0x2246   :  { %1562 = vst.msk [vmem:[%s2299_s6 + $0xc] sm:$0x3] %vm67_vm0, %v1220_v28  ;;  %s1708_s6 = smov 2  }
0x224a   :  { %1293 = vrot.lane.b32.xlu0 %v2165_v20, %s1706_s3 }
0x2294   :  { %v1448_v29 = vpop.permute.xlu2 %1447 }
0x2295   :  { %1450 = vst.msk [vmem:[#allocation2] sm:$0x3] %vm67_vm0, %v1448_v29 }
0x229c   :  { %v1442_v34 = vpop.permute.xlu2 %1441 }
0x229d   :  { %1444 = vst.msk [vmem:[%s2300_s7] sm:$0x3] %vm67_vm0, %v1442_v34 }
0x22b4   :  { %v1454_v35 = vpop.permute.xlu0 %1453 }
0x22b5   :  { %1456 = vst.msk [vmem:[#allocation2 + $0x2] sm:$0x3] %vm67_vm0, %v1454_v35 }
0x22b6   :  { %1481 = dma.vmem_to_hbm [thread:$0]  %s1474_s14, 64, %s1476_s12, [#allocation3], %s1705_s26, %s1705_s26, %s1708_s6  }
0x22bc   :  { %v1294_v20 = vpop.permute.xlu0 %1293 }
0x22bd   :  { %1565 = vst.msk [vmem:[%s2300_s7 + $0x2] sm:$0x3] %vm67_vm0, %v1294_v20 }
0x22be   :  { %1701 = dma.done.wait [#allocation3], 64  }
0x22bf   :  { %1702 = vsyncadd [#allocation3], 4294967232 }
0x22c0   :  { %1496 = vsyncpa [#allocation3], 1 }

// kernel: bert_gru_sentiment_forward.4
= control target key start
LH: loop header
LB: loop body
LE: loop exit
PB: predicated region body
PF: predicated region fallthrough
CT: control target
= control target key end

     0   :  { %16 = vsyncpa [#allocation3], 0  ;;  %vm84_vm0 = vcmask 254976   ;;  %vm137_vm1 = vcmask 261120   ;;  %v1885_v24 = vmov 0.0   ;;  %s1886_s19 = smov 64   ;;  %s2533_s0 = inlined_call_operand.vmem [shape: f32[8,2,32], index: 0, kind: input, shape index: {}, may-alias: {0,2}]   ;;  %s2534_s1 = inlined_call_operand.vmem [shape: f32[8,2,32], index: 1, kind: input, shape index: {}, may-alias: {1,3}]   ;;  %s2535_s2 = inlined_call_operand.vmem [shape: f32[8,2,32], index: 2, kind: input, shape index: {}, may-alias: {0,2}]   ;;  %s2536_s3 = inlined_call_operand.vmem [shape: f32[8,2,32], index: 3, kind: input, shape index: {}, may-alias: {1,3}]   ;;  %s2537_s4 = inlined_call_operand.vmem [shape: f32[2,2,32,96], index: 4, kind: input, shape index: {}]   ;;  %s2538_s5 = inlined_call_operand.vmem [shape: f32[2,1,96], index: 5, kind: input, shape index: {}]   ;;  %s2539_s6 = inlined_call_operand.vmem [shape: f32[2,32,96], index: 6, kind: input, shape index: {}]   ;;  %s2540_s7 = inlined_call_operand.vmem [shape: f32[2,1,32], index: 7, kind: input, shape index: {}]   ;;  %s2541_s8 = inlined_call_operand.hbm [shape: f32[8,2,32], index: 8, kind: output, shape index: {0}]   ;;  %s2542_s9 = inlined_call_operand.hbm [shape: f32[8,2,32], index: 9, kind: output, shape index: {1}]   ;;  %s2543_s10 = inlined_call_operand.vmem [shape: f32[2,2,32], index: 10, kind: output, shape index: {2}]  }
   0x1   :  { %v1669_v0 = vld [vmem:[%s2537_s4 + $0x38] sm:$0xff]  ;;  %v1668_v1 = vld [vmem:[%s2537_s4 + $0x30] sm:$0xff]  ;;  %v1667_v2 = vld [vmem:[%s2537_s4 + $0x28] sm:$0xff]  ;;  %85 = vst.msk [vmem:[%s2543_s10] sm:$0x3] %vm84_vm0, %v1885_v24 }
   0x2   :  { %154 = vmatpush.msra.mxu0 %v1669_v0  ;;  %v99_v3 = vld [vmem:[%s2534_s1] sm:$0x3]  ;;  %v100_v4 = vld [vmem:[%s2534_s1 + $0x2] sm:$0x3]  ;;  %v101_v5 = vld [vmem:[%s2534_s1 + $0x4] sm:$0x3] }
   0x3   :  { %v102_v6 = vld [vmem:[%s2534_s1 + $0x6] sm:$0x3]  ;;  %120 = vst [vmem:[#allocation1] ss:$4 sm:$0xff] %v99_v3  ;;  %v98_v7 = vld [vmem:[%s2537_s4 + $0x18] sm:$0xff]  ;;  %v97_v8 = vld [vmem:[%s2537_s4 + $0x10] sm:$0xff] }
   0x4   :  { %155 = vmatpush.msra.mxu0 %v1668_v1  ;;  %122 = vst [vmem:[#allocation1 + $0x1] ss:$4 sm:$0xff] %v100_v4  ;;  %v1666_v9 = vld [vmem:[%s2537_s4 + $0x20] sm:$0xff]  ;;  %v1980_v10 = vld [vmem:[%s2539_s6 + $0x18] sm:$0xff]  ;;  %206 = vmatpush.msra.mxu1 %v98_v7  ;;  %v96_v11 = vld [vmem:[%s2537_s4 + $0x8] sm:$0xff] }
   0x5   :  { %124 = vst [vmem:[#allocation1 + $0x2] ss:$4 sm:$0xff] %v101_v5  ;;  %v103_v12 = vld [vmem:[%s2534_s1 + $0x8] sm:$0x3]  ;;  %v104_v13 = vld [vmem:[%s2534_s1 + $0xa] sm:$0x3] }
   0x6   :  { %156 = vmatpush.msra.mxu0 %v1667_v2  ;;  %126 = vst [vmem:[#allocation1 + $0x3] ss:$4 sm:$0xff] %v102_v6  ;;  %207 = vmatpush.msra.mxu1 %v97_v8  ;;  %v105_v14 = vld [vmem:[%s2534_s1 + $0xc] sm:$0x3]  ;;  %v106_v15 = vld [vmem:[%s2534_s1 + $0xe] sm:$0x3] }
   0x7   :  { %128 = vst [vmem:[#allocation1 + $0x20] ss:$4 sm:$0xff] %v103_v12  ;;  %v2000_v16 = vld [vmem:[%s2539_s6 + $0x10] sm:$0xff]  ;;  %v95_v17 = vld [vmem:[%s2537_s4] sm:$0xff]  ;;  %v2012_v19 = vld [vmem:[%s2539_s6 + $0x8] sm:$0xff] }
   0x8   :  { %157 = vmatpush.msra.mxu0 %v1666_v9  ;;  %130 = vst [vmem:[#allocation1 + $0x21] ss:$4 sm:$0xff] %v104_v13  ;;  %208 = vmatpush.msra.mxu1 %v96_v11  ;;  %v87_v18 = vld [vmem:[%s2533_s0] sm:$0x3]  ;;  %v88_v20 = vld [vmem:[%s2533_s0 + $0x2] sm:$0x3] }
   0x9   :  { %132 = vst [vmem:[#allocation1 + $0x22] ss:$4 sm:$0xff] %v105_v14  ;;  %v89_v21 = vld [vmem:[%s2533_s0 + $0x4] sm:$0x3]  ;;  %v90_v23 = vld [vmem:[%s2533_s0 + $0x6] sm:$0x3] }
   0xa   :  { %418 = vmatpush.msrb.mxu0 %v1980_v10  ;;  %134 = vst [vmem:[#allocation1 + $0x23] ss:$4 sm:$0xff] %v106_v15  ;;  %209 = vmatpush.msra.mxu1 %v95_v17  ;;  %v2024_v22 = vld [vmem:[%s2539_s6] sm:$0xff]  ;;  %v1681_v25 = vld [vmem:[%s2537_s4 + $0x78] sm:$0xff]  ;;  %v1680_v29 = vld [vmem:[%s2537_s4 + $0x70] sm:$0xff] }
   0xb   :  { %v1677_v26 = vld [vmem:[%s2537_s4 + $0x58] sm:$0xff]  ;;  %86 = vst.msk [vmem:[%s2543_s10 + $0x2] sm:$0x3] %vm84_vm0, %v1885_v24  ;;  %304 = vmatpush.msra.mxu2 %v1681_v25  ;;  %v91_v30 = vld [vmem:[%s2533_s0 + $0x8] sm:$0x3]  ;;  %v1676_v31 = vld [vmem:[%s2537_s4 + $0x50] sm:$0xff] }
   0xc   :  { %419 = vmatpush.msrb.mxu0 %v2000_v16  ;;  %v2042_v27 = vld [vmem:[%s2539_s6 + $0x38] sm:$0xff]  ;;  %356 = vmatpush.msra.mxu3 %v1677_v26  ;;  %v2062_v32 = vld [vmem:[%s2539_s6 + $0x30] sm:$0xff]  ;;  %v92_v33 = vld [vmem:[%s2533_s0 + $0xa] sm:$0x3] }
   0xd   :  { %v135_v28 = vld.sshfl [vmem:[#allocation1] sm:$0xff pattern:$0x73625140]  ;;  %497 = vmatpush.msrb.mxu1 %v2042_v27  ;;  %v1679_v34 = vld [vmem:[%s2537_s4 + $0x68] sm:$0xff]  ;;  %305 = vmatpush.msra.mxu2 %v1680_v29 }
   0xe   :  { %420 = vmatpush.msrb.mxu0 %v2012_v19  ;;  %173 = vst [vmem:[#allocation1] ss:$4 sm:$0xff] %v87_v18  ;;  %v1675_v35 = vld [vmem:[%s2537_s4 + $0x48] sm:$0xff]  ;;  %357 = vmatpush.msra.mxu3 %v1676_v31  ;;  %v1678_v38 = vld [vmem:[%s2537_s4 + $0x60] sm:$0xff] }
   0xf   :  { %1670 = vmatmul.msk.f32.vlgmr.msra.gmra.mxu0 %vm137_vm1, %v135_v28  ;;  %175 = vst [vmem:[#allocation1 + $0x1] ss:$4 sm:$0xff] %v88_v20  ;;  %v93_v36 = vld [vmem:[%s2533_s0 + $0xc] sm:$0x3]  ;;  %498 = vmatpush.msrb.mxu1 %v2062_v32  ;;  %v1674_v40 = vld [vmem:[%s2537_s4 + $0x40] sm:$0xff] }
  0x10   :  { %421 = vmatpush.msrb.mxu0 %v2024_v22  ;;  %177 = vst [vmem:[#allocation1 + $0x2] ss:$4 sm:$0xff] %v89_v21  ;;  %v2081_v37 = vld [vmem:[%s2539_s6 + $0x28] sm:$0xff]  ;;  %306 = vmatpush.msra.mxu2 %v1679_v34  ;;  %v2097_v42 = vld [vmem:[%s2539_s6 + $0x20] sm:$0xff] }
  0x11   :  { %v136_v39 = vld.sshfl [vmem:[#allocation1 + $0x20] sm:$0xff pattern:$0x73625140]  ;;  %179 = vst [vmem:[#allocation1 + $0x3] ss:$4 sm:$0xff] %v90_v23  ;;  %358 = vmatpush.msra.mxu3 %v1675_v35  ;;  %499 = vmatpush.msrb.mxu1 %v2081_v37 }
  0x12   :  { %727 = vmatpush.msra.mxu0 %v1980_v10  ;;  %v94_v41 = vld [vmem:[%s2533_s0 + $0xe] sm:$0x3]  ;;  %181 = vst [vmem:[#allocation1 + $0x20] ss:$4 sm:$0xff] %v91_v30  ;;  %307 = vmatpush.msra.mxu2 %v1678_v38  ;;  %v250_v43 = vld [vmem:[%s2536_s3] sm:$0x3] }
  0x13   :  { %183 = vst [vmem:[#allocation1 + $0x21] ss:$4 sm:$0xff] %v92_v33  ;;  %359 = vmatpush.msra.mxu3 %v1674_v40  ;;  %500 = vmatpush.msrb.mxu1 %v2097_v42  ;;  %v1733_v44 = vld [vmem:[%s2540_s7] ss:$0 sm:$0xff]  ;;  %v251_v45 = vld [vmem:[%s2536_s3 + $0x2] sm:$0x3] }
  0x14   :  { %728 = vmatpush.msra.mxu0 %v2000_v16  ;;  %185 = vst [vmem:[#allocation1 + $0x22] ss:$4 sm:$0xff] %v93_v36  ;;  %579 = vmatpush.msrb.mxu2 %v1980_v10  ;;  %v252_v47 = vld [vmem:[%s2536_s3 + $0x4] sm:$0x3]  ;;  %v2125_v48 = vld [vmem:[%s2543_s10] sm:$0x3] }
  0x15   :  { %187 = vst [vmem:[#allocation1 + $0x23] ss:$4 sm:$0xff] %v94_v41  ;;  %653 = vmatpush.msrb.mxu3 %v2042_v27  ;;  %448 = vrot.lane.b32.xlu0 %v1733_v44, %s1886_s19  ;;  %v253_v49 = vld [vmem:[%s2536_s3 + $0x6] sm:$0x3]  ;;  %v254_v50 = vld [vmem:[%s2536_s3 + $0x8] sm:$0x3] }
  0x16   :  { %580 = vmatpush.msrb.mxu2 %v2000_v16  ;;  %729 = vmatpush.msra.mxu0 %v2012_v19  ;;  %v255_v51 = vld [vmem:[%s2536_s3 + $0xa] sm:$0x3]  ;;  %v256_v52 = vld [vmem:[%s2536_s3 + $0xc] sm:$0x3]  ;;  %v257_v53 = vld [vmem:[%s2536_s3 + $0xe] sm:$0x3] }
  0x17   :  { %1671 = vmatmul.msk.f32.gmra.mxu0 %vm137_vm1, %v136_v39  ;;  %654 = vmatpush.msrb.mxu3 %v2062_v32  ;;  %v1734_v54 = vld [vmem:[%s2540_s7 + $0x1] ss:$0 sm:$0xff] }
  0x18   :  { %v188_v46 = vld.sshfl [vmem:[#allocation1] sm:$0xff pattern:$0x73625140]  ;;  %581 = vmatpush.msrb.mxu2 %v2012_v19  ;;  %730 = vmatpush.msra.mxu0 %v2024_v22 }
  0x19   :  { %1672 = vmatmul.msk.f32.vlgmr.msra.gmra.mxu1 %vm137_vm1, %v188_v46  ;;  %271 = vst [vmem:[#allocation1] ss:$4 sm:$0xff] %v250_v43  ;;  %655 = vmatpush.msrb.mxu3 %v2081_v37 }
  0x1a   :  { %273 = vst [vmem:[#allocation1 + $0x1] ss:$4 sm:$0xff] %v251_v45  ;;  %582 = vmatpush.msrb.mxu2 %v2024_v22  ;;  %801 = vmatpush.msra.mxu1 %v2042_v27 }
  0x1b   :  { %275 = vst [vmem:[#allocation1 + $0x2] ss:$4 sm:$0xff] %v252_v47  ;;  %656 = vmatpush.msrb.mxu3 %v2097_v42 }
  0x1c   :  { %v189_v55 = vld.sshfl [vmem:[#allocation1 + $0x20] sm:$0xff pattern:$0x73625140]  ;;  %277 = vst [vmem:[#allocation1 + $0x3] ss:$4 sm:$0xff] %v253_v49  ;;  %802 = vmatpush.msra.mxu1 %v2062_v32 }
  0x1d   :  { %279 = vst [vmem:[#allocation1 + $0x20] ss:$4 sm:$0xff] %v254_v50 }
  0x1e   :  { %281 = vst [vmem:[#allocation1 + $0x21] ss:$4 sm:$0xff] %v255_v51 }
  0x1f   :  { %1693 = vmatmul.msk.f32.vlgmr.msrb.gmra.mxu0 %vm137_vm1, %v2125_v48 }
  0x20   :  { %17 = vsyncpa [#allocation5], 0  ;;  %283 = vst [vmem:[#allocation1 + $0x22] ss:$4 sm:$0xff] %v256_v52  ;;  %803 = vmatpush.msra.mxu1 %v2081_v37  ;;  %1023 = vmatpush.msrb.mxu0 %v1980_v10  ;;  %v237_v56 = vld [vmem:[%s2535_s2] sm:$0x3] }
  0x21   :  { %285 = vst [vmem:[#allocation1 + $0x23] ss:$4 sm:$0xff] %v257_v53  ;;  %527 = vrot.lane.b32.xlu0 %v1734_v54, %s1886_s19  ;;  %1673 = vmatmul.msk.f32.gmra.mxu1 %vm137_vm1, %v189_v55  ;;  %v238_v57 = vld [vmem:[%s2535_s2 + $0x2] sm:$0x3]  ;;  %v239_v59 = vld [vmem:[%s2535_s2 + $0x4] sm:$0x3] }
  0x22   :  { %1024 = vmatpush.msrb.mxu0 %v2000_v16  ;;  %804 = vmatpush.msra.mxu1 %v2097_v42  ;;  %v240_v60 = vld [vmem:[%s2535_s2 + $0x6] sm:$0x3]  ;;  %v2177_v61 = vld [vmem:[%s2543_s10 + $0x2] sm:$0x3]  ;;  %v241_v62 = vld [vmem:[%s2535_s2 + $0x8] sm:$0x3] }
  0x23   :  { %v286_v58 = vld.sshfl [vmem:[#allocation1] sm:$0xff pattern:$0x73625140]  ;;  %v242_v63 = vld [vmem:[%s2535_s2 + $0xa] sm:$0x3]  ;;  %s1887_s28 = smov 32  }
  0x24   :  { %1025 = vmatpush.msrb.mxu0 %v2012_v19  ;;  %1682 = vmatmul.msk.f32.vlgmr.msra.gmra.mxu2 %vm137_vm1, %v286_v58  ;;  %323 = vst [vmem:[#allocation1] ss:$4 sm:$0xff] %v237_v56  ;;  %v243_v0 = vld [vmem:[%s2535_s2 + $0xc] sm:$0x3]  ;;  %v244_v2 = vld [vmem:[%s2535_s2 + $0xe] sm:$0x3] }
  0x25   :  { %325 = vst [vmem:[#allocation1 + $0x1] ss:$4 sm:$0xff] %v238_v57  ;;  %875 = vmatpush.msra.mxu2 %v1980_v10  ;;  %v1735_v14 = vld [vmem:[%s2538_s5] ss:$0 sm:$0xff]  ;;  %v1736_v26 = vld [vmem:[%s2538_s5 + $0x1] ss:$0 sm:$0xff] }
  0x26   :  { %1026 = vmatpush.msrb.mxu0 %v2024_v22  ;;  %327 = vst [vmem:[#allocation1 + $0x2] ss:$4 sm:$0xff] %v239_v59  ;;  %s1888_s5 = smov 96   ;;  %s1614_s11 = sshll.u32 %s2541_s8, 4  ;;  %s1615_s11 = int_to_ptr.hbm [resolvable:$true] %s1614_s11 }
  0x27   :  { %329 = vst [vmem:[#allocation1 + $0x3] ss:$4 sm:$0xff] %v240_v60  ;;  %876 = vmatpush.msra.mxu2 %v2000_v16  ;;  %s1889_s12 = smov [#allocation2]   ;;  %s1890_s7 = smov 2  }
  0x28   :  { %v287_v1 = vld.sshfl [vmem:[#allocation1 + $0x20] sm:$0xff pattern:$0x73625140]  ;;  %s1612_s3 = sshll.u32 %s1889_s12, 4  ;;  %s1891_s4 = smov [#allocation4]   ;;  %s1613_s3 = int_to_ptr.vmem [resolvable:$true] %s1612_s3 }
  0x29   :  { %331 = vst [vmem:[#allocation1 + $0x20] ss:$4 sm:$0xff] %v241_v62  ;;  %1695 = vmatmul.msk.f32.vlgmr.msrb.gmra.mxu1 %vm137_vm1, %v2177_v61  ;;  %877 = vmatpush.msra.mxu2 %v2012_v19  ;;  %s1629_s6 = sshll.u32 %s1891_s4, 4  ;;  %s1631_s15 = sshll.u32 %s2542_s9, 4  ;;  %s1630_s6 = int_to_ptr.vmem [resolvable:$true] %s1629_s6  ;;  %s1632_s15 = int_to_ptr.hbm [resolvable:$true] %s1631_s15 }
  0x2a   :  { %333 = vst [vmem:[#allocation1 + $0x21] ss:$4 sm:$0xff] %v242_v63  ;;  %1097 = vmatpush.msrb.mxu1 %v2042_v27 }
  0x2b   :  { %335 = vst [vmem:[#allocation1 + $0x22] ss:$4 sm:$0xff] %v243_v0  ;;  %878 = vmatpush.msra.mxu2 %v2024_v22 }
  0x2c   :  { %337 = vst [vmem:[#allocation1 + $0x23] ss:$4 sm:$0xff] %v244_v2  ;;  %1683 = vmatmul.msk.f32.gmra.mxu2 %vm137_vm1, %v287_v1  ;;  %1098 = vmatpush.msrb.mxu1 %v2062_v32 }
  0x2e   :  { %v338_v3 = vld.sshfl [vmem:[#allocation1] sm:$0xff pattern:$0x73625140]  ;;  %1099 = vmatpush.msrb.mxu1 %v2081_v37 }
  0x2f   :  { %1684 = vmatmul.msk.f32.vlgmr.msra.gmra.mxu3 %vm137_vm1, %v338_v3 }
  0x30   :  { %949 = vmatpush.msra.mxu3 %v2042_v27  ;;  %1100 = vmatpush.msrb.mxu1 %v2097_v42 }
  0x32   :  { %950 = vmatpush.msra.mxu3 %v2062_v32 }
  0x33   :  { %v339_v4 = vld.sshfl [vmem:[#allocation1 + $0x20] sm:$0xff pattern:$0x73625140] }
  0x34   :  { %951 = vmatpush.msra.mxu3 %v2081_v37 }
  0x36   :  { %952 = vmatpush.msra.mxu3 %v2097_v42 }
  0x37   :  { %1685 = vmatmul.msk.f32.gmra.mxu3 %vm137_vm1, %v339_v4 }
  0x87   :  { %v2209_v9 = vpop.permute.xlu0 %448 }
  0x8c   :  { %v159_v5 = vpop.f32.mrf.mxu0 }
  0x93   :  { %v2218_v18 = vpop.permute.xlu0 %527 }
  0x94   :  { %v162_v6 = vpop.f32.mrf.mxu0 }
  0x96   :  { %v211_v7 = vpop.f32.mrf.mxu1 }
  0x97   :  { %v212_v8 = vadd.f32 %v211_v7, %v159_v5 }
  0x99   :  { %v2229_v31 = vadd.f32 %v1735_v14, %v212_v8 }
  0x9c   :  { %v423_v11 = vpop.f32.mrf.mxu0 }
  0x9d   :  { %v451_v12 = vadd.f32 %v2209_v9, %v423_v11  ;;  %v426_v34 = vadd.f32 %v423_v11, %v2229_v31 }
  0x9e   :  { %v214_v13 = vpop.f32.mrf.mxu1 }
  0x9f   :  { %453 = vrot.lane.b32.xlu1 %v451_v12, %s1886_s19  ;;  %v215_v15 = vadd.f32 %v214_v13, %v162_v6  ;;  %v1694_v36 = vmul.f32 -1.442695, %v426_v34 }
  0xa1   :  { %v2216_v17 = vadd.f32 %v1735_v14, %v215_v15  ;;  %1737 = vpow2.f32 %v1694_v36 }
  0xa6   :  { %v502_v20 = vpop.f32.mrf.mxu1 }
  0xa7   :  { %v530_v21 = vadd.f32 %v2218_v18, %v502_v20  ;;  %v309_v23 = vpop.f32.mrf.mxu2  ;;  %v1738_v40 = vpop.eup %1737 }
  0xa8   :  { %v430_v43 = vadd.f32 1.0, %v1738_v40 }
  0xa9   :  { %532 = vrot.lane.b32.xlu1 %v530_v21, %s1886_s19 }
  0xaa   :  { %v442_v53 = vand.u32 2147483648, %v430_v43  ;;  %vm436_vm3 = vweird.f32 %v430_v43  ;;  %v440_v54 = vand.u32 2147483647, %v430_v43 }
  0xac   :  { %v443_v57 = vor.u32 1.1754944e-38, %v442_v53  ;;  %vm441_vm5 = vcmp.eq.f32.partialorder %v440_v54, 8.507059e+37 }
  0xaf   :  { %v312_v29 = vpop.f32.mrf.mxu2 }
  0xb1   :  { %469 = vrot.lane.b32.xlu1 %v2125_v48, %s1887_s28 }
  0xb2   :  { %v361_v24 = vpop.f32.mrf.mxu3 }
  0xb3   :  { %v362_v25 = vadd.f32 %v361_v24, %v309_v23 }
  0xb5   :  { %v2227_v28 = vadd.f32 %v1736_v26, %v362_v25 }
  0xba   :  { %v364_v30 = vpop.f32.mrf.mxu3 }
  0xbb   :  { %v365_v33 = vadd.f32 %v364_v30, %v312_v29 }
  0xbd   :  { %v2232_v35 = vadd.f32 %v1736_v26, %v365_v33 }
  0xbf   :  { %v381_v38 = vrot.slane %v2232_v35, 6 }
  0xc1   :  { %v505_v39 = vadd.f32 %v502_v20, %v381_v38 }
  0xc3   :  { %v1696_v41 = vmul.f32 -1.442695, %v505_v39 }
  0xc5   :  { %1739 = vpow2.f32 %v1696_v41 }
  0xc6   :  { %1741 = vrcp.f32 %v430_v43 }
  0xcb   :  { %v1740_v44 = vpop.eup %1739 }
  0xcc   :  { %v1742_v45 = vpop.eup %1741  ;;  %v509_v46 = vadd.f32 1.0, %v1740_v44  ;;  %v225_v44 = vrot.slane %v2229_v31, 2 }
  0xcd   :  { %v432_v47 = vmul.f32 %v1742_v45, %v430_v43  ;;  %vm437_vm2 = vweird.f32 %v1742_v45 }
  0xce   :  { %1743 = vrcp.f32 %v509_v46  ;;  %vm438_vm4 = vmor %vm436_vm3, %vm437_vm2  ;;  %v521_v0 = vand.u32 2147483648, %v509_v46  ;;  %vm515_vm7 = vweird.f32 %v509_v46  ;;  %v519_v1 = vand.u32 2147483647, %v509_v46 }
  0xcf   :  { %v433_v48 = vsub.f32 1.0, %v432_v47 }
  0xd0   :  { %v522_v3 = vor.u32 1.1754944e-38, %v521_v0  ;;  %vm520_vm9 = vcmp.eq.f32.partialorder %v519_v1, 8.507059e+37 }
  0xd1   :  { %v434_v50 = vmul.f32 %v1742_v45, %v433_v48 }
  0xd3   :  { %v435_v52 = vadd.f32 %v1742_v45, %v434_v50 }
  0xd4   :  { %v1744_v49 = vpop.eup %1743 }
  0xd5   :  { %v511_v51 = vmul.f32 %v1744_v49, %v509_v46  ;;  %v439_v56 = vsel %vm438_vm4, %v1742_v45, %v435_v52  ;;  %vm516_vm6 = vweird.f32 %v1744_v49 }
  0xd6   :  { %v444_v59 = vsel %vm441_vm5, %v443_v57, %v439_v56  ;;  %vm517_vm8 = vmor %vm515_vm7, %vm516_vm6 }
  0xd7   :  { %v512_v55 = vsub.f32 1.0, %v511_v51  ;;  %v463_v20 = vsub.f32 1.0, %v444_v59 }
  0xd9   :  { %v513_v60 = vmul.f32 %v1744_v49, %v512_v55 }
  0xdb   :  { %v514_v63 = vadd.f32 %v1744_v49, %v513_v60 }
  0xdd   :  { %v518_v2 = vsel %vm517_vm8, %v1744_v49, %v514_v63 }
  0xde   :  { %v523_v4 = vsel %vm520_vm9, %v522_v3, %v518_v2 }
  0xdf   :  { %v542_v29 = vsub.f32 1.0, %v523_v4 }
 0x111   :  { %v454_v58 = vpop.permute.xlu1 %453 }
 0x112   :  { %v456_v62 = vmul.f32 %v454_v58, %v444_v59 }
 0x114   :  { %458 = vrot.lane.b32.xlu2 %v456_v62, %s1886_s19 }
 0x11b   :  { %v533_v5 = vpop.permute.xlu1 %532 }
 0x11c   :  { %v535_v6 = vmul.f32 %v533_v5, %v523_v4 }
 0x11e   :  { %537 = vrot.lane.b32.xlu2 %v535_v6, %s1886_s19 }
 0x123   :  { %v470_v15 = vpop.permute.xlu1 %469 }
 0x124   :  { %v472_v23 = vmul.f32 %v470_v15, %v444_v59 }
 0x16e   :  { %v459_v7 = vpop.permute.xlu2 %458 }
 0x16f   :  { %v461_v8 = vadd.f32 %v459_v7, %v2229_v31 }
 0x171   :  { %1745 = vtanh.f32 %v461_v8 }
 0x177   :  { %v1746_v11 = vpop.eup %1745 }
 0x178   :  { %465 = vrot.lane.b32.xlu0 %v1746_v11, %s1888_s5  ;;  %v538_v12 = vpop.permute.xlu2 %537 }
 0x179   :  { %v540_v13 = vadd.f32 %v538_v12, %v381_v38 }
 0x17b   :  { %1747 = vtanh.f32 %v540_v13  ;;  %v380_v13 = vrot.slane %v2232_v35, 4 }
 0x180   :  { %548 = vrot.lane.b32.xlu0 %v2177_v61, %s1887_s28 }
 0x181   :  { %v1748_v14 = vpop.eup %1747 }
 0x182   :  { %544 = vrot.lane.b32.xlu2 %v1748_v14, %s1888_s5 }
 0x1dc   :  { %v545_v26 = vpop.permute.xlu2 %544 }
 0x1dd   :  { %v547_v33 = vmul.f32 %v545_v26, %v542_v29 }
 0x1ea   :  { %v466_v21 = vpop.permute.xlu0 %465 }
 0x1eb   :  { %v468_v24 = vmul.f32 %v466_v21, %v463_v20 }
 0x1ed   :  { %v473_v25 = vadd.f32 %v472_v23, %v468_v24 }
 0x1ef   :  { %475 = vst [vmem:[#allocation1] ss:$4 sm:$0xff] %v473_v25 }
 0x1f2   :  { %v549_v30 = vpop.permute.xlu0 %548 }
 0x1f3   :  { %v551_v34 = vmul.f32 %v549_v30, %v523_v4 }
 0x1f5   :  { %v2242_v36 = vadd.f32 %v551_v34, %v547_v33 }
 0x1f6   :  { %v2244_v38 = vld.sshfl [vmem:[#allocation1] sm:$0xff pattern:$0x73625140] }
 0x1f7   :  { %554 = vst [vmem:[#allocation1] ss:$4 sm:$0xff] %v2242_v36 }
 0x1fe   :  { %v2247_v61 = vld.sshfl [vmem:[#allocation1] sm:$0xff pattern:$0x73625140] }
 0x1ff   :  { %561 = vst [vmem:[#allocation1] ss:$4 sm:$0xff] %v473_v25 }
 0x206   :  { %v562_v39 = vld.sshfl [vmem:[#allocation1] sm:$0xff pattern:$0x73625140] }
 0x207   :  { %563 = vrot.lane.b32.xlu1 %v562_v39, %s1888_s5 }
 0x279   :  { %v564_v40 = vpop.permute.xlu1 %563 }
 0x27a   :  { %1697 = vmatmul.msk.f32.vlgmr.msrb.gmra.mxu2 %vm137_vm1, %v564_v40 }
 0x27b   :  { %1171 = vmatpush.msrb.mxu2 %v1980_v10 }
 0x27d   :  { %1172 = vmatpush.msrb.mxu2 %v2000_v16 }
 0x27f   :  { %1173 = vmatpush.msrb.mxu2 %v2012_v19 }
 0x281   :  { %1174 = vmatpush.msrb.mxu2 %v2024_v22 }
 0x2fd   :  { %v584_v41 = vpop.f32.mrf.mxu2 }
 0x2fe   :  { %v607_v43 = vadd.f32 %v584_v41, %v2209_v9  ;;  %v587_v45 = vadd.f32 %v584_v41, %v225_v44 }
 0x300   :  { %609 = vrot.lane.b32.xlu2 %v607_v43, %s1886_s19  ;;  %v1698_v46 = vmul.f32 -1.442695, %v587_v45 }
 0x302   :  { %1749 = vpow2.f32 %v1698_v46 }
 0x308   :  { %v1750_v47 = vpop.eup %1749 }
 0x309   :  { %v591_v48 = vadd.f32 1.0, %v1750_v47 }
 0x30b   :  { %1751 = vrcp.f32 %v591_v48  ;;  %v603_v54 = vand.u32 2147483648, %v591_v48  ;;  %vm597_vm11 = vweird.f32 %v591_v48  ;;  %v601_v55 = vand.u32 2147483647, %v591_v48 }
 0x30d   :  { %v604_v57 = vor.u32 1.1754944e-38, %v603_v54  ;;  %vm602_vm13 = vcmp.eq.f32.partialorder %v601_v55, 8.507059e+37 }
 0x311   :  { %v1752_v49 = vpop.eup %1751 }
 0x312   :  { %v593_v50 = vmul.f32 %v1752_v49, %v591_v48  ;;  %vm598_vm10 = vweird.f32 %v1752_v49 }
 0x313   :  { %vm599_vm12 = vmor %vm597_vm11, %vm598_vm10 }
 0x314   :  { %v594_v51 = vsub.f32 1.0, %v593_v50 }
 0x316   :  { %v595_v52 = vmul.f32 %v1752_v49, %v594_v51 }
 0x318   :  { %v596_v53 = vadd.f32 %v1752_v49, %v595_v52 }
 0x31a   :  { %v600_v56 = vsel %vm599_vm12, %v1752_v49, %v596_v53 }
 0x31b   :  { %v605_v59 = vsel %vm602_vm13, %v604_v57, %v600_v56  ;;  %v226_v56 = vrot.slane %v2229_v31, 4 }
 0x31c   :  { %v619_v1 = vsub.f32 1.0, %v605_v59  ;;  %v625_v3 = vmul.f32 %v605_v59, %v473_v25 }
 0x35a   :  { %v610_v58 = vpop.permute.xlu2 %609 }
 0x35b   :  { %v612_v60 = vmul.f32 %v610_v58, %v605_v59 }
 0x35d   :  { %614 = vrot.lane.b32.xlu0 %v612_v60, %s1886_s19 }
 0x3cf   :  { %v615_v62 = vpop.permute.xlu0 %614 }
 0x3d0   :  { %v617_v63 = vadd.f32 %v615_v62, %v225_v44 }
 0x3d2   :  { %1753 = vtanh.f32 %v617_v63 }
 0x3d8   :  { %v1754_v0 = vpop.eup %1753 }
 0x3d9   :  { %621 = vrot.lane.b32.xlu1 %v1754_v0, %s1888_s5 }
 0x44b   :  { %v622_v2 = vpop.permute.xlu1 %621 }
 0x44c   :  { %v624_v4 = vmul.f32 %v622_v2, %v619_v1 }
 0x44e   :  { %v2260_v5 = vadd.f32 %v625_v3, %v624_v4 }
 0x450   :  { %628 = vst [vmem:[#allocation1] ss:$4 sm:$0xff] %v2260_v5 }
 0x457   :  { %v2263_v6 = vld.sshfl [vmem:[#allocation1] sm:$0xff pattern:$0x73625140] }
 0x458   :  { %635 = vst [vmem:[#allocation1] ss:$4 sm:$0xff] %v2242_v36 }
 0x45f   :  { %v636_v7 = vld.sshfl [vmem:[#allocation1] sm:$0xff pattern:$0x73625140] }
 0x460   :  { %637 = vrot.lane.b32.xlu2 %v636_v7, %s1888_s5 }
 0x4ba   :  { %v638_v8 = vpop.permute.xlu2 %637 }
 0x4bb   :  { %1699 = vmatmul.msk.f32.vlgmr.msrb.gmra.mxu3 %vm137_vm1, %v638_v8 }
 0x4bc   :  { %1245 = vmatpush.msrb.mxu3 %v2042_v27 }
 0x4be   :  { %1246 = vmatpush.msrb.mxu3 %v2062_v32 }
 0x4c0   :  { %1247 = vmatpush.msrb.mxu3 %v2081_v37 }
 0x4c2   :  { %1248 = vmatpush.msrb.mxu3 %v2097_v42 }
 0x53e   :  { %v658_v11 = vpop.f32.mrf.mxu3 }
 0x53f   :  { %v681_v12 = vadd.f32 %v658_v11, %v2218_v18  ;;  %v661_v14 = vadd.f32 %v658_v11, %v380_v13 }
 0x541   :  { %683 = vrot.lane.b32.xlu0 %v681_v12, %s1886_s19  ;;  %v1700_v15 = vmul.f32 -1.442695, %v661_v14 }
 0x543   :  { %1755 = vpow2.f32 %v1700_v15 }
 0x549   :  { %v1756_v20 = vpop.eup %1755 }
 0x54a   :  { %v665_v21 = vadd.f32 1.0, %v1756_v20 }
 0x54c   :  { %1757 = vrcp.f32 %v665_v21  ;;  %v677_v30 = vand.u32 2147483648, %v665_v21  ;;  %vm671_vm15 = vweird.f32 %v665_v21  ;;  %v675_v33 = vand.u32 2147483647, %v665_v21 }
 0x54e   :  { %v678_v39 = vor.u32 1.1754944e-38, %v677_v30  ;;  %vm676_vm3 = vcmp.eq.f32.partialorder %v675_v33, 8.507059e+37 }
 0x552   :  { %v1758_v23 = vpop.eup %1757 }
 0x553   :  { %v667_v24 = vmul.f32 %v1758_v23, %v665_v21  ;;  %vm672_vm14 = vweird.f32 %v1758_v23 }
 0x554   :  { %vm673_vm2 = vmor %vm671_vm15, %vm672_vm14 }
 0x555   :  { %v668_v25 = vsub.f32 1.0, %v667_v24 }
 0x557   :  { %v669_v26 = vmul.f32 %v1758_v23, %v668_v25 }
 0x559   :  { %v670_v29 = vadd.f32 %v1758_v23, %v669_v26 }
 0x55b   :  { %v674_v34 = vsel %vm673_vm2, %v1758_v23, %v670_v29 }
 0x55c   :  { %v679_v41 = vsel %vm676_vm3, %v678_v39, %v674_v34  ;;  %v379_v39 = vrot.slane %v2232_v35, 2 }
 0x55d   :  { %v693_v47 = vsub.f32 1.0, %v679_v41  ;;  %v699_v49 = vmul.f32 %v679_v41, %v2242_v36 }
 0x5b3   :  { %v684_v40 = vpop.permute.xlu0 %683 }
 0x5b4   :  { %v686_v43 = vmul.f32 %v684_v40, %v679_v41 }
 0x5b6   :  { %688 = vrot.lane.b32.xlu1 %v686_v43, %s1886_s19 }
 0x628   :  { %v689_v44 = vpop.permute.xlu1 %688 }
 0x629   :  { %v691_v45 = vadd.f32 %v689_v44, %v380_v13 }
 0x62b   :  { %1759 = vtanh.f32 %v691_v45 }
 0x631   :  { %v1760_v46 = vpop.eup %1759 }
 0x632   :  { %695 = vrot.lane.b32.xlu2 %v1760_v46, %s1888_s5 }
 0x68c   :  { %v696_v48 = vpop.permute.xlu2 %695 }
 0x68d   :  { %v698_v50 = vmul.f32 %v696_v48, %v693_v47 }
 0x68f   :  { %v2278_v51 = vadd.f32 %v699_v49, %v698_v50 }
 0x691   :  { %702 = vst [vmem:[#allocation1] ss:$4 sm:$0xff] %v2278_v51 }
 0x698   :  { %v2281_v52 = vld.sshfl [vmem:[#allocation1] sm:$0xff pattern:$0x73625140] }
 0x699   :  { %709 = vst [vmem:[#allocation1] ss:$4 sm:$0xff] %v2260_v5 }
 0x6a0   :  { %v710_v53 = vld.sshfl [vmem:[#allocation1] sm:$0xff pattern:$0x73625140] }
 0x6a1   :  { %711 = vrot.lane.b32.xlu0 %v710_v53, %s1888_s5 }
 0x713   :  { %v712_v54 = vpop.permute.xlu0 %711 }
 0x714   :  { %1701 = vmatmul.msk.f32.vlgmr.msra.gmra.mxu0 %vm137_vm1, %v712_v54 }
 0x715   :  { %1319 = vmatpush.msra.mxu0 %v1980_v10 }
 0x717   :  { %1320 = vmatpush.msra.mxu0 %v2000_v16 }
 0x719   :  { %1321 = vmatpush.msra.mxu0 %v2012_v19 }
 0x71b   :  { %1322 = vmatpush.msra.mxu0 %v2024_v22 }
 0x791   :  { %v732_v36 = vpop.f32.mrf.mxu0 }
 0x792   :  { %v755_v55 = vadd.f32 %v732_v36, %v2209_v9  ;;  %v735_v57 = vadd.f32 %v732_v36, %v226_v56 }
 0x794   :  { %757 = vrot.lane.b32.xlu1 %v755_v55, %s1886_s19  ;;  %v1702_v58 = vmul.f32 -1.442695, %v735_v57 }
 0x796   :  { %1761 = vpow2.f32 %v1702_v58 }
 0x79c   :  { %v1762_v59 = vpop.eup %1761 }
 0x79d   :  { %v739_v60 = vadd.f32 1.0, %v1762_v59 }
 0x79f   :  { %1763 = vrcp.f32 %v739_v60  ;;  %v751_v3 = vand.u32 2147483648, %v739_v60  ;;  %vm745_vm5 = vweird.f32 %v739_v60  ;;  %v749_v4 = vand.u32 2147483647, %v739_v60 }
 0x7a1   :  { %v752_v8 = vor.u32 1.1754944e-38, %v751_v3  ;;  %vm750_vm7 = vcmp.eq.f32.partialorder %v749_v4, 8.507059e+37 }
 0x7a5   :  { %v1764_v62 = vpop.eup %1763 }
 0x7a6   :  { %v741_v63 = vmul.f32 %v1764_v62, %v739_v60  ;;  %vm746_vm4 = vweird.f32 %v1764_v62 }
 0x7a7   :  { %vm747_vm6 = vmor %vm745_vm5, %vm746_vm4 }
 0x7a8   :  { %v742_v0 = vsub.f32 1.0, %v741_v63 }
 0x7aa   :  { %v743_v1 = vmul.f32 %v1764_v62, %v742_v0 }
 0x7ac   :  { %v744_v2 = vadd.f32 %v1764_v62, %v743_v1 }
 0x7ae   :  { %v748_v7 = vsel %vm747_vm6, %v1764_v62, %v744_v2 }
 0x7af   :  { %v753_v12 = vsel %vm750_vm7, %v752_v8, %v748_v7 }
 0x7b0   :  { %v767_v21 = vsub.f32 1.0, %v753_v12  ;;  %v773_v24 = vmul.f32 %v753_v12, %v2260_v5 }
 0x806   :  { %v758_v11 = vpop.permute.xlu1 %757 }
 0x807   :  { %v760_v13 = vmul.f32 %v758_v11, %v753_v12  ;;  %v227_v11 = vrot.slane %v2229_v31, 6 }
 0x809   :  { %762 = vrot.lane.b32.xlu2 %v760_v13, %s1886_s19 }
 0x863   :  { %v763_v14 = vpop.permute.xlu2 %762 }
 0x864   :  { %v765_v15 = vadd.f32 %v763_v14, %v226_v56 }
 0x866   :  { %1765 = vtanh.f32 %v765_v15 }
 0x86c   :  { %v1766_v20 = vpop.eup %1765 }
 0x86d   :  { %769 = vrot.lane.b32.xlu0 %v1766_v20, %s1888_s5 }
 0x8df   :  { %v770_v23 = vpop.permute.xlu0 %769 }
 0x8e0   :  { %v772_v25 = vmul.f32 %v770_v23, %v767_v21 }
 0x8e2   :  { %v2296_v26 = vadd.f32 %v773_v24, %v772_v25 }
 0x8e4   :  { %776 = vst [vmem:[#allocation1] ss:$4 sm:$0xff] %v2296_v26 }
 0x8eb   :  { %v2299_v29 = vld.sshfl [vmem:[#allocation1] sm:$0xff pattern:$0x73625140] }
 0x8ec   :  { %783 = vst [vmem:[#allocation1] ss:$4 sm:$0xff] %v2278_v51 }
 0x8f3   :  { %v784_v30 = vld.sshfl [vmem:[#allocation1] sm:$0xff pattern:$0x73625140] }
 0x8f4   :  { %785 = vrot.lane.b32.xlu1 %v784_v30, %s1888_s5 }
 0x966   :  { %v786_v33 = vpop.permute.xlu1 %785 }
 0x967   :  { %1703 = vmatmul.msk.f32.vlgmr.msra.gmra.mxu1 %vm137_vm1, %v786_v33 }
 0x968   :  { %1393 = vmatpush.msra.mxu1 %v2042_v27 }
 0x96a   :  { %1394 = vmatpush.msra.mxu1 %v2062_v32 }
 0x96c   :  { %1395 = vmatpush.msra.mxu1 %v2081_v37 }
 0x96e   :  { %1396 = vmatpush.msra.mxu1 %v2097_v42 }
 0x9e4   :  { %v806_v5 = vpop.f32.mrf.mxu1 }
 0x9e5   :  { %v829_v34 = vadd.f32 %v806_v5, %v2218_v18  ;;  %v809_v40 = vadd.f32 %v806_v5, %v379_v39 }
 0x9e7   :  { %831 = vrot.lane.b32.xlu2 %v829_v34, %s1886_s19  ;;  %v1704_v41 = vmul.f32 -1.442695, %v809_v40 }
 0x9e9   :  { %1767 = vpow2.f32 %v1704_v41 }
 0x9ef   :  { %v1768_v43 = vpop.eup %1767 }
 0x9f0   :  { %v813_v44 = vadd.f32 1.0, %v1768_v43 }
 0x9f2   :  { %1769 = vrcp.f32 %v813_v44  ;;  %v825_v50 = vand.u32 2147483648, %v813_v44  ;;  %vm819_vm9 = vweird.f32 %v813_v44  ;;  %v823_v53 = vand.u32 2147483647, %v813_v44 }
 0x9f4   :  { %v826_v36 = vor.u32 1.1754944e-38, %v825_v50  ;;  %vm824_vm11 = vcmp.eq.f32.partialorder %v823_v53, 8.507059e+37 }
 0x9f8   :  { %v1770_v45 = vpop.eup %1769 }
 0x9f9   :  { %v815_v46 = vmul.f32 %v1770_v45, %v813_v44  ;;  %vm820_vm8 = vweird.f32 %v1770_v45 }
 0x9fa   :  { %vm821_vm10 = vmor %vm819_vm9, %vm820_vm8 }
 0x9fb   :  { %v816_v47 = vsub.f32 1.0, %v815_v46 }
 0x9fd   :  { %v817_v48 = vmul.f32 %v1770_v45, %v816_v47 }
 0x9ff   :  { %v818_v49 = vadd.f32 %v1770_v45, %v817_v48 }
 0xa01   :  { %v822_v54 = vsel %vm821_vm10, %v1770_v45, %v818_v49 }
 0xa02   :  { %v827_v56 = vsel %vm824_vm11, %v826_v36, %v822_v54 }
 0xa03   :  { %v841_v62 = vsub.f32 1.0, %v827_v56  ;;  %v847_v0 = vmul.f32 %v827_v56, %v2278_v51 }
 0xa41   :  { %v832_v55 = vpop.permute.xlu2 %831 }
 0xa42   :  { %v834_v57 = vmul.f32 %v832_v55, %v827_v56 }
 0xa44   :  { %836 = vrot.lane.b32.xlu0 %v834_v57, %s1886_s19 }
 0xab6   :  { %v837_v58 = vpop.permute.xlu0 %836 }
 0xab7   :  { %v839_v59 = vadd.f32 %v837_v58, %v379_v39 }
 0xab9   :  { %1771 = vtanh.f32 %v839_v59 }
 0xabf   :  { %v1772_v60 = vpop.eup %1771 }
 0xac0   :  { %843 = vrot.lane.b32.xlu1 %v1772_v60, %s1888_s5 }
 0xb32   :  { %v844_v63 = vpop.permute.xlu1 %843 }
 0xb33   :  { %v846_v1 = vmul.f32 %v844_v63, %v841_v62 }
 0xb35   :  { %v2314_v2 = vadd.f32 %v847_v0, %v846_v1 }
 0xb37   :  { %850 = vst [vmem:[#allocation1] ss:$4 sm:$0xff] %v2314_v2 }
 0xb3e   :  { %v2317_v3 = vld.sshfl [vmem:[#allocation1] sm:$0xff pattern:$0x73625140] }
 0xb3f   :  { %857 = vst [vmem:[#allocation1] ss:$4 sm:$0xff] %v2296_v26 }
 0xb46   :  { %v858_v4 = vld.sshfl [vmem:[#allocation1] sm:$0xff pattern:$0x73625140] }
 0xb47   :  { %859 = vrot.lane.b32.xlu2 %v858_v4, %s1888_s5 }
 0xba1   :  { %v860_v7 = vpop.permute.xlu2 %859 }
 0xba2   :  { %1705 = vmatmul.msk.f32.vlgmr.msra.gmra.mxu2 %vm137_vm1, %v860_v7 }
 0xba3   :  { %1467 = vmatpush.msra.mxu2 %v1980_v10 }
 0xba5   :  { %1468 = vmatpush.msra.mxu2 %v2000_v16 }
 0xba7   :  { %1469 = vmatpush.msra.mxu2 %v2012_v19 }
 0xba9   :  { %1470 = vmatpush.msra.mxu2 %v2024_v22 }
 0xc25   :  { %v880_v51 = vpop.f32.mrf.mxu2 }
 0xc26   :  { %v903_v8 = vadd.f32 %v880_v51, %v2209_v9  ;;  %v883_v12 = vadd.f32 %v880_v51, %v227_v11 }
 0xc28   :  { %905 = vrot.lane.b32.xlu0 %v903_v8, %s1886_s19  ;;  %v1706_v13 = vmul.f32 -1.442695, %v883_v12 }
 0xc2a   :  { %1773 = vpow2.f32 %v1706_v13 }
 0xc30   :  { %v1774_v14 = vpop.eup %1773 }
 0xc31   :  { %v887_v15 = vadd.f32 1.0, %v1774_v14 }
 0xc33   :  { %1775 = vrcp.f32 %v887_v15  ;;  %v899_v22 = vand.u32 2147483648, %v887_v15  ;;  %vm893_vm13 = vweird.f32 %v887_v15  ;;  %v897_v23 = vand.u32 2147483647, %v887_v15 }
 0xc35   :  { %v900_v25 = vor.u32 1.1754944e-38, %v899_v22  ;;  %vm898_vm15 = vcmp.eq.f32.partialorder %v897_v23, 8.507059e+37 }
 0xc39   :  { %v1776_v10 = vpop.eup %1775 }
 0xc3a   :  { %v889_v20 = vmul.f32 %v1776_v10, %v887_v15  ;;  %vm894_vm12 = vweird.f32 %v1776_v10 }
 0xc3b   :  { %vm895_vm14 = vmor %vm893_vm13, %vm894_vm12 }
 0xc3c   :  { %v890_v16 = vsub.f32 1.0, %v889_v20 }
 0xc3e   :  { %v891_v21 = vmul.f32 %v1776_v10, %v890_v16 }
 0xc40   :  { %v892_v19 = vadd.f32 %v1776_v10, %v891_v21 }
 0xc42   :  { %v896_v24 = vsel %vm895_vm14, %v1776_v10, %v892_v19 }
 0xc43   :  { %v901_v30 = vsel %vm898_vm15, %v900_v25, %v896_v24 }
 0xc44   :  { %v915_v40 = vsub.f32 1.0, %v901_v30  ;;  %v921_v43 = vmul.f32 %v901_v30, %v2296_v26 }
 0xc9a   :  { %v906_v31 = vpop.permute.xlu0 %905 }
 0xc9b   :  { %v908_v33 = vmul.f32 %v906_v31, %v901_v30 }
 0xc9d   :  { %910 = vrot.lane.b32.xlu1 %v908_v33, %s1886_s19 }
 0xd0f   :  { %v911_v5 = vpop.permute.xlu1 %910 }
 0xd10   :  { %v913_v34 = vadd.f32 %v911_v5, %v227_v11 }
 0xd12   :  { %1777 = vtanh.f32 %v913_v34 }
 0xd18   :  { %v1778_v39 = vpop.eup %1777 }
 0xd19   :  { %917 = vrot.lane.b32.xlu2 %v1778_v39, %s1888_s5 }
 0xd73   :  { %v918_v41 = vpop.permute.xlu2 %917 }
 0xd74   :  { %v920_v44 = vmul.f32 %v918_v41, %v915_v40 }
 0xd76   :  { %v2332_v45 = vadd.f32 %v921_v43, %v920_v44 }
 0xd78   :  { %924 = vst [vmem:[#allocation1] ss:$4 sm:$0xff] %v2332_v45 }
 0xd7f   :  { %v2335_v46 = vld.sshfl [vmem:[#allocation1] sm:$0xff pattern:$0x73625140] }
 0xd80   :  { %931 = vst [vmem:[#allocation1] ss:$4 sm:$0xff] %v2314_v2 }
 0xd87   :  { %v932_v47 = vld.sshfl [vmem:[#allocation1] sm:$0xff pattern:$0x73625140] }
 0xd88   :  { %933 = vrot.lane.b32.xlu0 %v932_v47, %s1888_s5 }
 0xdfa   :  { %v934_v48 = vpop.permute.xlu0 %933 }
 0xdfb   :  { %1707 = vmatmul.msk.f32.vlgmr.msra.gmra.mxu3 %vm137_vm1, %v934_v48 }
 0xdfc   :  { %1541 = vmatpush.msra.mxu3 %v2042_v27 }
 0xdfe   :  { %1542 = vmatpush.msra.mxu3 %v2062_v32 }
 0xe00   :  { %1543 = vmatpush.msra.mxu3 %v2081_v37 }
 0xe02   :  { %1544 = vmatpush.msra.mxu3 %v2097_v42 }
 0xe7e   :  { %v954_v26 = vpop.f32.mrf.mxu3 }
 0xe7f   :  { %v977_v49 = vadd.f32 %v954_v26, %v2218_v18  ;;  %v957_v50 = vadd.f32 %v954_v26, %v2232_v35 }
 0xe81   :  { %979 = vrot.lane.b32.xlu1 %v977_v49, %s1886_s19  ;;  %v1708_v53 = vmul.f32 -1.442695, %v957_v50 }
 0xe83   :  { %1779 = vpow2.f32 %v1708_v53 }
 0xe89   :  { %v1780_v54 = vpop.eup %1779 }
 0xe8a   :  { %v961_v36 = vadd.f32 1.0, %v1780_v54 }
 0xe8c   :  { %1781 = vrcp.f32 %v961_v36  ;;  %v973_v37 = vand.u32 2147483648, %v961_v36  ;;  %vm967_vm3 = vweird.f32 %v961_v36  ;;  %v971_v42 = vand.u32 2147483647, %v961_v36 }
 0xe8e   :  { %v974_v59 = vor.u32 1.1754944e-38, %v973_v37  ;;  %vm972_vm5 = vcmp.eq.f32.partialorder %v971_v42, 8.507059e+37 }
 0xe92   :  { %v1782_v55 = vpop.eup %1781 }
 0xe93   :  { %v963_v27 = vmul.f32 %v1782_v55, %v961_v36  ;;  %vm968_vm2 = vweird.f32 %v1782_v55 }
 0xe94   :  { %vm969_vm4 = vmor %vm967_vm3, %vm968_vm2 }
 0xe95   :  { %v964_v56 = vsub.f32 1.0, %v963_v27 }
 0xe97   :  { %v965_v32 = vmul.f32 %v1782_v55, %v964_v56 }
 0xe99   :  { %v966_v57 = vadd.f32 %v1782_v55, %v965_v32 }
 0xe9b   :  { %v970_v58 = vsel %vm969_vm4, %v1782_v55, %v966_v57 }
 0xe9c   :  { %v975_v62 = vsel %vm972_vm5, %v974_v59, %v970_v58 }
 0xe9d   :  { %v989_v7 = vsub.f32 1.0, %v975_v62  ;;  %v995_v8 = vmul.f32 %v975_v62, %v2314_v2 }
 0xef3   :  { %v980_v60 = vpop.permute.xlu1 %979 }
 0xef4   :  { %v982_v63 = vmul.f32 %v980_v60, %v975_v62 }
 0xef6   :  { %984 = vrot.lane.b32.xlu2 %v982_v63, %s1886_s19 }
 0xf50   :  { %v985_v0 = vpop.permute.xlu2 %984 }
 0xf51   :  { %v987_v1 = vadd.f32 %v985_v0, %v2232_v35 }
 0xf53   :  { %1783 = vtanh.f32 %v987_v1 }
 0xf59   :  { %v1784_v4 = vpop.eup %1783 }
 0xf5a   :  { %991 = vrot.lane.b32.xlu0 %v1784_v4, %s1888_s5 }
 0xfcc   :  { %v992_v51 = vpop.permute.xlu0 %991 }
 0xfcd   :  { %v994_v11 = vmul.f32 %v992_v51, %v989_v7 }
 0xfcf   :  { %v2351_v12 = vadd.f32 %v995_v8, %v994_v11 }
 0xfd1   :  { %998 = vst [vmem:[#allocation1] ss:$4 sm:$0xff] %v2351_v12 }
 0xfd8   :  { %v2354_v13 = vld.sshfl [vmem:[#allocation1] sm:$0xff pattern:$0x73625140] }
 0xfd9   :  { %1005 = vst [vmem:[#allocation1] ss:$4 sm:$0xff] %v2332_v45 }
 0xfe0   :  { %v1006_v14 = vld.sshfl [vmem:[#allocation1] sm:$0xff pattern:$0x73625140] }
 0xfe1   :  { %1007 = vrot.lane.b32.xlu1 %v1006_v14, %s1888_s5 }
0x1053   :  { %v1008_v35 = vpop.permute.xlu1 %1007 }
0x1054   :  { %1709 = vmatmul.msk.f32.vlgmr.msrb.gmra.mxu0 %vm137_vm1, %v1008_v35 }
0x10d1   :  { %v1028_v15 = vpop.f32.mrf.mxu0 }
0x10d2   :  { %v1051_v10 = vadd.f32 %v1028_v15, %v2209_v9  ;;  %v1031_v2 = vadd.f32 %v1028_v15, %v2216_v17 }
0x10d4   :  { %1053 = vrot.lane.b32.xlu2 %v1051_v10, %s1886_s19  ;;  %v1710_v20 = vmul.f32 -1.442695, %v1031_v2 }
0x10d6   :  { %1785 = vpow2.f32 %v1710_v20 }
0x10dc   :  { %v1786_v16 = vpop.eup %1785 }
0x10dd   :  { %v1035_v21 = vadd.f32 1.0, %v1786_v16 }
0x10df   :  { %1787 = vrcp.f32 %v1035_v21  ;;  %v1047_v31 = vand.u32 2147483648, %v1035_v21  ;;  %vm1041_vm7 = vweird.f32 %v1035_v21  ;;  %v1045_v30 = vand.u32 2147483647, %v1035_v21 }
0x10e1   :  { %v1048_v5 = vor.u32 1.1754944e-38, %v1047_v31  ;;  %vm1046_vm9 = vcmp.eq.f32.partialorder %v1045_v30, 8.507059e+37 }
0x10e5   :  { %v1788_v19 = vpop.eup %1787 }
0x10e6   :  { %v1037_v22 = vmul.f32 %v1788_v19, %v1035_v21  ;;  %vm1042_vm6 = vweird.f32 %v1788_v19 }
0x10e7   :  { %vm1043_vm8 = vmor %vm1041_vm7, %vm1042_vm6 }
0x10e8   :  { %v1038_v23 = vsub.f32 1.0, %v1037_v22 }
0x10ea   :  { %v1039_v24 = vmul.f32 %v1788_v19, %v1038_v23 }
0x10ec   :  { %v1040_v25 = vadd.f32 %v1788_v19, %v1039_v24 }
0x10ee   :  { %v1044_v33 = vsel %vm1043_vm8, %v1788_v19, %v1040_v25 }
0x10ef   :  { %v1049_v39 = vsel %vm1046_vm9, %v1048_v5, %v1044_v33 }
0x10f0   :  { %v1063_v47 = vsub.f32 1.0, %v1049_v39  ;;  %v1069_v26 = vmul.f32 %v1049_v39, %v2332_v45  ;;  %v378_v45 = vrot.slane %v2227_v28, 6 }
0x112e   :  { %v1054_v34 = vpop.permute.xlu2 %1053 }
0x112f   :  { %v1056_v40 = vmul.f32 %v1054_v34, %v1049_v39 }
0x1131   :  { %1058 = vrot.lane.b32.xlu0 %v1056_v40, %s1886_s19 }
0x11a3   :  { %v1059_v41 = vpop.permute.xlu0 %1058 }
0x11a4   :  { %v1061_v43 = vadd.f32 %v1059_v41, %v2216_v17 }
0x11a6   :  { %1789 = vtanh.f32 %v1061_v43 }
0x11ac   :  { %v1790_v44 = vpop.eup %1789 }
0x11ad   :  { %1065 = vrot.lane.b32.xlu1 %v1790_v44, %s1888_s5 }
0x121f   :  { %v1066_v48 = vpop.permute.xlu1 %1065 }
0x1220   :  { %v1068_v49 = vmul.f32 %v1066_v48, %v1063_v47 }
0x1222   :  { %v2366_v50 = vadd.f32 %v1069_v26, %v1068_v49 }
0x1224   :  { %1072 = vst [vmem:[#allocation1] ss:$4 sm:$0xff] %v2366_v50 }
0x122b   :  { %v2369_v53 = vld.sshfl [vmem:[#allocation1] sm:$0xff pattern:$0x73625140] }
0x122c   :  { %1079 = vst [vmem:[#allocation1] ss:$4 sm:$0xff] %v2351_v12 }
0x1233   :  { %v1080_v54 = vld.sshfl [vmem:[#allocation1] sm:$0xff pattern:$0x73625140] }
0x1234   :  { %1081 = vrot.lane.b32.xlu2 %v1080_v54, %s1888_s5 }
0x128e   :  { %v1082_v36 = vpop.permute.xlu2 %1081 }
0x128f   :  { %1711 = vmatmul.msk.f32.vlgmr.msrb.gmra.mxu1 %vm137_vm1, %v1082_v36 }
0x130c   :  { %v1102_v55 = vpop.f32.mrf.mxu1 }
0x130d   :  { %v1125_v27 = vadd.f32 %v1102_v55, %v2218_v18  ;;  %v1105_v56 = vadd.f32 %v1102_v55, %v378_v45 }
0x130f   :  { %1127 = vrot.lane.b32.xlu0 %v1125_v27, %s1886_s19  ;;  %v1712_v32 = vmul.f32 -1.442695, %v1105_v56 }
0x1311   :  { %1791 = vpow2.f32 %v1712_v32 }
0x1317   :  { %v1792_v57 = vpop.eup %1791 }
0x1318   :  { %v1109_v37 = vadd.f32 1.0, %v1792_v57 }
0x131a   :  { %1793 = vrcp.f32 %v1109_v37  ;;  %v1121_v63 = vand.u32 2147483648, %v1109_v37  ;;  %vm1115_vm11 = vweird.f32 %v1109_v37  ;;  %v1119_v0 = vand.u32 2147483647, %v1109_v37 }
0x131c   :  { %v1122_v4 = vor.u32 1.1754944e-38, %v1121_v63  ;;  %vm1120_vm13 = vcmp.eq.f32.partialorder %v1119_v0, 8.507059e+37 }
0x1320   :  { %v1794_v42 = vpop.eup %1793 }
0x1321   :  { %v1111_v58 = vmul.f32 %v1794_v42, %v1109_v37  ;;  %vm1116_vm10 = vweird.f32 %v1794_v42 }
0x1322   :  { %vm1117_vm12 = vmor %vm1115_vm11, %vm1116_vm10 }
0x1323   :  { %v1112_v59 = vsub.f32 1.0, %v1111_v58 }
0x1325   :  { %v1113_v60 = vmul.f32 %v1794_v42, %v1112_v59 }
0x1327   :  { %v1114_v62 = vadd.f32 %v1794_v42, %v1113_v60 }
0x1329   :  { %v1118_v1 = vsel %vm1117_vm12, %v1794_v42, %v1114_v62 }
0x132a   :  { %v1123_v51 = vsel %vm1120_vm13, %v1122_v4, %v1118_v1 }
0x132b   :  { %v1137_v15 = vsub.f32 1.0, %v1123_v51  ;;  %v1143_v2 = vmul.f32 %v1123_v51, %v2351_v12  ;;  %v228_v12 = vrot.slane %v2216_v17, 2 }
0x1381   :  { %v1128_v7 = vpop.permute.xlu0 %1127 }
0x1382   :  { %v1130_v8 = vmul.f32 %v1128_v7, %v1123_v51 }
0x1384   :  { %1132 = vrot.lane.b32.xlu1 %v1130_v8, %s1886_s19 }
0x13f6   :  { %v1133_v11 = vpop.permute.xlu1 %1132 }
0x13f7   :  { %v1135_v14 = vadd.f32 %v1133_v11, %v378_v45 }
0x13f9   :  { %1795 = vtanh.f32 %v1135_v14 }
0x13ff   :  { %v1796_v35 = vpop.eup %1795 }
0x1400   :  { %1139 = vrot.lane.b32.xlu2 %v1796_v35, %s1888_s5 }
0x145a   :  { %v1140_v10 = vpop.permute.xlu2 %1139 }
0x145b   :  { %v1142_v20 = vmul.f32 %v1140_v10, %v1137_v15 }
0x145d   :  { %v2380_v16 = vadd.f32 %v1143_v2, %v1142_v20 }
0x145f   :  { %1146 = vst [vmem:[#allocation1] ss:$4 sm:$0xff] %v2380_v16 }
0x1466   :  { %v2383_v21 = vld.sshfl [vmem:[#allocation1] sm:$0xff pattern:$0x73625140] }
0x1467   :  { %1153 = vst [vmem:[#allocation1] ss:$4 sm:$0xff] %v2366_v50 }
0x146e   :  { %v1154_v19 = vld.sshfl [vmem:[#allocation1] sm:$0xff pattern:$0x73625140] }
0x146f   :  { %1155 = vrot.lane.b32.xlu0 %v1154_v19, %s1888_s5 }
0x14e1   :  { %v1156_v22 = vpop.permute.xlu0 %1155 }
0x14e2   :  { %1713 = vmatmul.msk.f32.vlgmr.msrb.gmra.mxu2 %vm137_vm1, %v1156_v22 }
0x1565   :  { %v1176_v23 = vpop.f32.mrf.mxu2 }
0x1566   :  { %v1199_v24 = vadd.f32 %v1176_v23, %v2209_v9  ;;  %v1179_v25 = vadd.f32 %v1176_v23, %v228_v12 }
0x1568   :  { %1201 = vrot.lane.b32.xlu1 %v1199_v24, %s1886_s19  ;;  %v1714_v31 = vmul.f32 -1.442695, %v1179_v25 }
0x156a   :  { %1797 = vpow2.f32 %v1714_v31 }
0x1570   :  { %v1798_v30 = vpop.eup %1797 }
0x1571   :  { %v1183_v33 = vadd.f32 1.0, %v1798_v30 }
0x1573   :  { %1799 = vrcp.f32 %v1183_v33  ;;  %v1195_v43 = vand.u32 2147483648, %v1183_v33  ;;  %vm1189_vm15 = vweird.f32 %v1183_v33  ;;  %v1193_v44 = vand.u32 2147483647, %v1183_v33 }
0x1575   :  { %v1196_v48 = vor.u32 1.1754944e-38, %v1195_v43  ;;  %vm1194_vm3 = vcmp.eq.f32.partialorder %v1193_v44, 8.507059e+37 }
0x1579   :  { %v1800_v5 = vpop.eup %1799 }
0x157a   :  { %v1185_v34 = vmul.f32 %v1800_v5, %v1183_v33  ;;  %vm1190_vm14 = vweird.f32 %v1800_v5 }
0x157b   :  { %vm1191_vm2 = vmor %vm1189_vm15, %vm1190_vm14 }
0x157c   :  { %v1186_v39 = vsub.f32 1.0, %v1185_v34 }
0x157e   :  { %v1187_v40 = vmul.f32 %v1800_v5, %v1186_v39 }
0x1580   :  { %v1188_v41 = vadd.f32 %v1800_v5, %v1187_v40 }
0x1582   :  { %v1192_v47 = vsel %vm1191_vm2, %v1800_v5, %v1188_v41 }
0x1583   :  { %v1197_v49 = vsel %vm1194_vm3, %v1196_v48, %v1192_v47 }
0x1584   :  { %v1211_v45 = vsub.f32 1.0, %v1197_v49  ;;  %v1217_v32 = vmul.f32 %v1197_v49, %v2366_v50  ;;  %v377_v50 = vrot.slane %v2227_v28, 4 }
0x15da   :  { %v1202_v26 = vpop.permute.xlu1 %1201 }
0x15db   :  { %v1204_v54 = vmul.f32 %v1202_v26, %v1197_v49 }
0x15dd   :  { %1206 = vrot.lane.b32.xlu2 %v1204_v54, %s1886_s19 }
0x1637   :  { %v1207_v36 = vpop.permute.xlu2 %1206 }
0x1638   :  { %v1209_v55 = vadd.f32 %v1207_v36, %v228_v12 }
0x163a   :  { %1801 = vtanh.f32 %v1209_v55 }
0x1640   :  { %v1802_v27 = vpop.eup %1801 }
0x1641   :  { %1213 = vrot.lane.b32.xlu0 %v1802_v27, %s1888_s5 }
0x16b3   :  { %v1214_v56 = vpop.permute.xlu0 %1213 }
0x16b4   :  { %v1216_v57 = vmul.f32 %v1214_v56, %v1211_v45 }
0x16b6   :  { %v2394_v37 = vadd.f32 %v1217_v32, %v1216_v57 }
0x16b8   :  { %1220 = vst [vmem:[#allocation1] ss:$4 sm:$0xff] %v2394_v37 }
0x16bf   :  { %v2397_v42 = vld.sshfl [vmem:[#allocation1] sm:$0xff pattern:$0x73625140] }
0x16c0   :  { %1227 = vst [vmem:[#allocation1] ss:$4 sm:$0xff] %v2380_v16 }
0x16c7   :  { %v1228_v58 = vld.sshfl [vmem:[#allocation1] sm:$0xff pattern:$0x73625140] }
0x16c8   :  { %1229 = vrot.lane.b32.xlu1 %v1228_v58, %s1888_s5 }
0x173a   :  { %v1230_v59 = vpop.permute.xlu1 %1229 }
0x173b   :  { %1715 = vmatmul.msk.f32.vlgmr.msrb.gmra.mxu3 %vm137_vm1, %v1230_v59 }
0x17be   :  { %v1250_v60 = vpop.f32.mrf.mxu3 }
0x17bf   :  { %v1273_v62 = vadd.f32 %v1250_v60, %v2218_v18  ;;  %v1253_v63 = vadd.f32 %v1250_v60, %v377_v50 }
0x17c1   :  { %1275 = vrot.lane.b32.xlu2 %v1273_v62, %s1886_s19  ;;  %v1716_v0 = vmul.f32 -1.442695, %v1253_v63 }
0x17c3   :  { %1803 = vpow2.f32 %v1716_v0 }
0x17c9   :  { %v1804_v1 = vpop.eup %1803 }
0x17ca   :  { %v1257_v4 = vadd.f32 1.0, %v1804_v1 }
0x17cc   :  { %1805 = vrcp.f32 %v1257_v4  ;;  %v1269_v35 = vand.u32 2147483648, %v1257_v4  ;;  %vm1263_vm5 = vweird.f32 %v1257_v4  ;;  %v1267_v15 = vand.u32 2147483647, %v1257_v4 }
0x17ce   :  { %v1270_v2 = vor.u32 1.1754944e-38, %v1269_v35  ;;  %vm1268_vm7 = vcmp.eq.f32.partialorder %v1267_v15, 8.507059e+37 }
0x17d2   :  { %v1806_v7 = vpop.eup %1805 }
0x17d3   :  { %v1259_v51 = vmul.f32 %v1806_v7, %v1257_v4  ;;  %vm1264_vm4 = vweird.f32 %v1806_v7 }
0x17d4   :  { %vm1265_vm6 = vmor %vm1263_vm5, %vm1264_vm4 }
0x17d5   :  { %v1260_v8 = vsub.f32 1.0, %v1259_v51 }
0x17d7   :  { %v1261_v11 = vmul.f32 %v1806_v7, %v1260_v8 }
0x17d9   :  { %v1262_v14 = vadd.f32 %v1806_v7, %v1261_v11 }
0x17db   :  { %v1266_v10 = vsel %vm1265_vm6, %v1806_v7, %v1262_v14 }
0x17dc   :  { %v1271_v19 = vsel %vm1268_vm7, %v1270_v2, %v1266_v10 }
0x17dd   :  { %v1285_v25 = vsub.f32 1.0, %v1271_v19  ;;  %v1291_v30 = vmul.f32 %v1271_v19, %v2380_v16  ;;  %v229_v16 = vrot.slane %v2216_v17, 4 }
0x181b   :  { %v1276_v20 = vpop.permute.xlu2 %1275 }
0x181c   :  { %v1278_v22 = vmul.f32 %v1276_v20, %v1271_v19 }
0x181e   :  { %1280 = vrot.lane.b32.xlu0 %v1278_v22, %s1886_s19 }
0x1890   :  { %v1281_v23 = vpop.permute.xlu0 %1280 }
0x1891   :  { %v1283_v24 = vadd.f32 %v1281_v23, %v377_v50 }
0x1893   :  { %1807 = vtanh.f32 %v1283_v24 }
0x1899   :  { %v1808_v12 = vpop.eup %1807 }
0x189a   :  { %1287 = vrot.lane.b32.xlu1 %v1808_v12, %s1888_s5 }
0x190c   :  { %v1288_v31 = vpop.permute.xlu1 %1287 }
0x190d   :  { %v1290_v33 = vmul.f32 %v1288_v31, %v1285_v25 }
0x190f   :  { %v2408_v5 = vadd.f32 %v1291_v30, %v1290_v33 }
0x1911   :  { %1294 = vst [vmem:[#allocation1] ss:$4 sm:$0xff] %v2408_v5 }
0x1918   :  { %v2411_v34 = vld.sshfl [vmem:[#allocation1] sm:$0xff pattern:$0x73625140] }
0x1919   :  { %1301 = vst [vmem:[#allocation1] ss:$4 sm:$0xff] %v2394_v37 }
0x1920   :  { %v1302_v39 = vld.sshfl [vmem:[#allocation1] sm:$0xff pattern:$0x73625140] }
0x1921   :  { %1303 = vrot.lane.b32.xlu2 %v1302_v39, %s1888_s5 }
0x197b   :  { %v1304_v40 = vpop.permute.xlu2 %1303 }
0x197c   :  { %1717 = vmatmul.msk.f32.vlgmr.msra.gmra.mxu0 %vm137_vm1, %v1304_v40 }
0x19f9   :  { %v1324_v41 = vpop.f32.mrf.mxu0 }
0x19fa   :  { %v1347_v43 = vadd.f32 %v1324_v41, %v2209_v9  ;;  %v1327_v44 = vadd.f32 %v1324_v41, %v229_v16 }
0x19fc   :  { %1349 = vrot.lane.b32.xlu0 %v1347_v43, %s1886_s19  ;;  %v1718_v47 = vmul.f32 -1.442695, %v1327_v44 }
0x19fe   :  { %1809 = vpow2.f32 %v1718_v47 }
0x1a04   :  { %v1810_v48 = vpop.eup %1809 }
0x1a05   :  { %v1331_v26 = vadd.f32 1.0, %v1810_v48 }
0x1a07   :  { %1811 = vrcp.f32 %v1331_v26  ;;  %v1343_v45 = vand.u32 2147483648, %v1331_v26  ;;  %vm1337_vm9 = vweird.f32 %v1331_v26  ;;  %v1341_v56 = vand.u32 2147483647, %v1331_v26 }
0x1a09   :  { %v1344_v57 = vor.u32 1.1754944e-38, %v1343_v45  ;;  %vm1342_vm11 = vcmp.eq.f32.partialorder %v1341_v56, 8.507059e+37 }
0x1a0d   :  { %v1812_v49 = vpop.eup %1811 }
0x1a0e   :  { %v1333_v54 = vmul.f32 %v1812_v49, %v1331_v26  ;;  %vm1338_vm8 = vweird.f32 %v1812_v49 }
0x1a0f   :  { %vm1339_vm10 = vmor %vm1337_vm9, %vm1338_vm8 }
0x1a10   :  { %v1334_v36 = vsub.f32 1.0, %v1333_v54 }
0x1a12   :  { %v1335_v55 = vmul.f32 %v1812_v49, %v1334_v36 }
0x1a14   :  { %v1336_v27 = vadd.f32 %v1812_v49, %v1335_v55 }
0x1a16   :  { %v1340_v32 = vsel %vm1339_vm10, %v1812_v49, %v1336_v27 }
0x1a17   :  { %v1345_v59 = vsel %vm1342_vm11, %v1344_v57, %v1340_v32 }
0x1a18   :  { %v1359_v0 = vsub.f32 1.0, %v1345_v59  ;;  %v1365_v4 = vmul.f32 %v1345_v59, %v2394_v37  ;;  %v376_v37 = vrot.slane %v2227_v28, 2 }
0x1a6e   :  { %v1350_v58 = vpop.permute.xlu0 %1349 }
0x1a6f   :  { %v1352_v60 = vmul.f32 %v1350_v58, %v1345_v59 }
0x1a71   :  { %1354 = vrot.lane.b32.xlu1 %v1352_v60, %s1886_s19 }
0x1ae3   :  { %v1355_v62 = vpop.permute.xlu1 %1354 }
0x1ae4   :  { %v1357_v50 = vadd.f32 %v1355_v62, %v229_v16 }
0x1ae6   :  { %1813 = vtanh.f32 %v1357_v50 }
0x1aec   :  { %v1814_v63 = vpop.eup %1813 }
0x1aed   :  { %1361 = vrot.lane.b32.xlu2 %v1814_v63, %s1888_s5 }
0x1b47   :  { %v1362_v1 = vpop.permute.xlu2 %1361 }
0x1b48   :  { %v1364_v7 = vmul.f32 %v1362_v1, %v1359_v0 }
0x1b4a   :  { %v2422_v51 = vadd.f32 %v1365_v4, %v1364_v7 }
0x1b4c   :  { %1368 = vst [vmem:[#allocation1] ss:$4 sm:$0xff] %v2422_v51 }
0x1b53   :  { %v2425_v8 = vld.sshfl [vmem:[#allocation1] sm:$0xff pattern:$0x73625140] }
0x1b54   :  { %1375 = vst [vmem:[#allocation1] ss:$4 sm:$0xff] %v2408_v5 }
0x1b5b   :  { %v1376_v11 = vld.sshfl [vmem:[#allocation1] sm:$0xff pattern:$0x73625140] }
0x1b5c   :  { %1377 = vrot.lane.b32.xlu0 %v1376_v11, %s1888_s5 }
0x1bce   :  { %v1378_v14 = vpop.permute.xlu0 %1377 }
0x1bcf   :  { %1719 = vmatmul.msk.f32.vlgmr.msra.gmra.mxu1 %vm137_vm1, %v1378_v14 }
0x1c4c   :  { %v1398_v35 = vpop.f32.mrf.mxu1 }
0x1c4d   :  { %v1421_v15 = vadd.f32 %v1398_v35, %v2218_v18  ;;  %v1401_v10 = vadd.f32 %v1398_v35, %v376_v37 }
0x1c4f   :  { %1423 = vrot.lane.b32.xlu1 %v1421_v15, %s1886_s19  ;;  %v1720_v2 = vmul.f32 -1.442695, %v1401_v10 }
0x1c51   :  { %1815 = vpow2.f32 %v1720_v2 }
0x1c57   :  { %v1816_v20 = vpop.eup %1815 }
0x1c58   :  { %v1405_v19 = vadd.f32 1.0, %v1816_v20 }
0x1c5a   :  { %1817 = vrcp.f32 %v1405_v19  ;;  %v1417_v31 = vand.u32 2147483648, %v1405_v19  ;;  %vm1411_vm13 = vweird.f32 %v1405_v19  ;;  %v1415_v30 = vand.u32 2147483647, %v1405_v19 }
0x1c5c   :  { %v1418_v39 = vor.u32 1.1754944e-38, %v1417_v31  ;;  %vm1416_vm15 = vcmp.eq.f32.partialorder %v1415_v30, 8.507059e+37 }
0x1c60   :  { %v1818_v22 = vpop.eup %1817 }
0x1c61   :  { %v1407_v23 = vmul.f32 %v1818_v22, %v1405_v19  ;;  %vm1412_vm12 = vweird.f32 %v1818_v22 }
0x1c62   :  { %vm1413_vm14 = vmor %vm1411_vm13, %vm1412_vm12 }
0x1c63   :  { %v1408_v24 = vsub.f32 1.0, %v1407_v23 }
0x1c65   :  { %v1409_v12 = vmul.f32 %v1818_v22, %v1408_v24 }
0x1c67   :  { %v1410_v25 = vadd.f32 %v1818_v22, %v1409_v12 }
0x1c69   :  { %v1414_v33 = vsel %vm1413_vm14, %v1818_v22, %v1410_v25 }
0x1c6a   :  { %v1419_v41 = vsel %vm1416_vm15, %v1418_v39, %v1414_v33 }
0x1c6b   :  { %v1433_v48 = vsub.f32 1.0, %v1419_v41  ;;  %v1439_v49 = vmul.f32 %v1419_v41, %v2408_v5  ;;  %v230_v5 = vrot.slane %v2216_v17, 6 }
0x1cc1   :  { %v1424_v40 = vpop.permute.xlu1 %1423 }
0x1cc2   :  { %v1426_v43 = vmul.f32 %v1424_v40, %v1419_v41 }
0x1cc4   :  { %1428 = vrot.lane.b32.xlu2 %v1426_v43, %s1886_s19 }
0x1d1e   :  { %v1429_v16 = vpop.permute.xlu2 %1428 }
0x1d1f   :  { %v1431_v44 = vadd.f32 %v1429_v16, %v376_v37 }
0x1d21   :  { %1819 = vtanh.f32 %v1431_v44 }
0x1d27   :  { %v1820_v47 = vpop.eup %1819 }
0x1d28   :  { %1435 = vrot.lane.b32.xlu0 %v1820_v47, %s1888_s5 }
0x1d9a   :  { %v1436_v26 = vpop.permute.xlu0 %1435 }
0x1d9b   :  { %v1438_v54 = vmul.f32 %v1436_v26, %v1433_v48 }
0x1d9d   :  { %v2436_v36 = vadd.f32 %v1439_v49, %v1438_v54 }
0x1d9f   :  { %1442 = vst [vmem:[#allocation1] ss:$4 sm:$0xff] %v2436_v36 }
0x1da6   :  { %v2439_v55 = vld.sshfl [vmem:[#allocation1] sm:$0xff pattern:$0x73625140] }
0x1da7   :  { %1449 = vst [vmem:[#allocation1] ss:$4 sm:$0xff] %v2422_v51 }
0x1dae   :  { %v1450_v27 = vld.sshfl [vmem:[#allocation1] sm:$0xff pattern:$0x73625140] }
0x1daf   :  { %1451 = vrot.lane.b32.xlu1 %v1450_v27, %s1888_s5 }
0x1e21   :  { %v1452_v45 = vpop.permute.xlu1 %1451 }
0x1e22   :  { %1721 = vmatmul.msk.f32.vlgmr.msra.gmra.mxu2 %vm137_vm1, %v1452_v45 }
0x1ea5   :  { %v1472_v56 = vpop.f32.mrf.mxu2 }
0x1ea6   :  { %v1495_v32 = vadd.f32 %v1472_v56, %v2209_v9  ;;  %v1475_v57 = vadd.f32 %v1472_v56, %v230_v5 }
0x1ea8   :  { %1497 = vrot.lane.b32.xlu2 %v1495_v32, %s1886_s19  ;;  %v1722_v58 = vmul.f32 -1.442695, %v1475_v57 }
0x1eaa   :  { %1821 = vpow2.f32 %v1722_v58 }
0x1eb0   :  { %v1822_v59 = vpop.eup %1821 }
0x1eb1   :  { %v1479_v60 = vadd.f32 1.0, %v1822_v59 }
0x1eb3   :  { %1823 = vrcp.f32 %v1479_v60  ;;  %v1491_v4 = vand.u32 2147483648, %v1479_v60  ;;  %vm1485_vm3 = vweird.f32 %v1479_v60  ;;  %v1489_v7 = vand.u32 2147483647, %v1479_v60 }
0x1eb5   :  { %v1492_v11 = vor.u32 1.1754944e-38, %v1491_v4  ;;  %vm1490_vm5 = vcmp.eq.f32.partialorder %v1489_v7, 8.507059e+37 }
0x1eb9   :  { %v1824_v62 = vpop.eup %1823 }
0x1eba   :  { %v1481_v50 = vmul.f32 %v1824_v62, %v1479_v60  ;;  %vm1486_vm2 = vweird.f32 %v1824_v62 }
0x1ebb   :  { %vm1487_vm4 = vmor %vm1485_vm3, %vm1486_vm2 }
0x1ebc   :  { %v1482_v63 = vsub.f32 1.0, %v1481_v50 }
0x1ebe   :  { %v1483_v0 = vmul.f32 %v1824_v62, %v1482_v63 }
0x1ec0   :  { %v1484_v1 = vadd.f32 %v1824_v62, %v1483_v0 }
0x1ec2   :  { %v1488_v9 = vsel %vm1487_vm4, %v1824_v62, %v1484_v1 }
0x1ec3   :  { %v1493_v14 = vsel %vm1490_vm5, %v1492_v11, %v1488_v9 }
0x1ec4   :  { %v1507_v2 = vsub.f32 1.0, %v1493_v14  ;;  %v1513_v19 = vmul.f32 %v1493_v14, %v2422_v51 }
0x1f02   :  { %v1498_v17 = vpop.permute.xlu2 %1497 }
0x1f03   :  { %v1500_v35 = vmul.f32 %v1498_v17, %v1493_v14 }
0x1f05   :  { %1502 = vrot.lane.b32.xlu0 %v1500_v35, %s1886_s19 }
0x1f77   :  { %v1503_v15 = vpop.permute.xlu0 %1502 }
0x1f78   :  { %v1505_v37 = vadd.f32 %v1503_v15, %v230_v5 }
0x1f7a   :  { %1825 = vtanh.f32 %v1505_v37 }
0x1f80   :  { %v1826_v10 = vpop.eup %1825 }
0x1f81   :  { %1509 = vrot.lane.b32.xlu1 %v1826_v10, %s1888_s5 }
0x1ff3   :  { %v1510_v20 = vpop.permute.xlu1 %1509 }
0x1ff4   :  { %v1512_v22 = vmul.f32 %v1510_v20, %v1507_v2 }
0x1ff6   :  { %v2450_v23 = vadd.f32 %v1513_v19, %v1512_v22 }
0x1ff8   :  { %1516 = vst [vmem:[#allocation1] ss:$4 sm:$0xff] %v2450_v23 }
0x1fff   :  { %v2453_v24 = vld.sshfl [vmem:[#allocation1] sm:$0xff pattern:$0x73625140] }
0x2000   :  { %1523 = vst [vmem:[#allocation1] ss:$4 sm:$0xff] %v2436_v36 }
0x2007   :  { %v1524_v12 = vld.sshfl [vmem:[#allocation1] sm:$0xff pattern:$0x73625140] }
0x2008   :  { %1525 = vrot.lane.b32.xlu2 %v1524_v12, %s1888_s5 }
0x2062   :  { %v1526_v25 = vpop.permute.xlu2 %1525 }
0x2063   :  { %1723 = vmatmul.msk.f32.vlgmr.msra.gmra.mxu3 %vm137_vm1, %v1526_v25 }
0x20e6   :  { %v1546_v31 = vpop.f32.mrf.mxu3 }
0x20e7   :  { %v1569_v30 = vadd.f32 %v1546_v31, %v2218_v18  ;;  %v1549_v51 = vadd.f32 %v1546_v31, %v2227_v28 }
0x20e9   :  { %1571 = vrot.lane.b32.xlu0 %v1569_v30, %s1886_s19  ;;  %v1724_v18 = vmul.f32 -1.442695, %v1549_v51 }
0x20eb   :  { %1827 = vpow2.f32 %v1724_v18 }
0x20f1   :  { %477 = vrot.lane.b32.xlu0 %v2244_v38, %s1888_s5  ;;  %v1828_v33 = vpop.eup %1827 }
0x20f2   :  { %v1553_v39 = vadd.f32 1.0, %v1828_v33 }
0x20f4   :  { %1829 = vrcp.f32 %v1553_v39  ;;  %vm1559_vm6 = vweird.f32 %v1553_v39  ;;  %v1563_v16 = vand.u32 2147483647, %v1553_v39 }
0x20f6   :  { %vm1564_vm8 = vcmp.eq.f32.partialorder %v1563_v16, 8.507059e+37 }
0x20f9   :  { %704 = vrot.lane.b32.xlu0 %v2281_v52, %s1888_s5 }
0x20fa   :  { %v1830_v38 = vpop.eup %1829 }
0x20fb   :  { %v1555_v40 = vmul.f32 %v1830_v38, %v1553_v39  ;;  %vm1560_vm1 = vweird.f32 %v1830_v38 }
0x20fc   :  { %vm1561_vm7 = vmor %vm1559_vm6, %vm1560_vm1 }
0x20fd   :  { %v1556_v41 = vsub.f32 1.0, %v1555_v40 }
0x20ff   :  { %v1557_v52 = vmul.f32 %v1830_v38, %v1556_v41 }
0x2101   :  { %926 = vrot.lane.b32.xlu0 %v2335_v46, %s1888_s5  ;;  %v1558_v43 = vadd.f32 %v1830_v38, %v1557_v52  ;;  %v1565_v46 = vand.u32 2147483648, %v1553_v39 }
0x2103   :  { %v1566_v44 = vor.u32 1.1754944e-38, %v1565_v46 }
0x2109   :  { %1148 = vrot.lane.b32.xlu0 %v2383_v21, %s1888_s5  ;;  %v1562_v21 = vsel %vm1561_vm7, %v1830_v38, %v1558_v43 }
0x210a   :  { %v1567_v47 = vsel %vm1564_vm8, %v1566_v44, %v1562_v21 }
0x210b   :  { %v1587_v57 = vmul.f32 %v1567_v47, %v2436_v36 }
0x2111   :  { %1370 = vrot.lane.b32.xlu0 %v2425_v8, %s1888_s5 }
0x215b   :  { %v1572_v8 = vpop.permute.xlu0 %1571 }
0x215c   :  { %v1574_v48 = vmul.f32 %v1572_v8, %v1567_v47 }
0x215e   :  { %1576 = vrot.lane.b32.xlu1 %v1574_v48, %s1886_s19 }
0x2163   :  { %v478_v26 = vpop.permute.xlu0 %477 }
0x2164   :  { %481 = vst.msk [vmem:[#allocation2] sm:$0x3] %vm84_vm0, %v478_v26 }
0x2166   :  { %556 = vrot.lane.b32.xlu1 %v2247_v61, %s1888_s5 }
0x216b   :  { %v705_v49 = vpop.permute.xlu0 %704 }
0x216c   :  { %708 = vst.msk [vmem:[#allocation4 + $0xc] sm:$0x3] %vm84_vm0, %v705_v49 }
0x216e   :  { %778 = vrot.lane.b32.xlu1 %v2299_v29, %s1888_s5 }
0x2173   :  { %v927_v54 = vpop.permute.xlu0 %926 }
0x2174   :  { %930 = vst.msk [vmem:[#allocation2 + $0x6] sm:$0x3] %vm84_vm0, %v927_v54 }
0x2176   :  { %1000 = vrot.lane.b32.xlu1 %v2354_v13, %s1888_s5 }
0x217b   :  { %v1149_v27 = vpop.permute.xlu0 %1148 }
0x217c   :  { %1152 = vst.msk [vmem:[#allocation4 + $0x6] sm:$0x3] %vm84_vm0, %v1149_v27 }
0x217e   :  { %1222 = vrot.lane.b32.xlu1 %v2397_v42, %s1888_s5 }
0x2183   :  { %v1371_v45 = vpop.permute.xlu0 %1370 }
0x2184   :  { %1374 = vst.msk [vmem:[#allocation2 + $0xc] sm:$0x3] %vm84_vm0, %v1371_v45 }
0x2186   :  { %1444 = vrot.lane.b32.xlu1 %v2439_v55, %s1888_s5 }
0x21d0   :  { %v1577_v61 = vpop.permute.xlu1 %1576 }
0x21d1   :  { %v1579_v29 = vadd.f32 %v1577_v61, %v2227_v28 }
0x21d3   :  { %1831 = vtanh.f32 %v1579_v29 }
0x21d8   :  { %v557_v56 = vpop.permute.xlu1 %556 }
0x21d9   :  { %v1832_v32 = vpop.eup %1831  ;;  %560 = vst.msk [vmem:[#allocation4 + $0xe] sm:$0x3] %vm84_vm0, %v557_v56 }
0x21da   :  { %1583 = vrot.lane.b32.xlu2 %v1832_v32, %s1888_s5 }
0x21e0   :  { %v779_v13 = vpop.permute.xlu1 %778 }
0x21e1   :  { %782 = vst.msk [vmem:[#allocation2 + $0x4] sm:$0x3] %vm84_vm0, %v779_v13 }
0x21e2   :  { %630 = vrot.lane.b32.xlu2 %v2263_v6, %s1888_s5  ;;  %v1581_v6 = vsub.f32 1.0, %v1567_v47 }
0x21e8   :  { %v1001_v42 = vpop.permute.xlu1 %1000 }
0x21e9   :  { %1004 = vst.msk [vmem:[#allocation4 + $0x8] sm:$0x3] %vm84_vm0, %v1001_v42 }
0x21ea   :  { %852 = vrot.lane.b32.xlu2 %v2317_v3, %s1888_s5 }
0x21f0   :  { %v1223_v28 = vpop.permute.xlu1 %1222 }
0x21f1   :  { %1226 = vst.msk [vmem:[#allocation2 + $0xa] sm:$0x3] %vm84_vm0, %v1223_v28 }
0x21f2   :  { %1074 = vrot.lane.b32.xlu2 %v2369_v53, %s1888_s5 }
0x21f8   :  { %v1445_v55 = vpop.permute.xlu1 %1444 }
0x21f9   :  { %1448 = vst.msk [vmem:[#allocation4 + $0x2] sm:$0x3] %vm84_vm0, %v1445_v55 }
0x21fa   :  { %1296 = vrot.lane.b32.xlu2 %v2411_v34, %s1888_s5 }
0x2202   :  { %1518 = vrot.lane.b32.xlu2 %v2453_v24, %s1888_s5 }
0x2234   :  { %v1584_v5 = vpop.permute.xlu2 %1583 }
0x2235   :  { %v1586_v3 = vmul.f32 %v1584_v5, %v1581_v6 }
0x2237   :  { %v1588_v58 = vadd.f32 %v1587_v57, %v1586_v3 }
0x2239   :  { %1590 = vst [vmem:[#allocation1] ss:$4 sm:$0xff] %v1588_v58 }
0x223c   :  { %v631_v59 = vpop.permute.xlu2 %630 }
0x223d   :  { %634 = vst.msk [vmem:[#allocation2 + $0x2] sm:$0x3] %vm84_vm0, %v631_v59 }
0x2240   :  { %v1591_v53 = vld.sshfl [vmem:[#allocation1] sm:$0xff pattern:$0x73625140] }
0x2241   :  { %1592 = vrot.lane.b32.xlu0 %v1591_v53, %s1888_s5  ;;  %1596 = vst [vmem:[#allocation1] ss:$4 sm:$0xff] %v2450_v23 }
0x2244   :  { %v853_v60 = vpop.permute.xlu2 %852 }
0x2245   :  { %856 = vst.msk [vmem:[#allocation4 + $0xa] sm:$0x3] %vm84_vm0, %v853_v60 }
0x2248   :  { %v1597_v34 = vld.sshfl [vmem:[#allocation1] sm:$0xff pattern:$0x73625140] }
0x2249   :  { %1598 = vrot.lane.b32.xlu1 %v1597_v34, %s1888_s5  ;;  %1602 = vst [vmem:[#allocation1] ss:$4 sm:$0xff] %v1588_v58 }
0x224c   :  { %v1075_v62 = vpop.permute.xlu2 %1074 }
0x224d   :  { %1078 = vst.msk [vmem:[#allocation2 + $0x8] sm:$0x3] %vm84_vm0, %v1075_v62 }
0x2250   :  { %v1603_v36 = vld.sshfl [vmem:[#allocation1] sm:$0xff pattern:$0x73625140] }
0x2251   :  { %1604 = vrot.lane.b32.xlu2 %v1603_v36, %s1888_s5 }
0x2254   :  { %v1297_v50 = vpop.permute.xlu2 %1296 }
0x2255   :  { %1300 = vst.msk [vmem:[#allocation4 + $0x4] sm:$0x3] %vm84_vm0, %v1297_v50 }
0x225c   :  { %v1519_v63 = vpop.permute.xlu2 %1518 }
0x225d   :  { %1522 = vst.msk [vmem:[#allocation2 + $0xe] sm:$0x3] %vm84_vm0, %v1519_v63 }
0x225e   :  { %1620 = dma.vmem_to_hbm [thread:$0]  %s1613_s3, 256, %s1615_s11, [#allocation3], %s1887_s28, %s1887_s28, %s1890_s7  }
0x22ab   :  { %v1605_v0 = vpop.permute.xlu2 %1604 }
0x22ac   :  { %1725 = vst.msk [vmem:[%s2543_s10 + $0x2] sm:$0x3] %vm84_vm0, %v1605_v0 }
0x22b3   :  { %v1593_v1 = vpop.permute.xlu0 %1592 }
0x22b4   :  { %1595 = vst.msk [vmem:[#allocation4] sm:$0x3] %vm84_vm0, %v1593_v1 }
0x22b5   :  { %1637 = dma.vmem_to_hbm [thread:$0]  %s1630_s6, 256, %s1632_s15, [#allocation5], %s1887_s28, %s1887_s28, %s1890_s7  }
0x22bb   :  { %v1599_v4 = vpop.permute.xlu1 %1598 }
0x22bc   :  { %1601 = vst.msk [vmem:[%s2543_s10] sm:$0x3] %vm84_vm0, %v1599_v4 }
0x22bd   :  { %1881 = dma.done.wait [#allocation3], 256  }
0x22be   :  { %1882 = vsyncadd [#allocation3], 4294967040 }
0x22bf   :  { %1883 = dma.done.wait [#allocation5], 256  }
0x22c0   :  { %1884 = vsyncadd [#allocation5], 4294967040 }
0x22c1   :  { %1650 = vsyncpa [#allocation3], 1 }
0x22c2   :  { %1651 = vsyncpa [#allocation5], 1 }

</bundles_post_ra>
